<compile_context>
chip_gen: v7x
topology: tpu7x:2x2x1
jax: 0.10.0
libtpu: 0.0.40
codegen_flags: <defaults>
</compile_context>

<pallas_src>
import functools

import jax
import jax.numpy as jnp
from jax.experimental import pallas as pl
from jax.experimental.pallas import tpu as pltpu


# ----------------------------------------------------------------------------
# In-kernel helpers
# ----------------------------------------------------------------------------
def _group_layer_norm(x, gamma, beta, groups, eps):
    # x: (rows, C) f32, gamma/beta: (1, C).  Per-group mean/var over the
    # d = C // groups channels, (x - mean) / (sqrt(var) + eps) like the module.
    d = x.shape[-1] // groups
    cols = []
    for gi in range(groups):
        xg = x[:, gi * d:(gi + 1) * d]
        mean = jnp.mean(xg, axis=-1, keepdims=True)
        var = jnp.mean((xg - mean) ** 2, axis=-1, keepdims=True)
        cols.append((xg - mean) / (jnp.sqrt(var) + eps))
    xn = cols[0] if groups == 1 else jnp.concatenate(cols, axis=-1)
    return xn * gamma + beta


def _gelu_tanh(x):
    # tanh-approx GELU: tanh goes to the EUP slot, freeing the VALU in the FF
    # epilogue (per perf review; |err| vs exact erf GELU ~ 5e-4).
    c = 0.7978845608028654  # sqrt(2/pi)
    return 0.5 * x * (1.0 + jnp.tanh(c * (x + 0.044715 * x * x * x)))


# ----------------------------------------------------------------------------
# Kernel 1: GroupLayerNorm + KV projection (whole sequence, bf16 output)
# ----------------------------------------------------------------------------
def kv_proj_kernel(x_ref, g_ref, b_ref, wkv_ref, kv_ref, *, groups, eps):
    x = x_ref[0].astype(jnp.float32)                      # (tn, C)
    xn = _group_layer_norm(x, g_ref[...], b_ref[...], groups, eps)
    kv_ref[0] = jnp.dot(xn.astype(jnp.bfloat16), wkv_ref[...],
                        preferred_element_type=jnp.float32
                        ).astype(kv_ref.dtype)            # (tn, 2*inner)


# ----------------------------------------------------------------------------
# Kernel 2: flash attention + out-proj + residual + GLN2 + grouped FF + residual
# ----------------------------------------------------------------------------
def attn_ff_kernel(x_ref, g1_ref, b1_ref, wq_ref, kv_ref, wo_ref, bo_ref,
                   g2_ref, b2_ref, w1_ref, bb1_ref, w2_ref, bb2_ref,
                   o_ref, q_sc, m_sc, l_sc, acc_sc,
                   *, groups, heads, dim_head, causal, eps, tq, tk, exp_bf16):
    f32, bf16 = jnp.float32, jnp.bfloat16
    gh = groups * heads
    inner = gh * dim_head
    qi = pl.program_id(1)
    ki = pl.program_id(2)
    nk = pl.num_programs(2)

    # --- first KV step for this (batch, q-tile): GLN1 + Q projection, init ---
    @pl.when(ki == 0)
    def _init():
        x = x_ref[0].astype(f32)                          # (tq, C)
        xn = _group_layer_norm(x, g1_ref[...], b1_ref[...], groups, eps)
        # attention scale already folded into wq; cast once, store bf16
        q_sc[...] = jnp.dot(xn.astype(bf16), wq_ref[...],
                            preferred_element_type=f32).astype(bf16)
        m_sc[...] = jnp.full_like(m_sc, -1e30)            # finite sentinel
        l_sc[...] = jnp.zeros_like(l_sc)
        acc_sc[...] = jnp.zeros_like(acc_sc)

    q_start = qi * tq
    kv_start = ki * tk

    def _process():
        kv = kv_ref[0]                                    # (tk, 2*inner) bf16
        k_all = kv[:, :inner]
        v_all = kv[:, inner:]
        if causal:
            qpos = q_start + jax.lax.broadcasted_iota(jnp.int32, (tq, tk), 0)
            kpos = kv_start + jax.lax.broadcasted_iota(jnp.int32, (tq, tk), 1)
            banned = kpos > qpos
        for h in range(gh):
            sl = slice(h * dim_head, (h + 1) * dim_head)
            # QK^T via dot_general on the last dims (no materialized K^T)
            s = jax.lax.dot_general(
                q_sc[:, sl], k_all[:, sl],
                dimension_numbers=(((1,), (1,)), ((), ())),
                preferred_element_type=f32)               # (tq, tk)
            if causal:
                s = jnp.where(banned, -1e30, s)
            m_prev = m_sc[:, h:h + 1]
            m_new = jnp.maximum(m_prev, jnp.max(s, axis=-1, keepdims=True))
            alpha = jnp.exp(m_prev - m_new)
            if exp_bf16:
                p = jnp.exp((s - m_new).astype(bf16))     # bf16 EUP (v6e/v7x)
            else:
                p = jnp.exp(s - m_new)
            l_sc[:, h:h + 1] = (alpha * l_sc[:, h:h + 1]
                                + jnp.sum(p.astype(f32), axis=-1,
                                          keepdims=True))
            acc_sc[:, sl] = alpha * acc_sc[:, sl] + jnp.dot(
                p.astype(bf16), v_all[:, sl], preferred_element_type=f32)
            m_sc[:, h:h + 1] = m_new

    if causal:
        # skip KV tiles that lie entirely above the causal diagonal
        @pl.when(kv_start <= q_start + (tq - 1))
        def _():
            _process()
    else:
        _process()

    # --- last KV step: out-proj + residual + GLN2 + grouped FF + residual ---
    @pl.when(ki == nk - 1)
    def _epilogue():
        x = x_ref[0].astype(f32)                          # residual (tq, C)
        inv = pl.reciprocal(l_sc[...], approx=True)       # (tq, gh)
        cols = [acc_sc[:, h * dim_head:(h + 1) * dim_head] * inv[:, h:h + 1]
                for h in range(gh)]
        ctx = cols[0] if gh == 1 else jnp.concatenate(cols, axis=-1)
        # single K=inner output projection (replaces gh K=dim_head matmuls)
        attn_out = jnp.dot(ctx.astype(bf16), wo_ref[...],
                           preferred_element_type=f32) + bo_ref[...]
        y = attn_out + x                                  # residual 1
        yn = _group_layer_norm(y, g2_ref[...], b2_ref[...], groups, eps)
        # TODO(synk): for groups > 2 switch the block-diagonal matmuls below
        # to a per-group contraction to avoid G-1 zero blocks on the MXU.
        hmid = jnp.dot(yn.astype(bf16), w1_ref[...],
                       preferred_element_type=f32) + bb1_ref[...]
        hmid = _gelu_tanh(hmid)
        ff = jnp.dot(hmid.astype(bf16), w2_ref[...],
                     preferred_element_type=f32) + bb2_ref[...]
        o_ref[0] = (y + ff).astype(o_ref.dtype)           # residual 2


# ----------------------------------------------------------------------------
# Config / tiling helpers
# ----------------------------------------------------------------------------
def _tpu_config():
    kind = ""
    try:
        kind = jax.devices()[0].device_kind.lower()
    except Exception:
        pass
    is_v7 = "v7" in kind
    is_new = is_v7 or ("v6" in kind)
    if is_v7:                       # 64 MiB physical VMEM -> smaller tiles
        vmem, q_tile, kv_tile = 40 * 1024 * 1024, 256, 512
    elif ("v5" in kind) or ("v6" in kind):   # 128 MiB physical VMEM
        vmem, q_tile, kv_tile = 64 * 1024 * 1024, 512, 512
    else:                           # unknown chip: conservative defaults
        vmem, q_tile, kv_tile = None, 256, 512
    return dict(q_tile=q_tile, kv_tile=kv_tile, vmem=vmem, exp_bf16=is_new)


def _pick_tile(n, target, step=16):
    if n <= target:
        return n
    t = (target // step) * step
    while t >= step:
        if n % t == 0:
            return t
        t -= step
    return n


def _compiler_params(dim_sem, vmem):
    kw = dict(dimension_semantics=dim_sem)
    if vmem is not None:
        kw["vmem_limit_bytes"] = vmem
    return pltpu.CompilerParams(**kw)


# ----------------------------------------------------------------------------
# pallas_call wrappers
# ----------------------------------------------------------------------------
def kv_projection(x, g1, b1, wkv, *, groups, eps, tile, vmem):
    B, N, C = x.shape
    two_inner = wkv.shape[1]
    tn = _pick_tile(N, tile)
    kern = functools.partial(kv_proj_kernel, groups=groups, eps=eps)
    return pl.pallas_call(
        kern,
        out_shape=jax.ShapeDtypeStruct((B, N, two_inner), jnp.bfloat16),
        grid=(B, N // tn),
        in_specs=[pl.BlockSpec((1, tn, C), lambda b, t: (b, t, 0)),
                  pl.BlockSpec((1, C), lambda b, t: (0, 0)),
                  pl.BlockSpec((1, C), lambda b, t: (0, 0)),
                  pl.BlockSpec((C, two_inner), lambda b, t: (0, 0))],
        out_specs=pl.BlockSpec((1, tn, two_inner), lambda b, t: (b, t, 0)),
        compiler_params=_compiler_params(("parallel", "parallel"), vmem),
    )(x, g1, b1, wkv)


def attn_ff(x, kv, prep, *, heads, groups, dim_head, causal, eps,
            tq, tk, vmem, exp_bf16):
    B, N, C = x.shape
    inner = heads * groups * dim_head
    H = prep["w1bd"].shape[1]
    tq = _pick_tile(N, tq)
    tk = _pick_tile(N, tk)
    gh = heads * groups
    kern = functools.partial(
        attn_ff_kernel, groups=groups, heads=heads, dim_head=dim_head,
        causal=causal, eps=eps, tq=tq, tk=tk, exp_bf16=exp_bf16)
    return pl.pallas_call(
        kern,
        out_shape=jax.ShapeDtypeStruct((B, N, C), x.dtype),
        grid=(B, N // tq, N // tk),
        in_specs=[
            pl.BlockSpec((1, tq, C), lambda b, q, k: (b, q, 0)),          # x
            pl.BlockSpec((1, C), lambda b, q, k: (0, 0)),                 # g1
            pl.BlockSpec((1, C), lambda b, q, k: (0, 0)),                 # b1
            pl.BlockSpec((C, inner), lambda b, q, k: (0, 0)),             # wq
            pl.BlockSpec((1, tk, 2 * inner), lambda b, q, k: (b, k, 0)),  # kv
            pl.BlockSpec((inner, C), lambda b, q, k: (0, 0)),             # wo
            pl.BlockSpec((1, C), lambda b, q, k: (0, 0)),                 # bo
            pl.BlockSpec((1, C), lambda b, q, k: (0, 0)),                 # g2
            pl.BlockSpec((1, C), lambda b, q, k: (0, 0)),                 # b2
            pl.BlockSpec((C, H), lambda b, q, k: (0, 0)),                 # w1bd
            pl.BlockSpec((1, H), lambda b, q, k: (0, 0)),                 # bb1
            pl.BlockSpec((H, C), lambda b, q, k: (0, 0)),                 # w2bd
            pl.BlockSpec((1, C), lambda b, q, k: (0, 0)),                 # bb2
        ],
        out_specs=pl.BlockSpec((1, tq, C), lambda b, q, k: (b, q, 0)),
        scratch_shapes=[
            pltpu.VMEM((tq, inner), jnp.bfloat16),   # Q (scaled, bf16)
            pltpu.VMEM((tq, gh), jnp.float32),       # running row-max per head
            pltpu.VMEM((tq, gh), jnp.float32),       # running denom per head
            pltpu.VMEM((tq, inner), jnp.float32),    # context accumulator
        ],
        compiler_params=_compiler_params(
            ("parallel", "parallel", "arbitrary"), vmem),
    )(x, prep["g1"], prep["b1"], prep["wq"], kv, prep["wo"], prep["bo"],
      prep["g2"], prep["b2"], prep["w1bd"], prep["bb1"], prep["w2bd"],
      prep["bb2"])


def prepare_params(params, *, dim_head):
    """One-time weight prep (hoisted out of the jitted forward): fold the
    attention scale into wq, cast matmul weights to bf16, flatten the grouped
    FF weights to block-diagonal dense form, reshape affines/biases to (1, .)."""
    bf16, f32 = jnp.bfloat16, jnp.float32
    scale = dim_head ** -0.5

    def block_diag(w):
        G, di, do = w.shape
        out = jnp.zeros((G * di, G * do), w.dtype)
        for g in range(G):
            out = out.at[g * di:(g + 1) * di, g * do:(g + 1) * do].set(w[g])
        return out

    return {
        "g1": params["g1"].reshape(1, -1).astype(f32),
        "b1": params["b1"].reshape(1, -1).astype(f32),
        "wq": (params["wq"] * scale).astype(bf16),
        "wkv": params["wkv"].astype(bf16),
        "wo": params["wo"].astype(bf16),
        "bo": params["bo"].reshape(1, -1).astype(f32),
        "g2": params["g2"].reshape(1, -1).astype(f32),
        "b2": params["b2"].reshape(1, -1).astype(f32),
        "w1bd": block_diag(params["w1"]).astype(bf16),
        "bb1": params["bb1"].reshape(1, -1).astype(f32),
        "w2bd": block_diag(params["w2"]).astype(bf16),
        "bb2": params["bb2"].reshape(1, -1).astype(f32),
    }


def transformer_block(x_bcn, prep, *, heads, groups, dim_head, causal,
                      eps=1e-5, q_tile=None, kv_tile=None):
    # TODO(synk): optional key-padding `mask` / `context` args of Attention
    # (None inside TransformerBlock.forward) are not implemented.
    cfg = _tpu_config()
    tq = q_tile if q_tile is not None else cfg["q_tile"]
    tk = kv_tile if kv_tile is not None else cfg["kv_tile"]
    # TODO(synk): fold these boundary layout transposes into the kernels
    # (read (1, C, tn) blocks and transpose on the XLU) to save two HBM passes.
    x = jnp.transpose(x_bcn, (0, 2, 1))            # (B, C, N) -> (B, N, C)
    kv = kv_projection(x, prep["g1"], prep["b1"], prep["wkv"],
                       groups=groups, eps=eps, tile=max(tq, tk),
                       vmem=cfg["vmem"])
    y = attn_ff(x, kv, prep, heads=heads, groups=groups, dim_head=dim_head,
                causal=causal, eps=eps, tq=tq, tk=tk, vmem=cfg["vmem"],
                exp_bf16=cfg["exp_bf16"])
    return jnp.transpose(y, (0, 2, 1))             # back to (B, C, N)


# ----------------------------------------------------------------------------
# Pure-JAX reference (mirrors the PyTorch module) for a sanity check
# ----------------------------------------------------------------------------
def reference_block(x_bcn, params, *, heads, groups, dim_head, causal,
                    eps=1e-5):
    x = jnp.transpose(x_bcn, (0, 2, 1)).astype(jnp.float32)
    B, N, C = x.shape
    inner = dim_head * heads * groups

    def gln(t, g, b):
        d = C // groups
        t4 = t.reshape(B, N, groups, d)
        mean = t4.mean(-1, keepdims=True)
        var = ((t4 - mean) ** 2).mean(-1, keepdims=True)
        t4 = (t4 - mean) / (jnp.sqrt(var) + eps)
        return t4.reshape(B, N, C) * g.reshape(1, 1, C) + b.reshape(1, 1, C)

    xn = gln(x, params["g1"], params["b1"])
    q = xn @ params["wq"]
    kv = xn @ params["wkv"]
    k, v = kv[..., :inner], kv[..., inner:]

    def split(t):
        t = t.reshape(B, N, groups, heads, dim_head)
        return jnp.transpose(t, (0, 2, 3, 1, 4)).reshape(-1, N, dim_head)

    qh = split(q) * dim_head ** -0.5
    kh, vh = split(k), split(v)
    sim = jnp.einsum("bid,bjd->bij", qh, kh)
    if causal:
        cm = jnp.triu(jnp.ones((N, N), bool), 1)
        sim = jnp.where(cm, -jnp.finfo(jnp.float32).max, sim)
    attn = jax.nn.softmax(sim, axis=-1)
    oh = jnp.einsum("bij,bjd->bid", attn, vh)
    o = oh.reshape(B, groups, heads, N, dim_head)
    o = jnp.transpose(o, (0, 3, 1, 2, 4)).reshape(B, N, inner)
    x = o @ params["wo"] + params["bo"] + x

    xn = gln(x, params["g2"], params["b2"])
    d = C // groups
    outs = []
    for gi in range(groups):
        xg = xn[..., gi * d:(gi + 1) * d]
        h = jnp.einsum("bnd,dk->bnk", xg, params["w1"][gi]) + params["bb1"][gi]
        h = jax.nn.gelu(h, approximate=False)
        outs.append(jnp.einsum("bnk,kd->bnd", h, params["w2"][gi])
                    + params["bb2"][gi])
    x = jnp.concatenate(outs, -1) + x
    return jnp.transpose(x, (0, 2, 1))


# ----------------------------------------------------------------------------
# Main
# ----------------------------------------------------------------------------
if __name__ == "__main__":
    B, N = 2, 64                      # batch, sequence length
    DIM, GROUPS = 64, 2               # per-group channels, streams
    HEADS, DIM_HEAD = 4, 16
    FF_MULT = 4
    CAUSAL = True

    C = DIM * GROUPS                  # 128
    INNER = DIM_HEAD * HEADS * GROUPS  # 128
    HID_G = DIM * FF_MULT             # 256 hidden channels per group

    key = jax.random.PRNGKey(0)
    ks = jax.random.split(key, 13)
    params = {
        "g1": 1.0 + 0.1 * jax.random.normal(ks[9], (1, C), jnp.float32),
        "b1": 0.05 * jax.random.normal(ks[10], (1, C), jnp.float32),
        "wq": jax.random.normal(ks[0], (C, INNER), jnp.float32) * 0.05,
        "wkv": jax.random.normal(ks[1], (C, 2 * INNER), jnp.float32) * 0.05,
        "wo": jax.random.normal(ks[2], (INNER, C), jnp.float32) * 0.05,
        "bo": jax.random.normal(ks[3], (C,), jnp.float32) * 0.01,
        "g2": 1.0 + 0.1 * jax.random.normal(ks[11], (1, C), jnp.float32),
        "b2": 0.05 * jax.random.normal(ks[12], (1, C), jnp.float32),
        "w1": jax.random.normal(ks[4], (GROUPS, DIM, HID_G), jnp.float32) * 0.05,
        "bb1": jax.random.normal(ks[5], (GROUPS, 1, HID_G), jnp.float32) * 0.01,
        "w2": jax.random.normal(ks[6], (GROUPS, HID_G, DIM), jnp.float32) * 0.05,
        "bb2": jax.random.normal(ks[7], (GROUPS, 1, DIM), jnp.float32) * 0.01,
    }

    x = jax.random.normal(ks[8], (B, C, N), jnp.float32)   # PyTorch (B, C, N)

    # one-time weight prep (hoisted out of the jitted forward)
    prep = prepare_params(params, dim_head=DIM_HEAD)

    # small tiles in the test so the flash q/kv tiling + causal skip paths
    # are exercised (multiple q tiles, multiple kv tiles)
    fwd = jax.jit(functools.partial(transformer_block, heads=HEADS,
                                    groups=GROUPS, dim_head=DIM_HEAD,
                                    causal=CAUSAL, q_tile=16, kv_tile=32))
    out = jax.block_until_ready(fwd(x, prep))

    with jax.default_matmul_precision("highest"):
        ref = reference_block(x, params, heads=HEADS, groups=GROUPS,
                              dim_head=DIM_HEAD, causal=CAUSAL)
    ref = jax.block_until_ready(ref)

    assert out.shape == (B, C, N)
    assert bool(jnp.all(jnp.isfinite(out)))
    # bf16 MXU operands, tanh GELU and approx softmax reciprocal => loose tol
    assert bool(jnp.allclose(out, ref, atol=2e-2, rtol=2e-2)), float(
        jnp.max(jnp.abs(out - ref)))

    print("KERNEL_OK")
</pallas_src>

<mosaic_0001>
module attributes {stable_mosaic.version = 11 : i64} {
  func.func @kv_proj_kernel(%arg0: i32, %arg1: i32, %arg2: memref<1x32x128xf32, #tpu.memory_space<vmem>>, %arg3: memref<1x128xf32, #tpu.memory_space<vmem>>, %arg4: memref<1x128xf32, #tpu.memory_space<vmem>>, %arg5: memref<128x256xbf16, #tpu.memory_space<vmem>>, %arg6: memref<1x32x256xbf16, #tpu.memory_space<vmem>>) attributes {dimension_semantics = [#tpu.dimension_semantics<parallel>, #tpu.dimension_semantics<parallel>], iteration_bounds = array<i64: 2, 2>, scalar_prefetch = 0 : i64, scratch_operands = 0 : i64, tpu.core_type = #tpu.core_type<tc>, window_params = [{transform_indices = @transform_0, window_bounds = array<i64: 1, 32, 128>}, {pipeline_mode = #tpu.pipeline_mode<synchronous>, transform_indices = @transform_1, window_bounds = array<i64: 1, 128>}, {pipeline_mode = #tpu.pipeline_mode<synchronous>, transform_indices = @transform_2, window_bounds = array<i64: 1, 128>}, {pipeline_mode = #tpu.pipeline_mode<synchronous>, transform_indices = @transform_3, window_bounds = array<i64: 128, 256>}, {transform_indices = @transform_4, window_bounds = array<i64: 1, 32, 256>}]} {
    %c0 = arith.constant 0 : index
    %c0_0 = arith.constant 0 : index
    %c0_1 = arith.constant 0 : index
    %0 = vector.load %arg2[%c0, %c0_0, %c0_1] : memref<1x32x128xf32, #tpu.memory_space<vmem>>, vector<1x32x128xf32>
    %1 = vector.shape_cast %0 : vector<1x32x128xf32> to vector<32x128xf32>
    %c0_2 = arith.constant 0 : index
    %c0_3 = arith.constant 0 : index
    %2 = vector.load %arg3[%c0_2, %c0_3] : memref<1x128xf32, #tpu.memory_space<vmem>>, vector<1x128xf32>
    %c0_4 = arith.constant 0 : index
    %c0_5 = arith.constant 0 : index
    %3 = vector.load %arg4[%c0_4, %c0_5] : memref<1x128xf32, #tpu.memory_space<vmem>>, vector<1x128xf32>
    %4 = vector.extract_strided_slice %1 {offsets = [0, 0], sizes = [32, 64], strides = [1, 1]} : vector<32x128xf32> to vector<32x64xf32>
    %cst = arith.constant dense<0.000000e+00> : vector<32xf32>
    %5 = vector.multi_reduction <add>, %4, %cst [1] : vector<32x64xf32> to vector<32xf32>
    %6 = vector.shape_cast %5 : vector<32xf32> to vector<32x1xf32>
    %cst_6 = arith.constant 6.400000e+01 : f32
    %7 = vector.broadcast %cst_6 : f32 to vector<32x1xf32>
    %8 = arith.divf %6, %7 : vector<32x1xf32>
    %9 = vector.broadcast %8 : vector<32x1xf32> to vector<32x64xf32>
    %10 = arith.subf %4, %9 : vector<32x64xf32>
    %11 = arith.mulf %10, %10 : vector<32x64xf32>
    %cst_7 = arith.constant dense<0.000000e+00> : vector<32xf32>
    %12 = vector.multi_reduction <add>, %11, %cst_7 [1] : vector<32x64xf32> to vector<32xf32>
    %13 = vector.shape_cast %12 : vector<32xf32> to vector<32x1xf32>
    %cst_8 = arith.constant 6.400000e+01 : f32
    %14 = vector.broadcast %cst_8 : f32 to vector<32x1xf32>
    %15 = arith.divf %13, %14 : vector<32x1xf32>
    %16 = vector.broadcast %8 : vector<32x1xf32> to vector<32x64xf32>
    %17 = arith.subf %4, %16 : vector<32x64xf32>
    %18 = math.sqrt %15 : vector<32x1xf32>
    %cst_9 = arith.constant 9.99999974E-6 : f32
    %19 = vector.broadcast %cst_9 : f32 to vector<32x1xf32>
    %20 = arith.addf %18, %19 : vector<32x1xf32>
    %21 = vector.broadcast %20 : vector<32x1xf32> to vector<32x64xf32>
    %22 = arith.divf %17, %21 : vector<32x64xf32>
    %23 = vector.extract_strided_slice %1 {offsets = [0, 64], sizes = [32, 64], strides = [1, 1]} : vector<32x128xf32> to vector<32x64xf32>
    %cst_10 = arith.constant dense<0.000000e+00> : vector<32xf32>
    %24 = vector.multi_reduction <add>, %23, %cst_10 [1] : vector<32x64xf32> to vector<32xf32>
    %25 = vector.shape_cast %24 : vector<32xf32> to vector<32x1xf32>
    %cst_11 = arith.constant 6.400000e+01 : f32
    %26 = vector.broadcast %cst_11 : f32 to vector<32x1xf32>
    %27 = arith.divf %25, %26 : vector<32x1xf32>
    %28 = vector.broadcast %27 : vector<32x1xf32> to vector<32x64xf32>
    %29 = arith.subf %23, %28 : vector<32x64xf32>
    %30 = arith.mulf %29, %29 : vector<32x64xf32>
    %cst_12 = arith.constant dense<0.000000e+00> : vector<32xf32>
    %31 = vector.multi_reduction <add>, %30, %cst_12 [1] : vector<32x64xf32> to vector<32xf32>
    %32 = vector.shape_cast %31 : vector<32xf32> to vector<32x1xf32>
    %cst_13 = arith.constant 6.400000e+01 : f32
    %33 = vector.broadcast %cst_13 : f32 to vector<32x1xf32>
    %34 = arith.divf %32, %33 : vector<32x1xf32>
    %35 = vector.broadcast %27 : vector<32x1xf32> to vector<32x64xf32>
    %36 = arith.subf %23, %35 : vector<32x64xf32>
    %37 = math.sqrt %34 : vector<32x1xf32>
    %cst_14 = arith.constant 9.99999974E-6 : f32
    %38 = vector.broadcast %cst_14 : f32 to vector<32x1xf32>
    %39 = arith.addf %37, %38 : vector<32x1xf32>
    %40 = vector.broadcast %39 : vector<32x1xf32> to vector<32x64xf32>
    %41 = arith.divf %36, %40 : vector<32x64xf32>
    %42 = tpu.concatenate %22, %41 in 1 : vector<32x64xf32>, vector<32x64xf32> -> vector<32x128xf32>
    %43 = vector.broadcast %2 : vector<1x128xf32> to vector<32x128xf32>
    %44 = arith.mulf %42, %43 : vector<32x128xf32>
    %45 = vector.broadcast %3 : vector<1x128xf32> to vector<32x128xf32>
    %46 = arith.addf %44, %45 : vector<32x128xf32>
    %47 = arith.truncf %46 : vector<32x128xf32> to vector<32x128xbf16>
    %c0_15 = arith.constant 0 : index
    %c0_16 = arith.constant 0 : index
    %48 = vector.load %arg5[%c0_15, %c0_16] : memref<128x256xbf16, #tpu.memory_space<vmem>>, vector<128x256xbf16>
    %cst_17 = arith.constant dense<0.000000e+00> : vector<32x256xf32>
    %49 = tpu.matmul %47, %48, %cst_17 {dimension_numbers = #tpu.dot_dimension_numbers<[1], [0], [0], [1], [0, 0, 1, 1], [], []>} : vector<32x128xbf16>, vector<128x256xbf16>, vector<32x256xf32> -> vector<32x256xf32>
    %50 = arith.truncf %49 : vector<32x256xf32> to vector<32x256xbf16>
    %c0_18 = arith.constant 0 : index
    %c0_19 = arith.constant 0 : index
    %c0_20 = arith.constant 0 : index
    %51 = vector.load %arg6[%c0_18, %c0_19, %c0_20] : memref<1x32x256xbf16, #tpu.memory_space<vmem>>, vector<1x32x256xbf16>
    %52 = vector.shape_cast %51 : vector<1x32x256xbf16> to vector<32x256xbf16>
    %53 = vector.shape_cast %50 : vector<32x256xbf16> to vector<1x32x256xbf16>
    tpu.vector_store %arg6[%c0_18, %c0_19, %c0_20], %53 {strides = array<i32>} : memref<1x32x256xbf16, #tpu.memory_space<vmem>>, vector<1x32x256xbf16>,
    return
  }
  func.func @transform_0(%arg0: i32, %arg1: i32) -> (i32, i32, i32) {
    %c0_i32 = arith.constant 0 : i32
    %c0_i32_0 = arith.constant 0 : i32
    return %arg0, %arg1, %c0_i32 : i32, i32, i32
  }
  func.func @transform_1(%arg0: i32, %arg1: i32) -> (i32, i32) {
    %c0_i32 = arith.constant 0 : i32
    %c0_i32_0 = arith.constant 0 : i32
    %c0_i32_1 = arith.constant 0 : i32
    return %c0_i32, %c0_i32_0 : i32, i32
  }
  func.func @transform_2(%arg0: i32, %arg1: i32) -> (i32, i32) {
    %c0_i32 = arith.constant 0 : i32
    %c0_i32_0 = arith.constant 0 : i32
    %c0_i32_1 = arith.constant 0 : i32
    return %c0_i32, %c0_i32_0 : i32, i32
  }
  func.func @transform_3(%arg0: i32, %arg1: i32) -> (i32, i32) {
    %c0_i32 = arith.constant 0 : i32
    %c0_i32_0 = arith.constant 0 : i32
    %c0_i32_1 = arith.constant 0 : i32
    return %c0_i32, %c0_i32_0 : i32, i32
  }
  func.func @transform_4(%arg0: i32, %arg1: i32) -> (i32, i32, i32) {
    %c0_i32 = arith.constant 0 : i32
    %c0_i32_0 = arith.constant 0 : i32
    return %arg0, %arg1, %c0_i32 : i32, i32, i32
  }
}

module attributes {stable_mosaic.version = 11 : i64} {
  func.func @attn_ff_kernel(%arg0: i32, %arg1: i32, %arg2: i32, %arg3: memref<1x16x128xf32, #tpu.memory_space<vmem>>, %arg4: memref<1x128xf32, #tpu.memory_space<vmem>>, %arg5: memref<1x128xf32, #tpu.memory_space<vmem>>, %arg6: memref<128x128xbf16, #tpu.memory_space<vmem>>, %arg7: memref<1x32x256xbf16, #tpu.memory_space<vmem>>, %arg8: memref<128x128xbf16, #tpu.memory_space<vmem>>, %arg9: memref<1x128xf32, #tpu.memory_space<vmem>>, %arg10: memref<1x128xf32, #tpu.memory_space<vmem>>, %arg11: memref<1x128xf32, #tpu.memory_space<vmem>>, %arg12: memref<128x512xbf16, #tpu.memory_space<vmem>>, %arg13: memref<1x512xf32, #tpu.memory_space<vmem>>, %arg14: memref<512x128xbf16, #tpu.memory_space<vmem>>, %arg15: memref<1x128xf32, #tpu.memory_space<vmem>>, %arg16: memref<1x16x128xf32, #tpu.memory_space<vmem>>, %arg17: memref<16x128xbf16, #tpu.memory_space<vmem>>, %arg18: memref<16x8xf32, #tpu.memory_space<vmem>>, %arg19: memref<16x8xf32, #tpu.memory_space<vmem>>, %arg20: memref<16x128xf32, #tpu.memory_space<vmem>>) attributes {dimension_semantics = [#tpu.dimension_semantics<parallel>, #tpu.dimension_semantics<parallel>, #tpu.dimension_semantics<arbitrary>], iteration_bounds = array<i64: 2, 4, 2>, scalar_prefetch = 0 : i64, scratch_operands = 4 : i64, tpu.core_type = #tpu.core_type<tc>, window_params = [{transform_indices = @transform_0, window_bounds = array<i64: 1, 16, 128>}, {pipeline_mode = #tpu.pipeline_mode<synchronous>, transform_indices = @transform_1, window_bounds = array<i64: 1, 128>}, {pipeline_mode = #tpu.pipeline_mode<synchronous>, transform_indices = @transform_2, window_bounds = array<i64: 1, 128>}, {pipeline_mode = #tpu.pipeline_mode<synchronous>, transform_indices = @transform_3, window_bounds = array<i64: 128, 128>}, {transform_indices = @transform_4, window_bounds = array<i64: 1, 32, 256>}, {pipeline_mode = #tpu.pipeline_mode<synchronous>, transform_indices = @transform_5, window_bounds = array<i64: 128, 128>}, {pipeline_mode = #tpu.pipeline_mode<synchronous>, transform_indices = @transform_6, window_bounds = array<i64: 1, 128>}, {pipeline_mode = #tpu.pipeline_mode<synchronous>, transform_indices = @transform_7, window_bounds = array<i64: 1, 128>}, {pipeline_mode = #tpu.pipeline_mode<synchronous>, transform_indices = @transform_8, window_bounds = array<i64: 1, 128>}, {pipeline_mode = #tpu.pipeline_mode<synchronous>, transform_indices = @transform_9, window_bounds = array<i64: 128, 512>}, {pipeline_mode = #tpu.pipeline_mode<synchronous>, transform_indices = @transform_10, window_bounds = array<i64: 1, 512>}, {pipeline_mode = #tpu.pipeline_mode<synchronous>, transform_indices = @transform_11, window_bounds = array<i64: 512, 128>}, {pipeline_mode = #tpu.pipeline_mode<synchronous>, transform_indices = @transform_12, window_bounds = array<i64: 1, 128>}, {transform_indices = @transform_13, window_bounds = array<i64: 1, 16, 128>}]} {
    %c0_i32 = arith.constant 0 : i32
    %0 = arith.cmpi eq, %arg2, %c0_i32 : i32
    %1 = arith.extui %0 : i1 to i32
    %c0_i32_0 = arith.constant 0 : i32
    %2 = arith.cmpi ne, %1, %c0_i32_0 : i32
    scf.if %2 {
      %c0 = arith.constant 0 : index
      %c0_3 = arith.constant 0 : index
      %c0_4 = arith.constant 0 : index
      %12 = vector.load %arg3[%c0, %c0_3, %c0_4] : memref<1x16x128xf32, #tpu.memory_space<vmem>>, vector<1x16x128xf32>
      %13 = vector.shape_cast %12 : vector<1x16x128xf32> to vector<16x128xf32>
      %c0_5 = arith.constant 0 : index
      %c0_6 = arith.constant 0 : index
      %14 = vector.load %arg4[%c0_5, %c0_6] : memref<1x128xf32, #tpu.memory_space<vmem>>, vector<1x128xf32>
      %c0_7 = arith.constant 0 : index
      %c0_8 = arith.constant 0 : index
      %15 = vector.load %arg5[%c0_7, %c0_8] : memref<1x128xf32, #tpu.memory_space<vmem>>, vector<1x128xf32>
      %16 = vector.extract_strided_slice %13 {offsets = [0, 0], sizes = [16, 64], strides = [1, 1]} : vector<16x128xf32> to vector<16x64xf32>
      %cst = arith.constant dense<0.000000e+00> : vector<16xf32>
      %17 = vector.multi_reduction <add>, %16, %cst [1] : vector<16x64xf32> to vector<16xf32>
      %18 = vector.shape_cast %17 : vector<16xf32> to vector<16x1xf32>
      %cst_9 = arith.constant 6.400000e+01 : f32
      %19 = vector.broadcast %cst_9 : f32 to vector<16x1xf32>
      %20 = arith.divf %18, %19 : vector<16x1xf32>
      %21 = vector.broadcast %20 : vector<16x1xf32> to vector<16x64xf32>
      %22 = arith.subf %16, %21 : vector<16x64xf32>
      %23 = arith.mulf %22, %22 : vector<16x64xf32>
      %cst_10 = arith.constant dense<0.000000e+00> : vector<16xf32>
      %24 = vector.multi_reduction <add>, %23, %cst_10 [1] : vector<16x64xf32> to vector<16xf32>
      %25 = vector.shape_cast %24 : vector<16xf32> to vector<16x1xf32>
      %cst_11 = arith.constant 6.400000e+01 : f32
      %26 = vector.broadcast %cst_11 : f32 to vector<16x1xf32>
      %27 = arith.divf %25, %26 : vector<16x1xf32>
      %28 = vector.broadcast %20 : vector<16x1xf32> to vector<16x64xf32>
      %29 = arith.subf %16, %28 : vector<16x64xf32>
      %30 = math.sqrt %27 : vector<16x1xf32>
      %cst_12 = arith.constant 9.99999974E-6 : f32
      %31 = vector.broadcast %cst_12 : f32 to vector<16x1xf32>
      %32 = arith.addf %30, %31 : vector<16x1xf32>
      %33 = vector.broadcast %32 : vector<16x1xf32> to vector<16x64xf32>
      %34 = arith.divf %29, %33 : vector<16x64xf32>
      %35 = vector.extract_strided_slice %13 {offsets = [0, 64], sizes = [16, 64], strides = [1, 1]} : vector<16x128xf32> to vector<16x64xf32>
      %cst_13 = arith.constant dense<0.000000e+00> : vector<16xf32>
      %36 = vector.multi_reduction <add>, %35, %cst_13 [1] : vector<16x64xf32> to vector<16xf32>
      %37 = vector.shape_cast %36 : vector<16xf32> to vector<16x1xf32>
      %cst_14 = arith.constant 6.400000e+01 : f32
      %38 = vector.broadcast %cst_14 : f32 to vector<16x1xf32>
      %39 = arith.divf %37, %38 : vector<16x1xf32>
      %40 = vector.broadcast %39 : vector<16x1xf32> to vector<16x64xf32>
      %41 = arith.subf %35, %40 : vector<16x64xf32>
      %42 = arith.mulf %41, %41 : vector<16x64xf32>
      %cst_15 = arith.constant dense<0.000000e+00> : vector<16xf32>
      %43 = vector.multi_reduction <add>, %42, %cst_15 [1] : vector<16x64xf32> to vector<16xf32>
      %44 = vector.shape_cast %43 : vector<16xf32> to vector<16x1xf32>
      %cst_16 = arith.constant 6.400000e+01 : f32
      %45 = vector.broadcast %cst_16 : f32 to vector<16x1xf32>
      %46 = arith.divf %44, %45 : vector<16x1xf32>
      %47 = vector.broadcast %39 : vector<16x1xf32> to vector<16x64xf32>
      %48 = arith.subf %35, %47 : vector<16x64xf32>
      %49 = math.sqrt %46 : vector<16x1xf32>
      %cst_17 = arith.constant 9.99999974E-6 : f32
      %50 = vector.broadcast %cst_17 : f32 to vector<16x1xf32>
      %51 = arith.addf %49, %50 : vector<16x1xf32>
      %52 = vector.broadcast %51 : vector<16x1xf32> to vector<16x64xf32>
      %53 = arith.divf %48, %52 : vector<16x64xf32>
      %54 = tpu.concatenate %34, %53 in 1 : vector<16x64xf32>, vector<16x64xf32> -> vector<16x128xf32>
      %55 = vector.broadcast %14 : vector<1x128xf32> to vector<16x128xf32>
      %56 = arith.mulf %54, %55 : vector<16x128xf32>
      %57 = vector.broadcast %15 : vector<1x128xf32> to vector<16x128xf32>
      %58 = arith.addf %56, %57 : vector<16x128xf32>
      %59 = arith.truncf %58 : vector<16x128xf32> to vector<16x128xbf16>
      %c0_18 = arith.constant 0 : index
      %c0_19 = arith.constant 0 : index
      %60 = vector.load %arg6[%c0_18, %c0_19] : memref<128x128xbf16, #tpu.memory_space<vmem>>, vector<128x128xbf16>
      %cst_20 = arith.constant dense<0.000000e+00> : vector<16x128xf32>
      %61 = tpu.matmul %59, %60, %cst_20 {dimension_numbers = #tpu.dot_dimension_numbers<[1], [0], [0], [1], [0, 0, 1, 1], [], []>} : vector<16x128xbf16>, vector<128x128xbf16>, vector<16x128xf32> -> vector<16x128xf32>
      %62 = arith.truncf %61 : vector<16x128xf32> to vector<16x128xbf16>
      %c0_21 = arith.constant 0 : index
      %c0_22 = arith.constant 0 : index
      %63 = vector.load %arg17[%c0_21, %c0_22] : memref<16x128xbf16, #tpu.memory_space<vmem>>, vector<16x128xbf16>
      tpu.vector_store %arg17[%c0_21, %c0_22], %62 {strides = array<i32>} : memref<16x128xbf16, #tpu.memory_space<vmem>>, vector<16x128xbf16>,
      %cst_23 = arith.constant -1.000000e+30 : f32
      %64 = vector.broadcast %cst_23 : f32 to vector<16x8xf32>
      %c0_24 = arith.constant 0 : index
      %c0_25 = arith.constant 0 : index
      %65 = vector.load %arg18[%c0_24, %c0_25] : memref<16x8xf32, #tpu.memory_space<vmem>>, vector<16x8xf32>
      tpu.vector_store %arg18[%c0_24, %c0_25], %64 {strides = array<i32>} : memref<16x8xf32, #tpu.memory_space<vmem>>, vector<16x8xf32>,
      %cst_26 = arith.constant 0.000000e+00 : f32
      %66 = vector.broadcast %cst_26 : f32 to vector<16x8xf32>
      %c0_27 = arith.constant 0 : index
      %c0_28 = arith.constant 0 : index
      %67 = vector.load %arg19[%c0_27, %c0_28] : memref<16x8xf32, #tpu.memory_space<vmem>>, vector<16x8xf32>
      tpu.vector_store %arg19[%c0_27, %c0_28], %66 {strides = array<i32>} : memref<16x8xf32, #tpu.memory_space<vmem>>, vector<16x8xf32>,
      %cst_29 = arith.constant 0.000000e+00 : f32
      %68 = vector.broadcast %cst_29 : f32 to vector<16x128xf32>
      %c0_30 = arith.constant 0 : index
      %c0_31 = arith.constant 0 : index
      %69 = vector.load %arg20[%c0_30, %c0_31] : memref<16x128xf32, #tpu.memory_space<vmem>>, vector<16x128xf32>
      tpu.vector_store %arg20[%c0_30, %c0_31], %68 {strides = array<i32>} : memref<16x128xf32, #tpu.memory_space<vmem>>, vector<16x128xf32>,
    } else {
    }
    %c16_i32 = arith.constant 16 : i32
    %3 = arith.muli %arg1, %c16_i32 : i32
    %c32_i32 = arith.constant 32 : i32
    %4 = arith.muli %arg2, %c32_i32 : i32
    %c15_i32 = arith.constant 15 : i32
    %5 = arith.addi %3, %c15_i32 : i32
    %6 = arith.cmpi sle, %4, %5 : i32
    %7 = arith.extui %6 : i1 to i32
    %c0_i32_1 = arith.constant 0 : i32
    %8 = arith.cmpi ne, %7, %c0_i32_1 : i32
    scf.if %8 {
      %c0 = arith.constant 0 : index
      %c0_3 = arith.constant 0 : index
      %c0_4 = arith.constant 0 : index
      %12 = vector.load %arg7[%c0, %c0_3, %c0_4] : memref<1x32x256xbf16, #tpu.memory_space<vmem>>, vector<1x32x256xbf16>
      %13 = vector.shape_cast %12 : vector<1x32x256xbf16> to vector<32x256xbf16>
      %14 = vector.extract_strided_slice %13 {offsets = [0, 0], sizes = [32, 128], strides = [1, 1]} : vector<32x256xbf16> to vector<32x128xbf16>
      %15 = vector.extract_strided_slice %13 {offsets = [0, 128], sizes = [32, 128], strides = [1, 1]} : vector<32x256xbf16> to vector<32x128xbf16>
      %16 = tpu.iota {dimensions = array<i32: 0>} : vector<16x32xi32>
      %17 = vector.broadcast %3 : i32 to vector<16x32xi32>
      %18 = arith.addi %17, %16 : vector<16x32xi32>
      %19 = tpu.iota {dimensions = array<i32: 1>} : vector<16x32xi32>
      %20 = vector.broadcast %4 : i32 to vector<16x32xi32>
      %21 = arith.addi %20, %19 : vector<16x32xi32>
      %22 = arith.cmpi sgt, %21, %18 : vector<16x32xi32>
      %c0_5 = arith.constant 0 : index
      %c0_6 = arith.constant 0 : index
      %23 = vector.load %arg17[%c0_5, %c0_6] : memref<16x128xbf16, #tpu.memory_space<vmem>>, vector<16x16xbf16>
      %24 = vector.extract_strided_slice %14 {offsets = [0, 0], sizes = [32, 16], strides = [1, 1]} : vector<32x128xbf16> to vector<32x16xbf16>
      %cst = arith.constant dense<0.000000e+00> : vector<16x32xf32>
      %25 = tpu.matmul %23, %24, %cst {dimension_numbers = #tpu.dot_dimension_numbers<[1], [1], [0], [0], [0, 0, 1, 0], [], []>} : vector<16x16xbf16>, vector<32x16xbf16>, vector<16x32xf32> -> vector<16x32xf32>
      %cst_7 = arith.constant -1.000000e+30 : f32
      %26 = vector.broadcast %cst_7 : f32 to vector<16x32xf32>
      %27 = arith.select %22, %26, %25 : vector<16x32xi1>, vector<16x32xf32>
      %c0_8 = arith.constant 0 : index
      %c0_9 = arith.constant 0 : index
      %28 = vector.load %arg18[%c0_8, %c0_9] : memref<16x8xf32, #tpu.memory_space<vmem>>, vector<16x1xf32>
      %cst_10 = arith.constant dense<0xFF800000> : vector<16xf32>
      %29 = vector.multi_reduction <maximumf>, %27, %cst_10 [1] : vector<16x32xf32> to vector<16xf32>
      %30 = vector.shape_cast %29 : vector<16xf32> to vector<16x1xf32>
      %31 = arith.maximumf %28, %30 : vector<16x1xf32>
      %32 = arith.subf %28, %31 : vector<16x1xf32>
      %33 = math.exp %32 : vector<16x1xf32>
      %34 = vector.broadcast %31 : vector<16x1xf32> to vector<16x32xf32>
      %35 = arith.subf %27, %34 : vector<16x32xf32>
      %36 = math.exp %35 : vector<16x32xf32>
      %c0_11 = arith.constant 0 : index
      %c0_12 = arith.constant 0 : index
      %37 = vector.load %arg19[%c0_11, %c0_12] : memref<16x8xf32, #tpu.memory_space<vmem>>, vector<16x1xf32>
      %38 = arith.mulf %33, %37 : vector<16x1xf32>
      %cst_13 = arith.constant dense<0.000000e+00> : vector<16xf32>
      %39 = vector.multi_reduction <add>, %36, %cst_13 [1] : vector<16x32xf32> to vector<16xf32>
      %40 = vector.shape_cast %39 : vector<16xf32> to vector<16x1xf32>
      %41 = arith.addf %38, %40 : vector<16x1xf32>
      %c0_14 = arith.constant 0 : index
      %c0_15 = arith.constant 0 : index
      %42 = vector.load %arg19[%c0_14, %c0_15] : memref<16x8xf32, #tpu.memory_space<vmem>>, vector<16x1xf32>
      tpu.vector_store %arg19[%c0_14, %c0_15], %41 {strides = array<i32>} : memref<16x8xf32, #tpu.memory_space<vmem>>, vector<16x1xf32>,
      %c0_16 = arith.constant 0 : index
      %c0_17 = arith.constant 0 : index
      %43 = vector.load %arg20[%c0_16, %c0_17] : memref<16x128xf32, #tpu.memory_space<vmem>>, vector<16x16xf32>
      %44 = vector.broadcast %33 : vector<16x1xf32> to vector<16x16xf32>
      %45 = arith.mulf %44, %43 : vector<16x16xf32>
      %46 = arith.truncf %36 : vector<16x32xf32> to vector<16x32xbf16>
      %47 = vector.extract_strided_slice %15 {offsets = [0, 0], sizes = [32, 16], strides = [1, 1]} : vector<32x128xbf16> to vector<32x16xbf16>
      %cst_18 = arith.constant dense<0.000000e+00> : vector<16x16xf32>
      %48 = tpu.matmul %46, %47, %cst_18 {dimension_numbers = #tpu.dot_dimension_numbers<[1], [0], [0], [1], [0, 0, 1, 1], [], []>} : vector<16x32xbf16>, vector<32x16xbf16>, vector<16x16xf32> -> vector<16x16xf32>
      %49 = arith.addf %45, %48 : vector<16x16xf32>
      %c0_19 = arith.constant 0 : index
      %c0_20 = arith.constant 0 : index
      %50 = vector.load %arg20[%c0_19, %c0_20] : memref<16x128xf32, #tpu.memory_space<vmem>>, vector<16x16xf32>
      tpu.vector_store %arg20[%c0_19, %c0_20], %49 {strides = array<i32>} : memref<16x128xf32, #tpu.memory_space<vmem>>, vector<16x16xf32>,
      %c0_21 = arith.constant 0 : index
      %c0_22 = arith.constant 0 : index
      %51 = vector.load %arg18[%c0_21, %c0_22] : memref<16x8xf32, #tpu.memory_space<vmem>>, vector<16x1xf32>
      tpu.vector_store %arg18[%c0_21, %c0_22], %31 {strides = array<i32>} : memref<16x8xf32, #tpu.memory_space<vmem>>, vector<16x1xf32>,
      %c0_23 = arith.constant 0 : index
      %c16 = arith.constant 16 : index
      %52 = vector.load %arg17[%c0_23, %c16] : memref<16x128xbf16, #tpu.memory_space<vmem>>, vector<16x16xbf16>
      %53 = vector.extract_strided_slice %14 {offsets = [0, 16], sizes = [32, 16], strides = [1, 1]} : vector<32x128xbf16> to vector<32x16xbf16>
      %cst_24 = arith.constant dense<0.000000e+00> : vector<16x32xf32>
      %54 = tpu.matmul %52, %53, %cst_24 {dimension_numbers = #tpu.dot_dimension_numbers<[1], [1], [0], [0], [0, 0, 1, 0], [], []>} : vector<16x16xbf16>, vector<32x16xbf16>, vector<16x32xf32> -> vector<16x32xf32>
      %cst_25 = arith.constant -1.000000e+30 : f32
      %55 = vector.broadcast %cst_25 : f32 to vector<16x32xf32>
      %56 = arith.select %22, %55, %54 : vector<16x32xi1>, vector<16x32xf32>
      %c0_26 = arith.constant 0 : index
      %c1 = arith.constant 1 : index
      %57 = vector.load %arg18[%c0_26, %c1] : memref<16x8xf32, #tpu.memory_space<vmem>>, vector<16x1xf32>
      %cst_27 = arith.constant dense<0xFF800000> : vector<16xf32>
      %58 = vector.multi_reduction <maximumf>, %56, %cst_27 [1] : vector<16x32xf32> to vector<16xf32>
      %59 = vector.shape_cast %58 : vector<16xf32> to vector<16x1xf32>
      %60 = arith.maximumf %57, %59 : vector<16x1xf32>
      %61 = arith.subf %57, %60 : vector<16x1xf32>
      %62 = math.exp %61 : vector<16x1xf32>
      %63 = vector.broadcast %60 : vector<16x1xf32> to vector<16x32xf32>
      %64 = arith.subf %56, %63 : vector<16x32xf32>
      %65 = math.exp %64 : vector<16x32xf32>
      %c0_28 = arith.constant 0 : index
      %c1_29 = arith.constant 1 : index
      %66 = vector.load %arg19[%c0_28, %c1_29] : memref<16x8xf32, #tpu.memory_space<vmem>>, vector<16x1xf32>
      %67 = arith.mulf %62, %66 : vector<16x1xf32>
      %cst_30 = arith.constant dense<0.000000e+00> : vector<16xf32>
      %68 = vector.multi_reduction <add>, %65, %cst_30 [1] : vector<16x32xf32> to vector<16xf32>
      %69 = vector.shape_cast %68 : vector<16xf32> to vector<16x1xf32>
      %70 = arith.addf %67, %69 : vector<16x1xf32>
      %c0_31 = arith.constant 0 : index
      %c1_32 = arith.constant 1 : index
      %71 = vector.load %arg19[%c0_31, %c1_32] : memref<16x8xf32, #tpu.memory_space<vmem>>, vector<16x1xf32>
      tpu.vector_store %arg19[%c0_31, %c1_32], %70 {strides = array<i32>} : memref<16x8xf32, #tpu.memory_space<vmem>>, vector<16x1xf32>,
      %c0_33 = arith.constant 0 : index
      %c16_34 = arith.constant 16 : index
      %72 = vector.load %arg20[%c0_33, %c16_34] : memref<16x128xf32, #tpu.memory_space<vmem>>, vector<16x16xf32>
      %73 = vector.broadcast %62 : vector<16x1xf32> to vector<16x16xf32>
      %74 = arith.mulf %73, %72 : vector<16x16xf32>
      %75 = arith.truncf %65 : vector<16x32xf32> to vector<16x32xbf16>
      %76 = vector.extract_strided_slice %15 {offsets = [0, 16], sizes = [32, 16], strides = [1, 1]} : vector<32x128xbf16> to vector<32x16xbf16>
      %cst_35 = arith.constant dense<0.000000e+00> : vector<16x16xf32>
      %77 = tpu.matmul %75, %76, %cst_35 {dimension_numbers = #tpu.dot_dimension_numbers<[1], [0], [0], [1], [0, 0, 1, 1], [], []>} : vector<16x32xbf16>, vector<32x16xbf16>, vector<16x16xf32> -> vector<16x16xf32>
      %78 = arith.addf %74, %77 : vector<16x16xf32>
      %c0_36 = arith.constant 0 : index
      %c16_37 = arith.constant 16 : index
      %79 = vector.load %arg20[%c0_36, %c16_37] : memref<16x128xf32, #tpu.memory_space<vmem>>, vector<16x16xf32>
      tpu.vector_store %arg20[%c0_36, %c16_37], %78 {strides = array<i32>} : memref<16x128xf32, #tpu.memory_space<vmem>>, vector<16x16xf32>,
      %c0_38 = arith.constant 0 : index
      %c1_39 = arith.constant 1 : index
      %80 = vector.load %arg18[%c0_38, %c1_39] : memref<16x8xf32, #tpu.memory_space<vmem>>, vector<16x1xf32>
      tpu.vector_store %arg18[%c0_38, %c1_39], %60 {strides = array<i32>} : memref<16x8xf32, #tpu.memory_space<vmem>>, vector<16x1xf32>,
      %c0_40 = arith.constant 0 : index
      %c32 = arith.constant 32 : index
      %81 = vector.load %arg17[%c0_40, %c32] : memref<16x128xbf16, #tpu.memory_space<vmem>>, vector<16x16xbf16>
      %82 = vector.extract_strided_slice %14 {offsets = [0, 32], sizes = [32, 16], strides = [1, 1]} : vector<32x128xbf16> to vector<32x16xbf16>
      %cst_41 = arith.constant dense<0.000000e+00> : vector<16x32xf32>
      %83 = tpu.matmul %81, %82, %cst_41 {dimension_numbers = #tpu.dot_dimension_numbers<[1], [1], [0], [0], [0, 0, 1, 0], [], []>} : vector<16x16xbf16>, vector<32x16xbf16>, vector<16x32xf32> -> vector<16x32xf32>
      %cst_42 = arith.constant -1.000000e+30 : f32
      %84 = vector.broadcast %cst_42 : f32 to vector<16x32xf32>
      %85 = arith.select %22, %84, %83 : vector<16x32xi1>, vector<16x32xf32>
      %c0_43 = arith.constant 0 : index
      %c2 = arith.constant 2 : index
      %86 = vector.load %arg18[%c0_43, %c2] : memref<16x8xf32, #tpu.memory_space<vmem>>, vector<16x1xf32>
      %cst_44 = arith.constant dense<0xFF800000> : vector<16xf32>
      %87 = vector.multi_reduction <maximumf>, %85, %cst_44 [1] : vector<16x32xf32> to vector<16xf32>
      %88 = vector.shape_cast %87 : vector<16xf32> to vector<16x1xf32>
      %89 = arith.maximumf %86, %88 : vector<16x1xf32>
      %90 = arith.subf %86, %89 : vector<16x1xf32>
      %91 = math.exp %90 : vector<16x1xf32>
      %92 = vector.broadcast %89 : vector<16x1xf32> to vector<16x32xf32>
      %93 = arith.subf %85, %92 : vector<16x32xf32>
      %94 = math.exp %93 : vector<16x32xf32>
      %c0_45 = arith.constant 0 : index
      %c2_46 = arith.constant 2 : index
      %95 = vector.load %arg19[%c0_45, %c2_46] : memref<16x8xf32, #tpu.memory_space<vmem>>, vector<16x1xf32>
      %96 = arith.mulf %91, %95 : vector<16x1xf32>
      %cst_47 = arith.constant dense<0.000000e+00> : vector<16xf32>
      %97 = vector.multi_reduction <add>, %94, %cst_47 [1] : vector<16x32xf32> to vector<16xf32>
      %98 = vector.shape_cast %97 : vector<16xf32> to vector<16x1xf32>
      %99 = arith.addf %96, %98 : vector<16x1xf32>
      %c0_48 = arith.constant 0 : index
      %c2_49 = arith.constant 2 : index
      %100 = vector.load %arg19[%c0_48, %c2_49] : memref<16x8xf32, #tpu.memory_space<vmem>>, vector<16x1xf32>
      tpu.vector_store %arg19[%c0_48, %c2_49], %99 {strides = array<i32>} : memref<16x8xf32, #tpu.memory_space<vmem>>, vector<16x1xf32>,
      %c0_50 = arith.constant 0 : index
      %c32_51 = arith.constant 32 : index
      %101 = vector.load %arg20[%c0_50, %c32_51] : memref<16x128xf32, #tpu.memory_space<vmem>>, vector<16x16xf32>
      %102 = vector.broadcast %91 : vector<16x1xf32> to vector<16x16xf32>
      %103 = arith.mulf %102, %101 : vector<16x16xf32>
      %104 = arith.truncf %94 : vector<16x32xf32> to vector<16x32xbf16>
      %105 = vector.extract_strided_slice %15 {offsets = [0, 32], sizes = [32, 16], strides = [1, 1]} : vector<32x128xbf16> to vector<32x16xbf16>
      %cst_52 = arith.constant dense<0.000000e+00> : vector<16x16xf32>
      %106 = tpu.matmul %104, %105, %cst_52 {dimension_numbers = #tpu.dot_dimension_numbers<[1], [0], [0], [1], [0, 0, 1, 1], [], []>} : vector<16x32xbf16>, vector<32x16xbf16>, vector<16x16xf32> -> vector<16x16xf32>
      %107 = arith.addf %103, %106 : vector<16x16xf32>
      %c0_53 = arith.constant 0 : index
      %c32_54 = arith.constant 32 : index
      %108 = vector.load %arg20[%c0_53, %c32_54] : memref<16x128xf32, #tpu.memory_space<vmem>>, vector<16x16xf32>
      tpu.vector_store %arg20[%c0_53, %c32_54], %107 {strides = array<i32>} : memref<16x128xf32, #tpu.memory_space<vmem>>, vector<16x16xf32>,
      %c0_55 = arith.constant 0 : index
      %c2_56 = arith.constant 2 : index
      %109 = vector.load %arg18[%c0_55, %c2_56] : memref<16x8xf32, #tpu.memory_space<vmem>>, vector<16x1xf32>
      tpu.vector_store %arg18[%c0_55, %c2_56], %89 {strides = array<i32>} : memref<16x8xf32, #tpu.memory_space<vmem>>, vector<16x1xf32>,
      %c0_57 = arith.constant 0 : index
      %c48 = arith.constant 48 : index
      %110 = vector.load %arg17[%c0_57, %c48] : memref<16x128xbf16, #tpu.memory_space<vmem>>, vector<16x16xbf16>
      %111 = vector.extract_strided_slice %14 {offsets = [0, 48], sizes = [32, 16], strides = [1, 1]} : vector<32x128xbf16> to vector<32x16xbf16>
      %cst_58 = arith.constant dense<0.000000e+00> : vector<16x32xf32>
      %112 = tpu.matmul %110, %111, %cst_58 {dimension_numbers = #tpu.dot_dimension_numbers<[1], [1], [0], [0], [0, 0, 1, 0], [], []>} : vector<16x16xbf16>, vector<32x16xbf16>, vector<16x32xf32> -> vector<16x32xf32>
      %cst_59 = arith.constant -1.000000e+30 : f32
      %113 = vector.broadcast %cst_59 : f32 to vector<16x32xf32>
      %114 = arith.select %22, %113, %112 : vector<16x32xi1>, vector<16x32xf32>
      %c0_60 = arith.constant 0 : index
      %c3 = arith.constant 3 : index
      %115 = vector.load %arg18[%c0_60, %c3] : memref<16x8xf32, #tpu.memory_space<vmem>>, vector<16x1xf32>
      %cst_61 = arith.constant dense<0xFF800000> : vector<16xf32>
      %116 = vector.multi_reduction <maximumf>, %114, %cst_61 [1] : vector<16x32xf32> to vector<16xf32>
      %117 = vector.shape_cast %116 : vector<16xf32> to vector<16x1xf32>
      %118 = arith.maximumf %115, %117 : vector<16x1xf32>
      %119 = arith.subf %115, %118 : vector<16x1xf32>
      %120 = math.exp %119 : vector<16x1xf32>
      %121 = vector.broadcast %118 : vector<16x1xf32> to vector<16x32xf32>
      %122 = arith.subf %114, %121 : vector<16x32xf32>
      %123 = math.exp %122 : vector<16x32xf32>
      %c0_62 = arith.constant 0 : index
      %c3_63 = arith.constant 3 : index
      %124 = vector.load %arg19[%c0_62, %c3_63] : memref<16x8xf32, #tpu.memory_space<vmem>>, vector<16x1xf32>
      %125 = arith.mulf %120, %124 : vector<16x1xf32>
      %cst_64 = arith.constant dense<0.000000e+00> : vector<16xf32>
      %126 = vector.multi_reduction <add>, %123, %cst_64 [1] : vector<16x32xf32> to vector<16xf32>
      %127 = vector.shape_cast %126 : vector<16xf32> to vector<16x1xf32>
      %128 = arith.addf %125, %127 : vector<16x1xf32>
      %c0_65 = arith.constant 0 : index
      %c3_66 = arith.constant 3 : index
      %129 = vector.load %arg19[%c0_65, %c3_66] : memref<16x8xf32, #tpu.memory_space<vmem>>, vector<16x1xf32>
      tpu.vector_store %arg19[%c0_65, %c3_66], %128 {strides = array<i32>} : memref<16x8xf32, #tpu.memory_space<vmem>>, vector<16x1xf32>,
      %c0_67 = arith.constant 0 : index
      %c48_68 = arith.constant 48 : index
      %130 = vector.load %arg20[%c0_67, %c48_68] : memref<16x128xf32, #tpu.memory_space<vmem>>, vector<16x16xf32>
      %131 = vector.broadcast %120 : vector<16x1xf32> to vector<16x16xf32>
      %132 = arith.mulf %131, %130 : vector<16x16xf32>
      %133 = arith.truncf %123 : vector<16x32xf32> to vector<16x32xbf16>
      %134 = vector.extract_strided_slice %15 {offsets = [0, 48], sizes = [32, 16], strides = [1, 1]} : vector<32x128xbf16> to vector<32x16xbf16>
      %cst_69 = arith.constant dense<0.000000e+00> : vector<16x16xf32>
      %135 = tpu.matmul %133, %134, %cst_69 {dimension_numbers = #tpu.dot_dimension_numbers<[1], [0], [0], [1], [0, 0, 1, 1], [], []>} : vector<16x32xbf16>, vector<32x16xbf16>, vector<16x16xf32> -> vector<16x16xf32>
      %136 = arith.addf %132, %135 : vector<16x16xf32>
      %c0_70 = arith.constant 0 : index
      %c48_71 = arith.constant 48 : index
      %137 = vector.load %arg20[%c0_70, %c48_71] : memref<16x128xf32, #tpu.memory_space<vmem>>, vector<16x16xf32>
      tpu.vector_store %arg20[%c0_70, %c48_71], %136 {strides = array<i32>} : memref<16x128xf32, #tpu.memory_space<vmem>>, vector<16x16xf32>,
      %c0_72 = arith.constant 0 : index
      %c3_73 = arith.constant 3 : index
      %138 = vector.load %arg18[%c0_72, %c3_73] : memref<16x8xf32, #tpu.memory_space<vmem>>, vector<16x1xf32>
      tpu.vector_store %arg18[%c0_72, %c3_73], %118 {strides = array<i32>} : memref<16x8xf32, #tpu.memory_space<vmem>>, vector<16x1xf32>,
      %c0_74 = arith.constant 0 : index
      %c64 = arith.constant 64 : index
      %139 = vector.load %arg17[%c0_74, %c64] : memref<16x128xbf16, #tpu.memory_space<vmem>>, vector<16x16xbf16>
      %140 = vector.extract_strided_slice %14 {offsets = [0, 64], sizes = [32, 16], strides = [1, 1]} : vector<32x128xbf16> to vector<32x16xbf16>
      %cst_75 = arith.constant dense<0.000000e+00> : vector<16x32xf32>
      %141 = tpu.matmul %139, %140, %cst_75 {dimension_numbers = #tpu.dot_dimension_numbers<[1], [1], [0], [0], [0, 0, 1, 0], [], []>} : vector<16x16xbf16>, vector<32x16xbf16>, vector<16x32xf32> -> vector<16x32xf32>
      %cst_76 = arith.constant -1.000000e+30 : f32
      %142 = vector.broadcast %cst_76 : f32 to vector<16x32xf32>
      %143 = arith.select %22, %142, %141 : vector<16x32xi1>, vector<16x32xf32>
      %c0_77 = arith.constant 0 : index
      %c4 = arith.constant 4 : index
      %144 = vector.load %arg18[%c0_77, %c4] : memref<16x8xf32, #tpu.memory_space<vmem>>, vector<16x1xf32>
      %cst_78 = arith.constant dense<0xFF800000> : vector<16xf32>
      %145 = vector.multi_reduction <maximumf>, %143, %cst_78 [1] : vector<16x32xf32> to vector<16xf32>
      %146 = vector.shape_cast %145 : vector<16xf32> to vector<16x1xf32>
      %147 = arith.maximumf %144, %146 : vector<16x1xf32>
      %148 = arith.subf %144, %147 : vector<16x1xf32>
      %149 = math.exp %148 : vector<16x1xf32>
      %150 = vector.broadcast %147 : vector<16x1xf32> to vector<16x32xf32>
      %151 = arith.subf %143, %150 : vector<16x32xf32>
      %152 = math.exp %151 : vector<16x32xf32>
      %c0_79 = arith.constant 0 : index
      %c4_80 = arith.constant 4 : index
      %153 = vector.load %arg19[%c0_79, %c4_80] : memref<16x8xf32, #tpu.memory_space<vmem>>, vector<16x1xf32>
      %154 = arith.mulf %149, %153 : vector<16x1xf32>
      %cst_81 = arith.constant dense<0.000000e+00> : vector<16xf32>
      %155 = vector.multi_reduction <add>, %152, %cst_81 [1] : vector<16x32xf32> to vector<16xf32>
      %156 = vector.shape_cast %155 : vector<16xf32> to vector<16x1xf32>
      %157 = arith.addf %154, %156 : vector<16x1xf32>
      %c0_82 = arith.constant 0 : index
      %c4_83 = arith.constant 4 : index
      %158 = vector.load %arg19[%c0_82, %c4_83] : memref<16x8xf32, #tpu.memory_space<vmem>>, vector<16x1xf32>
      tpu.vector_store %arg19[%c0_82, %c4_83], %157 {strides = array<i32>} : memref<16x8xf32, #tpu.memory_space<vmem>>, vector<16x1xf32>,
      %c0_84 = arith.constant 0 : index
      %c64_85 = arith.constant 64 : index
      %159 = vector.load %arg20[%c0_84, %c64_85] : memref<16x128xf32, #tpu.memory_space<vmem>>, vector<16x16xf32>
      %160 = vector.broadcast %149 : vector<16x1xf32> to vector<16x16xf32>
      %161 = arith.mulf %160, %159 : vector<16x16xf32>
      %162 = arith.truncf %152 : vector<16x32xf32> to vector<16x32xbf16>
      %163 = vector.extract_strided_slice %15 {offsets = [0, 64], sizes = [32, 16], strides = [1, 1]} : vector<32x128xbf16> to vector<32x16xbf16>
      %cst_86 = arith.constant dense<0.000000e+00> : vector<16x16xf32>
      %164 = tpu.matmul %162, %163, %cst_86 {dimension_numbers = #tpu.dot_dimension_numbers<[1], [0], [0], [1], [0, 0, 1, 1], [], []>} : vector<16x32xbf16>, vector<32x16xbf16>, vector<16x16xf32> -> vector<16x16xf32>
      %165 = arith.addf %161, %164 : vector<16x16xf32>
      %c0_87 = arith.constant 0 : index
      %c64_88 = arith.constant 64 : index
      %166 = vector.load %arg20[%c0_87, %c64_88] : memref<16x128xf32, #tpu.memory_space<vmem>>, vector<16x16xf32>
      tpu.vector_store %arg20[%c0_87, %c64_88], %165 {strides = array<i32>} : memref<16x128xf32, #tpu.memory_space<vmem>>, vector<16x16xf32>,
      %c0_89 = arith.constant 0 : index
      %c4_90 = arith.constant 4 : index
      %167 = vector.load %arg18[%c0_89, %c4_90] : memref<16x8xf32, #tpu.memory_space<vmem>>, vector<16x1xf32>
      tpu.vector_store %arg18[%c0_89, %c4_90], %147 {strides = array<i32>} : memref<16x8xf32, #tpu.memory_space<vmem>>, vector<16x1xf32>,
      %c0_91 = arith.constant 0 : index
      %c80 = arith.constant 80 : index
      %168 = vector.load %arg17[%c0_91, %c80] : memref<16x128xbf16, #tpu.memory_space<vmem>>, vector<16x16xbf16>
      %169 = vector.extract_strided_slice %14 {offsets = [0, 80], sizes = [32, 16], strides = [1, 1]} : vector<32x128xbf16> to vector<32x16xbf16>
      %cst_92 = arith.constant dense<0.000000e+00> : vector<16x32xf32>
      %170 = tpu.matmul %168, %169, %cst_92 {dimension_numbers = #tpu.dot_dimension_numbers<[1], [1], [0], [0], [0, 0, 1, 0], [], []>} : vector<16x16xbf16>, vector<32x16xbf16>, vector<16x32xf32> -> vector<16x32xf32>
      %cst_93 = arith.constant -1.000000e+30 : f32
      %171 = vector.broadcast %cst_93 : f32 to vector<16x32xf32>
      %172 = arith.select %22, %171, %170 : vector<16x32xi1>, vector<16x32xf32>
      %c0_94 = arith.constant 0 : index
      %c5 = arith.constant 5 : index
      %173 = vector.load %arg18[%c0_94, %c5] : memref<16x8xf32, #tpu.memory_space<vmem>>, vector<16x1xf32>
      %cst_95 = arith.constant dense<0xFF800000> : vector<16xf32>
      %174 = vector.multi_reduction <maximumf>, %172, %cst_95 [1] : vector<16x32xf32> to vector<16xf32>
      %175 = vector.shape_cast %174 : vector<16xf32> to vector<16x1xf32>
      %176 = arith.maximumf %173, %175 : vector<16x1xf32>
      %177 = arith.subf %173, %176 : vector<16x1xf32>
      %178 = math.exp %177 : vector<16x1xf32>
      %179 = vector.broadcast %176 : vector<16x1xf32> to vector<16x32xf32>
      %180 = arith.subf %172, %179 : vector<16x32xf32>
      %181 = math.exp %180 : vector<16x32xf32>
      %c0_96 = arith.constant 0 : index
      %c5_97 = arith.constant 5 : index
      %182 = vector.load %arg19[%c0_96, %c5_97] : memref<16x8xf32, #tpu.memory_space<vmem>>, vector<16x1xf32>
      %183 = arith.mulf %178, %182 : vector<16x1xf32>
      %cst_98 = arith.constant dense<0.000000e+00> : vector<16xf32>
      %184 = vector.multi_reduction <add>, %181, %cst_98 [1] : vector<16x32xf32> to vector<16xf32>
      %185 = vector.shape_cast %184 : vector<16xf32> to vector<16x1xf32>
      %186 = arith.addf %183, %185 : vector<16x1xf32>
      %c0_99 = arith.constant 0 : index
      %c5_100 = arith.constant 5 : index
      %187 = vector.load %arg19[%c0_99, %c5_100] : memref<16x8xf32, #tpu.memory_space<vmem>>, vector<16x1xf32>
      tpu.vector_store %arg19[%c0_99, %c5_100], %186 {strides = array<i32>} : memref<16x8xf32, #tpu.memory_space<vmem>>, vector<16x1xf32>,
      %c0_101 = arith.constant 0 : index
      %c80_102 = arith.constant 80 : index
      %188 = vector.load %arg20[%c0_101, %c80_102] : memref<16x128xf32, #tpu.memory_space<vmem>>, vector<16x16xf32>
      %189 = vector.broadcast %178 : vector<16x1xf32> to vector<16x16xf32>
      %190 = arith.mulf %189, %188 : vector<16x16xf32>
      %191 = arith.truncf %181 : vector<16x32xf32> to vector<16x32xbf16>
      %192 = vector.extract_strided_slice %15 {offsets = [0, 80], sizes = [32, 16], strides = [1, 1]} : vector<32x128xbf16> to vector<32x16xbf16>
      %cst_103 = arith.constant dense<0.000000e+00> : vector<16x16xf32>
      %193 = tpu.matmul %191, %192, %cst_103 {dimension_numbers = #tpu.dot_dimension_numbers<[1], [0], [0], [1], [0, 0, 1, 1], [], []>} : vector<16x32xbf16>, vector<32x16xbf16>, vector<16x16xf32> -> vector<16x16xf32>
      %194 = arith.addf %190, %193 : vector<16x16xf32>
      %c0_104 = arith.constant 0 : index
      %c80_105 = arith.constant 80 : index
      %195 = vector.load %arg20[%c0_104, %c80_105] : memref<16x128xf32, #tpu.memory_space<vmem>>, vector<16x16xf32>
      tpu.vector_store %arg20[%c0_104, %c80_105], %194 {strides = array<i32>} : memref<16x128xf32, #tpu.memory_space<vmem>>, vector<16x16xf32>,
      %c0_106 = arith.constant 0 : index
      %c5_107 = arith.constant 5 : index
      %196 = vector.load %arg18[%c0_106, %c5_107] : memref<16x8xf32, #tpu.memory_space<vmem>>, vector<16x1xf32>
      tpu.vector_store %arg18[%c0_106, %c5_107], %176 {strides = array<i32>} : memref<16x8xf32, #tpu.memory_space<vmem>>, vector<16x1xf32>,
      %c0_108 = arith.constant 0 : index
      %c96 = arith.constant 96 : index
      %197 = vector.load %arg17[%c0_108, %c96] : memref<16x128xbf16, #tpu.memory_space<vmem>>, vector<16x16xbf16>
      %198 = vector.extract_strided_slice %14 {offsets = [0, 96], sizes = [32, 16], strides = [1, 1]} : vector<32x128xbf16> to vector<32x16xbf16>
      %cst_109 = arith.constant dense<0.000000e+00> : vector<16x32xf32>
      %199 = tpu.matmul %197, %198, %cst_109 {dimension_numbers = #tpu.dot_dimension_numbers<[1], [1], [0], [0], [0, 0, 1, 0], [], []>} : vector<16x16xbf16>, vector<32x16xbf16>, vector<16x32xf32> -> vector<16x32xf32>
      %cst_110 = arith.constant -1.000000e+30 : f32
      %200 = vector.broadcast %cst_110 : f32 to vector<16x32xf32>
      %201 = arith.select %22, %200, %199 : vector<16x32xi1>, vector<16x32xf32>
      %c0_111 = arith.constant 0 : index
      %c6 = arith.constant 6 : index
      %202 = vector.load %arg18[%c0_111, %c6] : memref<16x8xf32, #tpu.memory_space<vmem>>, vector<16x1xf32>
      %cst_112 = arith.constant dense<0xFF800000> : vector<16xf32>
      %203 = vector.multi_reduction <maximumf>, %201, %cst_112 [1] : vector<16x32xf32> to vector<16xf32>
      %204 = vector.shape_cast %203 : vector<16xf32> to vector<16x1xf32>
      %205 = arith.maximumf %202, %204 : vector<16x1xf32>
      %206 = arith.subf %202, %205 : vector<16x1xf32>
      %207 = math.exp %206 : vector<16x1xf32>
      %208 = vector.broadcast %205 : vector<16x1xf32> to vector<16x32xf32>
      %209 = arith.subf %201, %208 : vector<16x32xf32>
      %210 = math.exp %209 : vector<16x32xf32>
      %c0_113 = arith.constant 0 : index
      %c6_114 = arith.constant 6 : index
      %211 = vector.load %arg19[%c0_113, %c6_114] : memref<16x8xf32, #tpu.memory_space<vmem>>, vector<16x1xf32>
      %212 = arith.mulf %207, %211 : vector<16x1xf32>
      %cst_115 = arith.constant dense<0.000000e+00> : vector<16xf32>
      %213 = vector.multi_reduction <add>, %210, %cst_115 [1] : vector<16x32xf32> to vector<16xf32>
      %214 = vector.shape_cast %213 : vector<16xf32> to vector<16x1xf32>
      %215 = arith.addf %212, %214 : vector<16x1xf32>
      %c0_116 = arith.constant 0 : index
      %c6_117 = arith.constant 6 : index
      %216 = vector.load %arg19[%c0_116, %c6_117] : memref<16x8xf32, #tpu.memory_space<vmem>>, vector<16x1xf32>
      tpu.vector_store %arg19[%c0_116, %c6_117], %215 {strides = array<i32>} : memref<16x8xf32, #tpu.memory_space<vmem>>, vector<16x1xf32>,
      %c0_118 = arith.constant 0 : index
      %c96_119 = arith.constant 96 : index
      %217 = vector.load %arg20[%c0_118, %c96_119] : memref<16x128xf32, #tpu.memory_space<vmem>>, vector<16x16xf32>
      %218 = vector.broadcast %207 : vector<16x1xf32> to vector<16x16xf32>
      %219 = arith.mulf %218, %217 : vector<16x16xf32>
      %220 = arith.truncf %210 : vector<16x32xf32> to vector<16x32xbf16>
      %221 = vector.extract_strided_slice %15 {offsets = [0, 96], sizes = [32, 16], strides = [1, 1]} : vector<32x128xbf16> to vector<32x16xbf16>
      %cst_120 = arith.constant dense<0.000000e+00> : vector<16x16xf32>
      %222 = tpu.matmul %220, %221, %cst_120 {dimension_numbers = #tpu.dot_dimension_numbers<[1], [0], [0], [1], [0, 0, 1, 1], [], []>} : vector<16x32xbf16>, vector<32x16xbf16>, vector<16x16xf32> -> vector<16x16xf32>
      %223 = arith.addf %219, %222 : vector<16x16xf32>
      %c0_121 = arith.constant 0 : index
      %c96_122 = arith.constant 96 : index
      %224 = vector.load %arg20[%c0_121, %c96_122] : memref<16x128xf32, #tpu.memory_space<vmem>>, vector<16x16xf32>
      tpu.vector_store %arg20[%c0_121, %c96_122], %223 {strides = array<i32>} : memref<16x128xf32, #tpu.memory_space<vmem>>, vector<16x16xf32>,
      %c0_123 = arith.constant 0 : index
      %c6_124 = arith.constant 6 : index
      %225 = vector.load %arg18[%c0_123, %c6_124] : memref<16x8xf32, #tpu.memory_space<vmem>>, vector<16x1xf32>
      tpu.vector_store %arg18[%c0_123, %c6_124], %205 {strides = array<i32>} : memref<16x8xf32, #tpu.memory_space<vmem>>, vector<16x1xf32>,
      %c0_125 = arith.constant 0 : index
      %c112 = arith.constant 112 : index
      %226 = vector.load %arg17[%c0_125, %c112] : memref<16x128xbf16, #tpu.memory_space<vmem>>, vector<16x16xbf16>
      %227 = vector.extract_strided_slice %14 {offsets = [0, 112], sizes = [32, 16], strides = [1, 1]} : vector<32x128xbf16> to vector<32x16xbf16>
      %cst_126 = arith.constant dense<0.000000e+00> : vector<16x32xf32>
      %228 = tpu.matmul %226, %227, %cst_126 {dimension_numbers = #tpu.dot_dimension_numbers<[1], [1], [0], [0], [0, 0, 1, 0], [], []>} : vector<16x16xbf16>, vector<32x16xbf16>, vector<16x32xf32> -> vector<16x32xf32>
      %cst_127 = arith.constant -1.000000e+30 : f32
      %229 = vector.broadcast %cst_127 : f32 to vector<16x32xf32>
      %230 = arith.select %22, %229, %228 : vector<16x32xi1>, vector<16x32xf32>
      %c0_128 = arith.constant 0 : index
      %c7 = arith.constant 7 : index
      %231 = vector.load %arg18[%c0_128, %c7] : memref<16x8xf32, #tpu.memory_space<vmem>>, vector<16x1xf32>
      %cst_129 = arith.constant dense<0xFF800000> : vector<16xf32>
      %232 = vector.multi_reduction <maximumf>, %230, %cst_129 [1] : vector<16x32xf32> to vector<16xf32>
      %233 = vector.shape_cast %232 : vector<16xf32> to vector<16x1xf32>
      %234 = arith.maximumf %231, %233 : vector<16x1xf32>
      %235 = arith.subf %231, %234 : vector<16x1xf32>
      %236 = math.exp %235 : vector<16x1xf32>
      %237 = vector.broadcast %234 : vector<16x1xf32> to vector<16x32xf32>
      %238 = arith.subf %230, %237 : vector<16x32xf32>
      %239 = math.exp %238 : vector<16x32xf32>
      %c0_130 = arith.constant 0 : index
      %c7_131 = arith.constant 7 : index
      %240 = vector.load %arg19[%c0_130, %c7_131] : memref<16x8xf32, #tpu.memory_space<vmem>>, vector<16x1xf32>
      %241 = arith.mulf %236, %240 : vector<16x1xf32>
      %cst_132 = arith.constant dense<0.000000e+00> : vector<16xf32>
      %242 = vector.multi_reduction <add>, %239, %cst_132 [1] : vector<16x32xf32> to vector<16xf32>
      %243 = vector.shape_cast %242 : vector<16xf32> to vector<16x1xf32>
      %244 = arith.addf %241, %243 : vector<16x1xf32>
      %c0_133 = arith.constant 0 : index
      %c7_134 = arith.constant 7 : index
      %245 = vector.load %arg19[%c0_133, %c7_134] : memref<16x8xf32, #tpu.memory_space<vmem>>, vector<16x1xf32>
      tpu.vector_store %arg19[%c0_133, %c7_134], %244 {strides = array<i32>} : memref<16x8xf32, #tpu.memory_space<vmem>>, vector<16x1xf32>,
      %c0_135 = arith.constant 0 : index
      %c112_136 = arith.constant 112 : index
      %246 = vector.load %arg20[%c0_135, %c112_136] : memref<16x128xf32, #tpu.memory_space<vmem>>, vector<16x16xf32>
      %247 = vector.broadcast %236 : vector<16x1xf32> to vector<16x16xf32>
      %248 = arith.mulf %247, %246 : vector<16x16xf32>
      %249 = arith.truncf %239 : vector<16x32xf32> to vector<16x32xbf16>
      %250 = vector.extract_strided_slice %15 {offsets = [0, 112], sizes = [32, 16], strides = [1, 1]} : vector<32x128xbf16> to vector<32x16xbf16>
      %cst_137 = arith.constant dense<0.000000e+00> : vector<16x16xf32>
      %251 = tpu.matmul %249, %250, %cst_137 {dimension_numbers = #tpu.dot_dimension_numbers<[1], [0], [0], [1], [0, 0, 1, 1], [], []>} : vector<16x32xbf16>, vector<32x16xbf16>, vector<16x16xf32> -> vector<16x16xf32>
      %252 = arith.addf %248, %251 : vector<16x16xf32>
      %c0_138 = arith.constant 0 : index
      %c112_139 = arith.constant 112 : index
      %253 = vector.load %arg20[%c0_138, %c112_139] : memref<16x128xf32, #tpu.memory_space<vmem>>, vector<16x16xf32>
      tpu.vector_store %arg20[%c0_138, %c112_139], %252 {strides = array<i32>} : memref<16x128xf32, #tpu.memory_space<vmem>>, vector<16x16xf32>,
      %c0_140 = arith.constant 0 : index
      %c7_141 = arith.constant 7 : index
      %254 = vector.load %arg18[%c0_140, %c7_141] : memref<16x8xf32, #tpu.memory_space<vmem>>, vector<16x1xf32>
      tpu.vector_store %arg18[%c0_140, %c7_141], %234 {strides = array<i32>} : memref<16x8xf32, #tpu.memory_space<vmem>>, vector<16x1xf32>,
    } else {
    }
    %c1_i32 = arith.constant 1 : i32
    %9 = arith.cmpi eq, %arg2, %c1_i32 : i32
    %10 = arith.extui %9 : i1 to i32
    %c0_i32_2 = arith.constant 0 : i32
    %11 = arith.cmpi ne, %10, %c0_i32_2 : i32
    scf.if %11 {
      %c0 = arith.constant 0 : index
      %c0_3 = arith.constant 0 : index
      %c0_4 = arith.constant 0 : index
      %12 = vector.load %arg3[%c0, %c0_3, %c0_4] : memref<1x16x128xf32, #tpu.memory_space<vmem>>, vector<1x16x128xf32>
      %13 = vector.shape_cast %12 : vector<1x16x128xf32> to vector<16x128xf32>
      %c0_5 = arith.constant 0 : index
      %c0_6 = arith.constant 0 : index
      %14 = vector.load %arg19[%c0_5, %c0_6] : memref<16x8xf32, #tpu.memory_space<vmem>>, vector<16x8xf32>
      %15 = tpu.reciprocal %14 {approx = true} : vector<16x8xf32> -> vector<16x8xf32>
      %c0_7 = arith.constant 0 : index
      %c0_8 = arith.constant 0 : index
      %16 = vector.load %arg20[%c0_7, %c0_8] : memref<16x128xf32, #tpu.memory_space<vmem>>, vector<16x16xf32>
      %17 = vector.extract_strided_slice %15 {offsets = [0, 0], sizes = [16, 1], strides = [1, 1]} : vector<16x8xf32> to vector<16x1xf32>
      %18 = vector.broadcast %17 : vector<16x1xf32> to vector<16x16xf32>
      %19 = arith.mulf %16, %18 : vector<16x16xf32>
      %c0_9 = arith.constant 0 : index
      %c16 = arith.constant 16 : index
      %20 = vector.load %arg20[%c0_9, %c16] : memref<16x128xf32, #tpu.memory_space<vmem>>, vector<16x16xf32>
      %21 = vector.extract_strided_slice %15 {offsets = [0, 1], sizes = [16, 1], strides = [1, 1]} : vector<16x8xf32> to vector<16x1xf32>
      %22 = vector.broadcast %21 : vector<16x1xf32> to vector<16x16xf32>
      %23 = arith.mulf %20, %22 : vector<16x16xf32>
      %c0_10 = arith.constant 0 : index
      %c32 = arith.constant 32 : index
      %24 = vector.load %arg20[%c0_10, %c32] : memref<16x128xf32, #tpu.memory_space<vmem>>, vector<16x16xf32>
      %25 = vector.extract_strided_slice %15 {offsets = [0, 2], sizes = [16, 1], strides = [1, 1]} : vector<16x8xf32> to vector<16x1xf32>
      %26 = vector.broadcast %25 : vector<16x1xf32> to vector<16x16xf32>
      %27 = arith.mulf %24, %26 : vector<16x16xf32>
      %c0_11 = arith.constant 0 : index
      %c48 = arith.constant 48 : index
      %28 = vector.load %arg20[%c0_11, %c48] : memref<16x128xf32, #tpu.memory_space<vmem>>, vector<16x16xf32>
      %29 = vector.extract_strided_slice %15 {offsets = [0, 3], sizes = [16, 1], strides = [1, 1]} : vector<16x8xf32> to vector<16x1xf32>
      %30 = vector.broadcast %29 : vector<16x1xf32> to vector<16x16xf32>
      %31 = arith.mulf %28, %30 : vector<16x16xf32>
      %c0_12 = arith.constant 0 : index
      %c64 = arith.constant 64 : index
      %32 = vector.load %arg20[%c0_12, %c64] : memref<16x128xf32, #tpu.memory_space<vmem>>, vector<16x16xf32>
      %33 = vector.extract_strided_slice %15 {offsets = [0, 4], sizes = [16, 1], strides = [1, 1]} : vector<16x8xf32> to vector<16x1xf32>
      %34 = vector.broadcast %33 : vector<16x1xf32> to vector<16x16xf32>
      %35 = arith.mulf %32, %34 : vector<16x16xf32>
      %c0_13 = arith.constant 0 : index
      %c80 = arith.constant 80 : index
      %36 = vector.load %arg20[%c0_13, %c80] : memref<16x128xf32, #tpu.memory_space<vmem>>, vector<16x16xf32>
      %37 = vector.extract_strided_slice %15 {offsets = [0, 5], sizes = [16, 1], strides = [1, 1]} : vector<16x8xf32> to vector<16x1xf32>
      %38 = vector.broadcast %37 : vector<16x1xf32> to vector<16x16xf32>
      %39 = arith.mulf %36, %38 : vector<16x16xf32>
      %c0_14 = arith.constant 0 : index
      %c96 = arith.constant 96 : index
      %40 = vector.load %arg20[%c0_14, %c96] : memref<16x128xf32, #tpu.memory_space<vmem>>, vector<16x16xf32>
      %41 = vector.extract_strided_slice %15 {offsets = [0, 6], sizes = [16, 1], strides = [1, 1]} : vector<16x8xf32> to vector<16x1xf32>
      %42 = vector.broadcast %41 : vector<16x1xf32> to vector<16x16xf32>
      %43 = arith.mulf %40, %42 : vector<16x16xf32>
      %c0_15 = arith.constant 0 : index
      %c112 = arith.constant 112 : index
      %44 = vector.load %arg20[%c0_15, %c112] : memref<16x128xf32, #tpu.memory_space<vmem>>, vector<16x16xf32>
      %45 = vector.extract_strided_slice %15 {offsets = [0, 7], sizes = [16, 1], strides = [1, 1]} : vector<16x8xf32> to vector<16x1xf32>
      %46 = vector.broadcast %45 : vector<16x1xf32> to vector<16x16xf32>
      %47 = arith.mulf %44, %46 : vector<16x16xf32>
      %48 = tpu.concatenate %19, %23, %27, %31, %35, %39, %43, %47 in 1 : vector<16x16xf32>, vector<16x16xf32>, vector<16x16xf32>, vector<16x16xf32>, vector<16x16xf32>, vector<16x16xf32>, vector<16x16xf32>, vector<16x16xf32> -> vector<16x128xf32>
      %49 = arith.truncf %48 : vector<16x128xf32> to vector<16x128xbf16>
      %c0_16 = arith.constant 0 : index
      %c0_17 = arith.constant 0 : index
      %50 = vector.load %arg8[%c0_16, %c0_17] : memref<128x128xbf16, #tpu.memory_space<vmem>>, vector<128x128xbf16>
      %cst = arith.constant dense<0.000000e+00> : vector<16x128xf32>
      %51 = tpu.matmul %49, %50, %cst {dimension_numbers = #tpu.dot_dimension_numbers<[1], [0], [0], [1], [0, 0, 1, 1], [], []>} : vector<16x128xbf16>, vector<128x128xbf16>, vector<16x128xf32> -> vector<16x128xf32>
      %c0_18 = arith.constant 0 : index
      %c0_19 = arith.constant 0 : index
      %52 = vector.load %arg9[%c0_18, %c0_19] : memref<1x128xf32, #tpu.memory_space<vmem>>, vector<1x128xf32>
      %53 = vector.broadcast %52 : vector<1x128xf32> to vector<16x128xf32>
      %54 = arith.addf %51, %53 : vector<16x128xf32>
      %55 = arith.addf %54, %13 : vector<16x128xf32>
      %c0_20 = arith.constant 0 : index
      %c0_21 = arith.constant 0 : index
      %56 = vector.load %arg10[%c0_20, %c0_21] : memref<1x128xf32, #tpu.memory_space<vmem>>, vector<1x128xf32>
      %c0_22 = arith.constant 0 : index
      %c0_23 = arith.constant 0 : index
      %57 = vector.load %arg11[%c0_22, %c0_23] : memref<1x128xf32, #tpu.memory_space<vmem>>, vector<1x128xf32>
      %58 = vector.extract_strided_slice %55 {offsets = [0, 0], sizes = [16, 64], strides = [1, 1]} : vector<16x128xf32> to vector<16x64xf32>
      %cst_24 = arith.constant dense<0.000000e+00> : vector<16xf32>
      %59 = vector.multi_reduction <add>, %58, %cst_24 [1] : vector<16x64xf32> to vector<16xf32>
      %60 = vector.shape_cast %59 : vector<16xf32> to vector<16x1xf32>
      %cst_25 = arith.constant 6.400000e+01 : f32
      %61 = vector.broadcast %cst_25 : f32 to vector<16x1xf32>
      %62 = arith.divf %60, %61 : vector<16x1xf32>
      %63 = vector.broadcast %62 : vector<16x1xf32> to vector<16x64xf32>
      %64 = arith.subf %58, %63 : vector<16x64xf32>
      %65 = arith.mulf %64, %64 : vector<16x64xf32>
      %cst_26 = arith.constant dense<0.000000e+00> : vector<16xf32>
      %66 = vector.multi_reduction <add>, %65, %cst_26 [1] : vector<16x64xf32> to vector<16xf32>
      %67 = vector.shape_cast %66 : vector<16xf32> to vector<16x1xf32>
      %cst_27 = arith.constant 6.400000e+01 : f32
      %68 = vector.broadcast %cst_27 : f32 to vector<16x1xf32>
      %69 = arith.divf %67, %68 : vector<16x1xf32>
      %70 = vector.broadcast %62 : vector<16x1xf32> to vector<16x64xf32>
      %71 = arith.subf %58, %70 : vector<16x64xf32>
      %72 = math.sqrt %69 : vector<16x1xf32>
      %cst_28 = arith.constant 9.99999974E-6 : f32
      %73 = vector.broadcast %cst_28 : f32 to vector<16x1xf32>
      %74 = arith.addf %72, %73 : vector<16x1xf32>
      %75 = vector.broadcast %74 : vector<16x1xf32> to vector<16x64xf32>
      %76 = arith.divf %71, %75 : vector<16x64xf32>
      %77 = vector.extract_strided_slice %55 {offsets = [0, 64], sizes = [16, 64], strides = [1, 1]} : vector<16x128xf32> to vector<16x64xf32>
      %cst_29 = arith.constant dense<0.000000e+00> : vector<16xf32>
      %78 = vector.multi_reduction <add>, %77, %cst_29 [1] : vector<16x64xf32> to vector<16xf32>
      %79 = vector.shape_cast %78 : vector<16xf32> to vector<16x1xf32>
      %cst_30 = arith.constant 6.400000e+01 : f32
      %80 = vector.broadcast %cst_30 : f32 to vector<16x1xf32>
      %81 = arith.divf %79, %80 : vector<16x1xf32>
      %82 = vector.broadcast %81 : vector<16x1xf32> to vector<16x64xf32>
      %83 = arith.subf %77, %82 : vector<16x64xf32>
      %84 = arith.mulf %83, %83 : vector<16x64xf32>
      %cst_31 = arith.constant dense<0.000000e+00> : vector<16xf32>
      %85 = vector.multi_reduction <add>, %84, %cst_31 [1] : vector<16x64xf32> to vector<16xf32>
      %86 = vector.shape_cast %85 : vector<16xf32> to vector<16x1xf32>
      %cst_32 = arith.constant 6.400000e+01 : f32
      %87 = vector.broadcast %cst_32 : f32 to vector<16x1xf32>
      %88 = arith.divf %86, %87 : vector<16x1xf32>
      %89 = vector.broadcast %81 : vector<16x1xf32> to vector<16x64xf32>
      %90 = arith.subf %77, %89 : vector<16x64xf32>
      %91 = math.sqrt %88 : vector<16x1xf32>
      %cst_33 = arith.constant 9.99999974E-6 : f32
      %92 = vector.broadcast %cst_33 : f32 to vector<16x1xf32>
      %93 = arith.addf %91, %92 : vector<16x1xf32>
      %94 = vector.broadcast %93 : vector<16x1xf32> to vector<16x64xf32>
      %95 = arith.divf %90, %94 : vector<16x64xf32>
      %96 = tpu.concatenate %76, %95 in 1 : vector<16x64xf32>, vector<16x64xf32> -> vector<16x128xf32>
      %97 = vector.broadcast %56 : vector<1x128xf32> to vector<16x128xf32>
      %98 = arith.mulf %96, %97 : vector<16x128xf32>
      %99 = vector.broadcast %57 : vector<1x128xf32> to vector<16x128xf32>
      %100 = arith.addf %98, %99 : vector<16x128xf32>
      %101 = arith.truncf %100 : vector<16x128xf32> to vector<16x128xbf16>
      %c0_34 = arith.constant 0 : index
      %c0_35 = arith.constant 0 : index
      %102 = vector.load %arg12[%c0_34, %c0_35] : memref<128x512xbf16, #tpu.memory_space<vmem>>, vector<128x512xbf16>
      %cst_36 = arith.constant dense<0.000000e+00> : vector<16x512xf32>
      %103 = tpu.matmul %101, %102, %cst_36 {dimension_numbers = #tpu.dot_dimension_numbers<[1], [0], [0], [1], [0, 0, 1, 1], [], []>} : vector<16x128xbf16>, vector<128x512xbf16>, vector<16x512xf32> -> vector<16x512xf32>
      %c0_37 = arith.constant 0 : index
      %c0_38 = arith.constant 0 : index
      %104 = vector.load %arg13[%c0_37, %c0_38] : memref<1x512xf32, #tpu.memory_space<vmem>>, vector<1x512xf32>
      %105 = vector.broadcast %104 : vector<1x512xf32> to vector<16x512xf32>
      %106 = arith.addf %103, %105 : vector<16x512xf32>
      %cst_39 = arith.constant 5.000000e-01 : f32
      %107 = vector.broadcast %cst_39 : f32 to vector<16x512xf32>
      %108 = arith.mulf %107, %106 : vector<16x512xf32>
      %cst_40 = arith.constant 4.471500e-02 : f32
      %109 = vector.broadcast %cst_40 : f32 to vector<16x512xf32>
      %110 = arith.mulf %109, %106 : vector<16x512xf32>
      %111 = arith.mulf %110, %106 : vector<16x512xf32>
      %112 = arith.mulf %111, %106 : vector<16x512xf32>
      %113 = arith.addf %106, %112 : vector<16x512xf32>
      %cst_41 = arith.constant 0.797884583 : f32
      %114 = vector.broadcast %cst_41 : f32 to vector<16x512xf32>
      %115 = arith.mulf %114, %113 : vector<16x512xf32>
      %116 = math.tanh %115 : vector<16x512xf32>
      %cst_42 = arith.constant 1.000000e+00 : f32
      %117 = vector.broadcast %cst_42 : f32 to vector<16x512xf32>
      %118 = arith.addf %117, %116 : vector<16x512xf32>
      %119 = arith.mulf %108, %118 : vector<16x512xf32>
      %120 = arith.truncf %119 : vector<16x512xf32> to vector<16x512xbf16>
      %c0_43 = arith.constant 0 : index
      %c0_44 = arith.constant 0 : index
      %121 = vector.load %arg14[%c0_43, %c0_44] : memref<512x128xbf16, #tpu.memory_space<vmem>>, vector<512x128xbf16>
      %cst_45 = arith.constant dense<0.000000e+00> : vector<16x128xf32>
      %122 = tpu.matmul %120, %121, %cst_45 {dimension_numbers = #tpu.dot_dimension_numbers<[1], [0], [0], [1], [0, 0, 1, 1], [], []>} : vector<16x512xbf16>, vector<512x128xbf16>, vector<16x128xf32> -> vector<16x128xf32>
      %c0_46 = arith.constant 0 : index
      %c0_47 = arith.constant 0 : index
      %123 = vector.load %arg15[%c0_46, %c0_47] : memref<1x128xf32, #tpu.memory_space<vmem>>, vector<1x128xf32>
      %124 = vector.broadcast %123 : vector<1x128xf32> to vector<16x128xf32>
      %125 = arith.addf %122, %124 : vector<16x128xf32>
      %126 = arith.addf %55, %125 : vector<16x128xf32>
      %c0_48 = arith.constant 0 : index
      %c0_49 = arith.constant 0 : index
      %c0_50 = arith.constant 0 : index
      %127 = vector.load %arg16[%c0_48, %c0_49, %c0_50] : memref<1x16x128xf32, #tpu.memory_space<vmem>>, vector<1x16x128xf32>
      %128 = vector.shape_cast %127 : vector<1x16x128xf32> to vector<16x128xf32>
      %129 = vector.shape_cast %126 : vector<16x128xf32> to vector<1x16x128xf32>
      tpu.vector_store %arg16[%c0_48, %c0_49, %c0_50], %129 {strides = array<i32>} : memref<1x16x128xf32, #tpu.memory_space<vmem>>, vector<1x16x128xf32>,
    } else {
    }
    return
  }
  func.func @transform_0(%arg0: i32, %arg1: i32, %arg2: i32) -> (i32, i32, i32) {
    %c0_i32 = arith.constant 0 : i32
    %c0_i32_0 = arith.constant 0 : i32
    return %arg0, %arg1, %c0_i32 : i32, i32, i32
  }
  func.func @transform_1(%arg0: i32, %arg1: i32, %arg2: i32) -> (i32, i32) {
    %c0_i32 = arith.constant 0 : i32
    %c0_i32_0 = arith.constant 0 : i32
    %c0_i32_1 = arith.constant 0 : i32
    return %c0_i32, %c0_i32_0 : i32, i32
  }
  func.func @transform_2(%arg0: i32, %arg1: i32, %arg2: i32) -> (i32, i32) {
    %c0_i32 = arith.constant 0 : i32
    %c0_i32_0 = arith.constant 0 : i32
    %c0_i32_1 = arith.constant 0 : i32
    return %c0_i32, %c0_i32_0 : i32, i32
  }
  func.func @transform_3(%arg0: i32, %arg1: i32, %arg2: i32) -> (i32, i32) {
    %c0_i32 = arith.constant 0 : i32
    %c0_i32_0 = arith.constant 0 : i32
    %c0_i32_1 = arith.constant 0 : i32
    return %c0_i32, %c0_i32_0 : i32, i32
  }
  func.func @transform_4(%arg0: i32, %arg1: i32, %arg2: i32) -> (i32, i32, i32) {
    %c0_i32 = arith.constant 0 : i32
    %c0_i32_0 = arith.constant 0 : i32
    return %arg0, %arg2, %c0_i32 : i32, i32, i32
  }
  func.func @transform_5(%arg0: i32, %arg1: i32, %arg2: i32) -> (i32, i32) {
    %c0_i32 = arith.constant 0 : i32
    %c0_i32_0 = arith.constant 0 : i32
    %c0_i32_1 = arith.constant 0 : i32
    return %c0_i32, %c0_i32_0 : i32, i32
  }
  func.func @transform_6(%arg0: i32, %arg1: i32, %arg2: i32) -> (i32, i32) {
    %c0_i32 = arith.constant 0 : i32
    %c0_i32_0 = arith.constant 0 : i32
    %c0_i32_1 = arith.constant 0 : i32
    return %c0_i32, %c0_i32_0 : i32, i32
  }
  func.func @transform_7(%arg0: i32, %arg1: i32, %arg2: i32) -> (i32, i32) {
    %c0_i32 = arith.constant 0 : i32
    %c0_i32_0 = arith.constant 0 : i32
    %c0_i32_1 = arith.constant 0 : i32
    return %c0_i32, %c0_i32_0 : i32, i32
  }
  func.func @transform_8(%arg0: i32, %arg1: i32, %arg2: i32) -> (i32, i32) {
    %c0_i32 = arith.constant 0 : i32
    %c0_i32_0 = arith.constant 0 : i32
    %c0_i32_1 = arith.constant 0 : i32
    return %c0_i32, %c0_i32_0 : i32, i32
  }
  func.func @transform_9(%arg0: i32, %arg1: i32, %arg2: i32) -> (i32, i32) {
    %c0_i32 = arith.constant 0 : i32
    %c0_i32_0 = arith.constant 0 : i32
    %c0_i32_1 = arith.constant 0 : i32
    return %c0_i32, %c0_i32_0 : i32, i32
  }
  func.func @transform_10(%arg0: i32, %arg1: i32, %arg2: i32) -> (i32, i32) {
    %c0_i32 = arith.constant 0 : i32
    %c0_i32_0 = arith.constant 0 : i32
    %c0_i32_1 = arith.constant 0 : i32
    return %c0_i32, %c0_i32_0 : i32, i32
  }
  func.func @transform_11(%arg0: i32, %arg1: i32, %arg2: i32) -> (i32, i32) {
    %c0_i32 = arith.constant 0 : i32
    %c0_i32_0 = arith.constant 0 : i32
    %c0_i32_1 = arith.constant 0 : i32
    return %c0_i32, %c0_i32_0 : i32, i32
  }
  func.func @transform_12(%arg0: i32, %arg1: i32, %arg2: i32) -> (i32, i32) {
    %c0_i32 = arith.constant 0 : i32
    %c0_i32_0 = arith.constant 0 : i32
    %c0_i32_1 = arith.constant 0 : i32
    return %c0_i32, %c0_i32_0 : i32, i32
  }
  func.func @transform_13(%arg0: i32, %arg1: i32, %arg2: i32) -> (i32, i32, i32) {
    %c0_i32 = arith.constant 0 : i32
    %c0_i32_0 = arith.constant 0 : i32
    return %arg0, %arg1, %c0_i32 : i32, i32, i32
  }
}

</mosaic_0001>

<bundles_post_ra>
// kernel: transformer_block.2
= control target key start
LH: loop header
LB: loop body
LE: loop exit
PB: predicated region body
PF: predicated region fallthrough
CT: control target
= control target key end

     0   :  { %s1414_s0 = inlined_call_operand.hbm [shape: f32[2,64,128], index: 0, kind: input, shape index: {}]   ;;  %s1415_s1 = inlined_call_operand.vmem [shape: f32[1,128], index: 1, kind: input, shape index: {}]   ;;  %s1416_s2 = inlined_call_operand.vmem [shape: f32[1,128], index: 2, kind: input, shape index: {}]   ;;  %s1417_s3 = inlined_call_operand.hbm [shape: bf16[128,256], index: 3, kind: input, shape index: {}]   ;;  %s1418_s4 = inlined_call_operand.vmem [shape: bf16[2,64,256], index: 4, kind: output, shape index: {}]  }
   0x1   :  { %1426 = sst [smem:[#allocation9_spill]] %s1417_s3 }
   0x2   :  { %1427 = sst [smem:[#allocation10_spill]] %s1418_s4 }
   0x3   :  { %9 = vsyncpa [#allocation3], 0 }
   0x4   :  { %11 = vsyncpa [#allocation3 + $0x1], 0 }
   0x5   :  { %12 = vsyncpa [#allocation5], 0  ;;  %s1144_s15 = smov 0   ;;  %s1146_s16 = smov 0  }
   0x6   :  { %s1148_s17 = smov 0   ;;  %s1150_s18 = smov 0  }
   0x7   :  { %s1152_s19 = smov 0   ;;  %s1154_s20 = smov 0  }
   0x8   :  { %s1156_s21 = smov 0   ;;  %s1158_s22 = smov 0  }
   0x9 LB: > { %s781_s23 = sadd.s32 4294967295, %s1111_s22   ;;  %p52_p0 = scmp.ne.s32.totalorder %s1087_s16, %s1083_s15  ;;  %s1111_s22 = sphi %s1158_s22, %s18_s22   ;;  %s1107_s21 = sphi %s1156_s21, %s1449_s21   ;;  %s1103_s20 = sphi %s1154_s20, %s1448_s20   ;;  %s1099_s19 = sphi %s1152_s19, %s1447_s19   ;;  %s1095_s18 = sphi %s1150_s18, %s1446_s18   ;;  %s1091_s17 = sphi %s1148_s17, %s1445_s17   ;;  %s1087_s16 = sphi %s1146_s16, %s1444_s16   ;;  %s1083_s15 = sphi %s1144_s15, %s1443_s15  }
   0xa   : > { %p1184_p1 = scmp.eq.s32.totalorder %s781_s23, 0  ;;  %p783_p2 = scmp.ge.s32.totalorder %s1111_s22, 1 }
   0xb   : > { %p154_p3 = scmp.lt.s32.totalorder %s1111_s22, 5  ;;  %s1113_s27 = smov [#allocation4]  }
   0xc   : > { %s1428_s24 = scalar_select %p1184_p1, 1, 0 }
   0xd   : > { %p1192_p4 = por %p1184_p1, %p52_p0  ;;  %p1196_p5 = pnand %p783_p2, %p154_p3 }
   0xe   : > { %s172_s28 = sshll.u32 %s1113_s27, 4  ;;  %s1432_s3 = sld [smem:[#allocation9_spill]]  ;;  %s173_s28 = int_to_ptr.vmem [resolvable:$true] %s172_s28 }
   0xf   : > { %s1429_s25 = scalar_select %p1192_p4, 1, 0 }
  0x10   : > { %s1430_s26 = scalar_select %p1196_p5, 1, 0 }
  0x11   : > { %p847_p6 = pneg %p1196_p5 }
  0x13   : > { %p1204_p7 = pnand %p847_p6, %p1184_p1 }
  0x14   : > { %s983_s6 = scalar_lea.hbm %s1432_s3, 2048 }
  0x15   : > { %p984_p8 = scmp.ne.s32.totalorder %s1432_s3, %s983_s6  ;;  %p985_p9 = pneg %p1204_p7 }
  0x16   : > { %p990_p12 = scmp.lt.u32.totalorder %s983_s6, %s1432_s3 }
  0x17   : > { %p986_p10 = pnand %p985_p9, %p984_p8 }
  0x19   : > { %p987_p11 = pneg %p986_p10 }
  0x1b   : > { %p992_p13 = pnand %p990_p12, %p987_p11 }
  0x1d   : > { %995 = shalt.err (!%p992_p13)
}
  0x1e   : > { %s996_s11 = scalar_lea.vmem %s173_s28, 2048  ;;  %p1004_p6 = scmp.lt.s32.totalorder %s173_s28, %s173_s28 }
  0x1f   : > { %p997_p0 = scmp.ne.s32.totalorder %s173_s28, %s996_s11  ;;  %p1005_p1 = scmp.lt.s32.totalorder %s996_s11, %s996_s11 }
  0x21   : > { %p999_p2 = pnand %p997_p0, %p985_p9  ;;  %p1006_p4 = por %p1005_p1, %p1004_p6 }
  0x23   : > { %p1000_p3 = pneg %p999_p2 }
  0x25   : > { %p1007_p5 = pnand %p1006_p4, %p1000_p3 }
  0x27   : > { %1010 = shalt.err (!%p1007_p5)
}
  0x28   : > { %s1423_s12 = smov 128   ;;  %s1424_s13 = smov 8  }
  0x29   : > { %850 = dma.hbm_to_vmem [thread:$0]  (!%p1204_p7), %s1432_s3, 2048, %s173_s28, [#allocation5], %s1423_s12, %s1423_s12, %s1424_s13  }
  0x2a   : > { %s27_s23 = sadd.s32 1, %s1103_s20  ;;  %s30_s27 = sadd.s32 1, %s1107_s21 }
  0x2b   : > { %p28_p1 = scmp.ge.s32.totalorder %s27_s23, 2  ;;  %s39_s30 = sadd.s32 1, %s1091_s17 }
  0x2c   : > { %p46_p4 = scmp.ne.s32.totalorder %s1091_s17, %s1087_s16  ;;  %p47_p5 = scmp.eq.s32.totalorder %s1111_s22, 0 }
  0x2d   : > { %s1451_s23 = smov (%p28_p1, %s27_s23), 0  ;;  %s1453_s27 = smov (!%p28_p1, %s30_s27), %s1107_s21 }
  0x2e   : > { %1433 = sst [smem:[#allocation8_spill]] %s1451_s23  ;;  %s35_s29 = ssub.s32 %s1103_s20, %s1451_s23 }
  0x2f   : > { %p32_p8 = scmp.ge.s32.totalorder %s1453_s27, 2  ;;  %p856_p9 = scmp.lt.s32.totalorder %s1111_s22, 4 }
  0x30   : > { %p1239_p10 = por %p47_p5, %p46_p4  ;;  %s186_s28 = sand.u32 1, %s1091_s17  }
  0x31   : > { %s1455_s27 = smov (%p32_p8, %s1453_s27), 0  ;;  %s786_s6 = sshll.u32 %s186_s28, 5 }
  0x32   : > { %s34_s7 = ssub.s32 %s1107_s21, %s1455_s27  ;;  %s787_s9 = sshll.u32 %s1103_s20, 2 }
  0x33   : > { %s36_s8 = sor.u32 %s35_s29, %s34_s7  ;;  %s788_s10 = sshll.u32 %s1107_s21, 3 }
  0x34   : > { %p37_p7 = scmp.eq.s32.totalorder %s36_s8, 0  ;;  %s196_s11 = sadd.s32 %s788_s10, %s787_s9 }
  0x35   : > { %s190_s14 = scalar_lea.vmem [#allocation2], %s786_s6  ;;  %s789_s13 = sshll.u32 %s196_s11, 7 }
  0x36   : > { %s199_s15 = sshll.u32 %s190_s14, 4  ;;  %s1258_s4 = scalar_lea.hbm %s1414_s0, %s789_s13  ;;  %s1253_s15 = int_to_ptr.vmem [resolvable:$true] %s199_s15 }
  0x37   : > { %s1251_s12 = scalar_select %p37_p7, %s1091_s17, %s39_s30  }
  0x38   : > { %p1264_p11 = pnand %p856_p9, %p1239_p10  ;;  %s1268_s30 = scalar_lea.sflag [#allocation3], %s186_s28 }
  0x39   : > { %s1011_s6 = scalar_lea.hbm %s1258_s4, 512  ;;  %s1016_s23 = scalar_lea.hbm %s1414_s0, 2048 }
  0x3a   : > { %p1012_p12 = scmp.ne.s32.totalorder %s1258_s4, %s1011_s6  ;;  %p1013_p13 = pneg %p1264_p11 }
  0x3b   : > { %p1017_p3 = scmp.lt.u32.totalorder %s1258_s4, %s1414_s0  ;;  %p1018_p6 = scmp.lt.u32.totalorder %s1016_s23, %s1011_s6 }
  0x3c   : > { %p1014_p0 = pnand %p1013_p13, %p1012_p12  ;;  %p1020_p4 = scmp.lt.u32.totalorder %s1011_s6, %s1258_s4 }
  0x3d   : > { %p1019_p1 = por %p1018_p6, %p1017_p3 }
  0x3e   : > { %p1015_p2 = pneg %p1014_p0 }
  0x3f   : > { %p1021_p5 = por %p1020_p4, %p1019_p1 }
  0x41   : > { %p1022_p8 = pnand %p1021_p5, %p1015_p2 }
  0x43   : > { %1025 = shalt.err (!%p1022_p8)
}
  0x44   : > { %s1026_s28 = scalar_lea.vmem %s1253_s15, 512  ;;  %s1116_s8 = smov [#allocation2]  }
  0x45   : > { %p1027_p9 = scmp.ne.s32.totalorder %s1253_s15, %s1026_s28  ;;  %s1031_s9 = sshll.u32 %s1116_s8, 4  ;;  %s1032_s9 = int_to_ptr.vmem [resolvable:$false] %s1031_s9 }
  0x46   : > { %s1033_s10 = scalar_lea.vmem %s1032_s9, 1024  ;;  %p1034_p12 = scmp.lt.s32.totalorder %s1253_s15, %s1032_s9 }
  0x47   : > { %p1029_p10 = pnand %p1027_p9, %p1013_p13  ;;  %p1035_p0 = scmp.lt.s32.totalorder %s1033_s10, %s1026_s28 }
  0x49   : > { %p1030_p7 = pneg %p1029_p10  ;;  %p1036_p3 = por %p1035_p0, %p1034_p12 }
  0x4b   : > { %p1037_p6 = pnand %p1036_p3, %p1030_p7 }
  0x4d   : > { %1040 = shalt.err (!%p1037_p6)
}
  0x4e   : > { %s1436_s11 = smov 8   ;;  %s1437_s14 = smov 128  }
  0x4f   : > { %854 = dma.hbm_to_vmem [thread:$0]  (!%p1264_p11), %s1258_s4, 512, %s1253_s15, %s1268_s30, %s1437_s14, %s1437_s14, %s1436_s11  }
  0x50   : > { %p1438_p13 = scmp.ne.s32.totalorder %s1430_s26, 0 }
  0x51   : > { %s213_s6 = sand.u32 (!%p1438_p13), 1, %s1087_s16   ;;  %p1439_p2 = scmp.ne.s32.totalorder (!%p1438_p13), %s1429_s25, 0 }
  0x52   : > { %211 = sbr.rel (%p1438_p13) target bundleno = 881 (0x371), region = 36  ;;  %s791_s3 = sshll.u32 (!%p1438_p13), %s213_s6, 5 }
  0x53   : > { %s214_s13 = scalar_lea.sflag (!%p1438_p13), [#allocation3], %s213_s6  ;;  %s217_s23 = scalar_lea.vmem (!%p1438_p13), [#allocation2], %s791_s3 }
  0x59   : > { %1074 = dma.done.wait (%p1439_p2), %s214_s13, 512  }
  0x5a   : > { %1076 = vsyncadd (%p1439_p2), %s214_s13, 4294966784  ;;  %p1440_p1 = scmp.ne.s32.totalorder %s1428_s24, 0 }
  0x5c   : > { %1078 = dma.done.wait (%p1440_p1), [#allocation5], 2048  }
  0x5d   : > { %1080 = vsyncadd (%p1440_p1), [#allocation5], 4294965248  ;;  %v264_v0 = vld [vmem:[%s217_s23] sm:$0xff]  ;;  %v266_v1 = vld [vmem:[%s217_s23 + $0x10] sm:$0xff]  ;;  %s1117_s4 = smov 64   ;;  %vm270_vm0 = vcmask 523264  }
  0x5e   : > { %v265_v2 = vld [vmem:[%s217_s23 + $0x8] sm:$0xff]  ;;  %356 = vrot.lane.b32.xlu0 %v264_v0, %s1117_s4  ;;  %360 = vrot.lane.b32.xlu1 %v266_v1, %s1117_s4  ;;  %v267_v3 = vld [vmem:[%s217_s23 + $0x18] sm:$0xff]  ;;  %v271_v12 = vsel %vm270_vm0, %v264_v0, 0.0  ;;  %v277_v14 = vsel %vm270_vm0, %v266_v1, 0.0  ;;  %s793_s29 = sshll.u32 %s1095_s18, 2  ;;  %p253_p11 = scmp.lt.s32.totalorder %s1099_s19, 1 }
  0x5f   : > { %v274_v13 = vsel %vm270_vm0, %v265_v2, 0.0  ;;  %v280_v15 = vsel %vm270_vm0, %v267_v3, 0.0  ;;  %v927_v60 = vld [vmem:[#allocation4 + $0x4] ss:$8 sps:$4 sm:$0xff]   ;;  %v929_v61 = vld [vmem:[#allocation4] ss:$8 sps:$4 sm:$0xff]  }
  0x60   : > { %586 = vmatprep.subr.bf16.mxu0 %v927_v60  ;;  %825 = vmatprep.subr.bf16.mxu1 %v927_v60  ;;  %v930_v62 = vld [vmem:[#allocation4 + $0x14] ss:$8 sps:$4 sm:$0xff]   ;;  %v932_v63 = vld [vmem:[#allocation4 + $0x10] ss:$8 sps:$4 sm:$0xff]   ;;  %p255_p4 = scmp.lt.s32.totalorder %s793_s29, 7  ;;  %s1457_s19 = smov (!%p253_p11, %s1099_s19), 1 }
  0x61   : > { %587 = vmatpush1.bf16.msra.mxu0 %v929_v61  ;;  %833 = vmatpush1.bf16.msra.mxu1 %v929_v61  ;;  %s795_s5 = sshll.u32 %s1457_s19, 4  ;;  %s1441_s10 = sld [smem:[#allocation10_spill]] }
  0x62   : > { %358 = vrot.lane.b32.xlu0 %v265_v2, %s1117_s4  ;;  %362 = vrot.lane.b32.xlu1 %v267_v3, %s1117_s4  ;;  %s1459_s29 = smov (!%p255_p4, %s793_s29), 7 }
  0x63   : > { %588 = vmatprep.subr.bf16.mxu0 %v930_v62  ;;  %826 = vmatprep.subr.bf16.mxu1 %v930_v62  ;;  %s794_s30 = sshll.u32 %s1459_s29, 1 }
  0x64   : > { %s259_s7 = sadd.s32 %s795_s5, %s794_s30 }
  0x65   : > { %589 = vmatpush1.bf16.msra.mxu0 %v932_v63  ;;  %834 = vmatpush1.bf16.msra.mxu1 %v932_v63  ;;  %s796_s28 = sshll.u32 %s259_s7, 2 }
  0x67   : > { %s261_s11 = scalar_lea.vmem %s1441_s10, %s796_s28 }
  0xd0   : > { %v357_v4 = vpop.permute.xlu0 %356  ;;  %v361_v5 = vpop.permute.xlu1 %360 }
  0xd1   : > { %v368_v6 = vsel %vm270_vm0, %v357_v4, 0.0  ;;  %v374_v7 = vsel %vm270_vm0, %v361_v5, 0.0  ;;  %v939_v4 = vld [vmem:[#allocation4 + $0x44] ss:$8 sps:$4 sm:$0xff]   ;;  %v941_v5 = vld [vmem:[#allocation4 + $0x40] ss:$8 sps:$4 sm:$0xff]  }
  0xd2   : > { %369 = vadd.xlane.f32.xlu0 %v368_v6  ;;  %v942_v6 = vld [vmem:[#allocation4 + $0x54] ss:$8 sps:$4 sm:$0xff]  }
  0xd4   : > { %v359_v8 = vpop.permute.xlu0 %358  ;;  %v363_v9 = vpop.permute.xlu1 %362 }
  0xd5   : > { %v371_v10 = vsel %vm270_vm0, %v359_v8, 0.0  ;;  %v377_v11 = vsel %vm270_vm0, %v363_v9, 0.0  ;;  %v945_v8 = vld [vmem:[#allocation4 + $0x64] ss:$8 sps:$4 sm:$0xff]   ;;  %v1118_v9 = vmov 0  }
  0xd6   : > { %375 = vadd.xlane.f32.xlu0 %v374_v7  ;;  %372 = vadd.xlane.f32.xlu1 %v371_v10  ;;  %v944_v7 = vld [vmem:[#allocation4 + $0x50] ss:$8 sps:$4 sm:$0xff]   ;;  %v947_v10 = vld [vmem:[#allocation4 + $0x60] ss:$8 sps:$4 sm:$0xff]  }
  0xd7   : > { %618 = vmatprep.mubr.bf16.mxu0 %v1118_v9  ;;  %628 = vmatprep.mubr.bf16.mxu1 %v1118_v9 }
  0xda   : > { %378 = vadd.xlane.f32.xlu0 %v377_v11  ;;  %272 = vadd.xlane.f32.xlu1 %v271_v12  ;;  %v948_v11 = vld [vmem:[#allocation4 + $0x74] ss:$8 sps:$4 sm:$0xff]   ;;  %v950_v12 = vld [vmem:[#allocation4 + $0x70] ss:$8 sps:$4 sm:$0xff]  }
  0xde   : > { %275 = vadd.xlane.f32.xlu0 %v274_v13  ;;  %278 = vadd.xlane.f32.xlu1 %v277_v14 }
  0xe2   : > { %281 = vadd.xlane.f32.xlu0 %v280_v15 }
 0x15f   : > { %v370_v16 = vpop.xlane.xlu0 %369 }
 0x160   : > { %v380_v17 = vmul.f32 0.015625, %v370_v16 }
 0x162   : > { %v1322_v18 = vsub.f32 %v264_v0, %v380_v17 }
 0x163   : > { %v373_v19 = vpop.xlane.xlu1 %372  ;;  %v376_v20 = vpop.xlane.xlu0 %375 }
 0x164   : > { %v381_v21 = vmul.f32 0.015625, %v373_v19  ;;  %v382_v22 = vmul.f32 0.015625, %v376_v20  ;;  %v388_v23 = vmul.f32 %v1322_v18, %v1322_v18 }
 0x166   : > { %v1326_v24 = vsub.f32 %v265_v2, %v381_v21  ;;  %v1328_v25 = vsub.f32 %v266_v1, %v382_v22  ;;  %396 = vrot.lane.b32.xlu1 %v388_v23, %s1117_s4 }
 0x167   : > { %v379_v26 = vpop.xlane.xlu0 %378  ;;  %v273_v32 = vpop.xlane.xlu1 %272 }
 0x168   : > { %v383_v27 = vmul.f32 0.015625, %v379_v26  ;;  %v389_v28 = vmul.f32 %v1326_v24, %v1326_v24  ;;  %v390_v29 = vmul.f32 %v1328_v25, %v1328_v25  ;;  %v284_v34 = vmul.f32 0.015625, %v273_v32 }
 0x16a   : > { %v1335_v30 = vsub.f32 %v267_v3, %v383_v27  ;;  %398 = vrot.lane.b32.xlu0 %v389_v28, %s1117_s4  ;;  %400 = vrot.lane.b32.xlu1 %v390_v29, %s1117_s4  ;;  %v1342_v36 = vsub.f32 %v264_v0, %v284_v34  ;;  %v933_v0 = vld [vmem:[#allocation4 + $0x24] ss:$8 sps:$4 sm:$0xff]  }
 0x16b   : > { %v276_v33 = vpop.xlane.xlu0 %275  ;;  %v279_v35 = vpop.xlane.xlu1 %278  ;;  %590 = vmatprep.subr.bf16.mxu0 %v933_v0  ;;  %827 = vmatprep.subr.bf16.mxu1 %v933_v0 }
 0x16c   : > { %v391_v31 = vmul.f32 %v1335_v30, %v1335_v30  ;;  %v286_v37 = vmul.f32 0.015625, %v279_v35  ;;  %v292_v41 = vmul.f32 %v1342_v36, %v1342_v36  ;;  %v285_v42 = vmul.f32 0.015625, %v276_v33 }
 0x16e   : > { %402 = vrot.lane.b32.xlu1 %v391_v31, %s1117_s4  ;;  %v1344_v39 = vsub.f32 %v266_v1, %v286_v37  ;;  %v296_v44 = vsel %vm270_vm0, %v292_v41, 0.0  ;;  %v1353_v46 = vsub.f32 %v265_v2, %v285_v42  ;;  %v935_v1 = vld [vmem:[#allocation4 + $0x20] ss:$8 sps:$4 sm:$0xff]   ;;  %v936_v2 = vld [vmem:[#allocation4 + $0x34] ss:$8 sps:$4 sm:$0xff]  }
 0x16f   : > { %v282_v38 = vpop.xlane.xlu0 %281  ;;  %591 = vmatpush1.bf16.msra.mxu0 %v935_v1  ;;  %835 = vmatpush1.bf16.msra.mxu1 %v935_v1 }
 0x170   : > { %v287_v40 = vmul.f32 0.015625, %v282_v38  ;;  %v294_v45 = vmul.f32 %v1344_v39, %v1344_v39  ;;  %v293_v49 = vmul.f32 %v1353_v46, %v1353_v46  ;;  %592 = vmatprep.subr.bf16.mxu0 %v936_v2  ;;  %828 = vmatprep.subr.bf16.mxu1 %v936_v2 }
 0x172   : > { %v1348_v43 = vsub.f32 %v267_v3, %v287_v40  ;;  %v302_v47 = vsel %vm270_vm0, %v294_v45, 0.0  ;;  %v299_v51 = vsel %vm270_vm0, %v293_v49, 0.0  ;;  %v938_v3 = vld [vmem:[#allocation4 + $0x30] ss:$8 sps:$4 sm:$0xff]  }
 0x173   : > { %593 = vmatpush1.bf16.msra.mxu0 %v938_v3  ;;  %836 = vmatpush1.bf16.msra.mxu1 %v938_v3 }
 0x174   : > { %v295_v48 = vmul.f32 %v1348_v43, %v1348_v43  ;;  %594 = vmatprep.subr.bf16.mxu0 %v939_v4  ;;  %829 = vmatprep.subr.bf16.mxu1 %v939_v4 }
 0x176   : > { %v305_v50 = vsel %vm270_vm0, %v295_v48, 0.0 }
 0x177   : > { %595 = vmatpush1.bf16.msra.mxu0 %v941_v5  ;;  %837 = vmatpush1.bf16.msra.mxu1 %v941_v5 }
 0x178   : > { %596 = vmatprep.subr.bf16.mxu0 %v942_v6  ;;  %830 = vmatprep.subr.bf16.mxu1 %v942_v6 }
 0x17b   : > { %597 = vmatpush1.bf16.msra.mxu0 %v944_v7  ;;  %838 = vmatpush1.bf16.msra.mxu1 %v944_v7 }
 0x17c   : > { %598 = vmatprep.subr.bf16.mxu0 %v945_v8  ;;  %831 = vmatprep.subr.bf16.mxu1 %v945_v8 }
 0x17f   : > { %599 = vmatpush1.bf16.msra.mxu0 %v947_v10  ;;  %839 = vmatpush1.bf16.msra.mxu1 %v947_v10 }
 0x180   : > { %600 = vmatprep.subr.bf16.mxu0 %v948_v11  ;;  %832 = vmatprep.subr.bf16.mxu1 %v948_v11 }
 0x183   : > { %601 = vmatpush1.bf16.msra.mxu0 %v950_v12  ;;  %840 = vmatpush1.bf16.msra.mxu1 %v950_v12 }
 0x189   : > { %297 = vadd.xlane.f32.xlu0 %v296_v44 }
 0x18d   : > { %303 = vadd.xlane.f32.xlu0 %v302_v47 }
 0x191   : > { %306 = vadd.xlane.f32.xlu0 %v305_v50 }
 0x192   : > { %300 = vadd.xlane.f32.xlu1 %v299_v51 }
 0x1d8   : > { %v397_v52 = vpop.permute.xlu1 %396 }
 0x1d9   : > { %v408_v53 = vsel %vm270_vm0, %v397_v52, 0.0 }
 0x1da   : > { %409 = vadd.xlane.f32.xlu1 %v408_v53 }
 0x1dc   : > { %v399_v54 = vpop.permute.xlu0 %398  ;;  %v401_v55 = vpop.permute.xlu1 %400 }
 0x1dd   : > { %v411_v56 = vsel %vm270_vm0, %v399_v54, 0.0  ;;  %v414_v57 = vsel %vm270_vm0, %v401_v55, 0.0 }
 0x1de   : > { %412 = vadd.xlane.f32.xlu0 %v411_v56  ;;  %415 = vadd.xlane.f32.xlu1 %v414_v57 }
 0x1e0   : > { %v403_v58 = vpop.permute.xlu1 %402 }
 0x1e1   : > { %v417_v59 = vsel %vm270_vm0, %v403_v58, 0.0 }
 0x1e2   : > { %418 = vadd.xlane.f32.xlu0 %v417_v59 }
 0x216   : > { %v298_v13 = vpop.xlane.xlu0 %297 }
 0x217   : > { %v308_v15 = vmul.f32 0.015625, %v298_v13 }
 0x219   : > { %951 = vrsqrt.f32 %v308_v15  ;;  %vm314_vm1 = vcmp.eq.f32.partialorder %v308_v15, inf  ;;  %v317_v35 = vand.u32 2147483648, %v308_v15  ;;  %vm316_vm2 = vcmp.eq.f32.partialorder %v308_v15, 0.0 }
 0x21a   : > { %v304_v14 = vpop.xlane.xlu0 %303 }
 0x21b   : > { %v310_v17 = vmul.f32 0.015625, %v304_v14 }
 0x21d   : > { %953 = vrsqrt.f32 %v310_v17  ;;  %vm328_vm3 = vcmp.eq.f32.partialorder %v310_v17, inf  ;;  %vm330_vm5 = vcmp.eq.f32.partialorder %v310_v17, 0.0  ;;  %v331_v47 = vand.u32 2147483648, %v310_v17 }
 0x21e   : > { %v307_v19 = vpop.xlane.xlu0 %306 }
 0x21f   : > { %v301_v16 = vpop.xlane.xlu1 %300  ;;  %v311_v21 = vmul.f32 0.015625, %v307_v19 }
 0x220   : > { %v309_v20 = vmul.f32 0.015625, %v301_v16 }
 0x221   : > { %vm335_vm6 = vcmp.eq.f32.partialorder %v311_v21, inf  ;;  %vm337_vm8 = vcmp.eq.f32.partialorder %v311_v21, 0.0  ;;  %v338_v55 = vand.u32 2147483648, %v311_v21 }
 0x222   : > { %955 = vrsqrt.f32 %v309_v20  ;;  %vm321_vm4 = vcmp.eq.f32.partialorder %v309_v20, inf  ;;  %v324_v50 = vand.u32 2147483648, %v309_v20  ;;  %vm323_vm7 = vcmp.eq.f32.partialorder %v309_v20, 0.0 }
 0x223   : > { %957 = vrsqrt.f32 %v311_v21  ;;  %v952_v22 = vpop.eup %951 }
 0x224   : > { %v313_v27 = vmul.f32 %v952_v22, %v308_v15 }
 0x226   : > { %v315_v37 = vsel %vm314_vm1, %v308_v15, %v313_v27 }
 0x227   : > { %v954_v28 = vpop.eup %953  ;;  %v318_v45 = vsel %vm316_vm2, %v317_v35, %v315_v37 }
 0x228   : > { %v327_v38 = vmul.f32 %v954_v28, %v310_v17  ;;  %v340_v53 = vadd.f32 1e-05, %v318_v45 }
 0x22a   : > { %v329_v48 = vsel %vm328_vm3, %v310_v17, %v327_v38 }
 0x22b   : > { %v332_v54 = vsel %vm330_vm5, %v331_v47, %v329_v48 }
 0x22c   : > { %v956_v32 = vpop.eup %955  ;;  %v342_v62 = vadd.f32 1e-05, %v332_v54 }
 0x22d   : > { %v958_v40 = vpop.eup %957  ;;  %v320_v41 = vmul.f32 %v956_v32, %v309_v20 }
 0x22e   : > { %v334_v49 = vmul.f32 %v958_v40, %v311_v21 }
 0x22f   : > { %v322_v51 = vsel %vm321_vm4, %v309_v20, %v320_v41  ;;  %v798_v41 = vld [vmem:[%s1416_s2] ss:$0 sm:$0xff] }
 0x230   : > { %v336_v57 = vsel %vm335_vm6, %v311_v21, %v334_v49  ;;  %v325_v58 = vsel %vm323_vm7, %v324_v50, %v322_v51 }
 0x231   : > { %v339_v1 = vsel %vm337_vm8, %v338_v55, %v336_v57  ;;  %v341_v2 = vadd.f32 1e-05, %v325_v58 }
 0x232   : > { %v343_v10 = vadd.f32 1e-05, %v339_v1 }
 0x267   : > { %v410_v23 = vpop.xlane.xlu1 %409 }
 0x268   : > { %v420_v26 = vmul.f32 0.015625, %v410_v23 }
 0x26a   : > { %959 = vrsqrt.f32 %v420_v26  ;;  %vm426_vm9 = vcmp.eq.f32.partialorder %v420_v26, inf  ;;  %v429_v59 = vand.u32 2147483648, %v420_v26  ;;  %vm428_vm10 = vcmp.eq.f32.partialorder %v420_v26, 0.0 }
 0x26b   : > { %v413_v29 = vpop.xlane.xlu0 %412  ;;  %v416_v31 = vpop.xlane.xlu1 %415 }
 0x26c   : > { %v421_v33 = vmul.f32 0.015625, %v413_v29  ;;  %v422_v34 = vmul.f32 0.015625, %v416_v31  ;;  %v797_v31 = vld [vmem:[%s1415_s1] ss:$0 sm:$0xff] }
 0x26e   : > { %961 = vrsqrt.f32 %v421_v33  ;;  %vm433_vm11 = vcmp.eq.f32.partialorder %v421_v33, inf  ;;  %vm435_vm12 = vcmp.eq.f32.partialorder %v421_v33, 0.0  ;;  %v436_v5 = vand.u32 2147483648, %v421_v33 }
 0x26f   : > { %963 = vrsqrt.f32 %v422_v34  ;;  %v419_v42 = vpop.xlane.xlu0 %418  ;;  %vm440_vm13 = vcmp.eq.f32.partialorder %v422_v34, inf  ;;  %v443_v8 = vand.u32 2147483648, %v422_v34  ;;  %vm442_vm14 = vcmp.eq.f32.partialorder %v422_v34, 0.0 }
 0x270   : > { %v423_v44 = vmul.f32 0.015625, %v419_v42 }
 0x272   : > { %965 = vrsqrt.f32 %v423_v44  ;;  %vm447_vm15 = vcmp.eq.f32.partialorder %v423_v44, inf  ;;  %v450_v17 = vand.u32 2147483648, %v423_v44  ;;  %vm449_vm1 = vcmp.eq.f32.partialorder %v423_v44, 0.0 }
 0x273   : > { %967 = vrcp.f32 %v340_v53 }
 0x274   : > { %v960_v52 = vpop.eup %959 }
 0x275   : > { %v425_v56 = vmul.f32 %v960_v52, %v420_v26 }
 0x277   : > { %v427_v60 = vsel %vm426_vm9, %v420_v26, %v425_v56 }
 0x278   : > { %v962_v61 = vpop.eup %961  ;;  %v430_v63 = vsel %vm428_vm10, %v429_v59, %v427_v60 }
 0x279   : > { %v964_v0 = vpop.eup %963  ;;  %v452_v3 = vadd.f32 1e-05, %v430_v63  ;;  %v432_v4 = vmul.f32 %v962_v61, %v421_v33 }
 0x27a   : > { %v439_v6 = vmul.f32 %v964_v0, %v422_v34 }
 0x27b   : > { %969 = vrcp.f32 %v452_v3  ;;  %v434_v7 = vsel %vm433_vm11, %v421_v33, %v432_v4 }
 0x27c   : > { %v966_v9 = vpop.eup %965  ;;  %v437_v11 = vsel %vm435_vm12, %v436_v5, %v434_v7  ;;  %v441_v12 = vsel %vm440_vm13, %v422_v34, %v439_v6  ;;  %971 = vrcp.f32 %v341_v2 }
 0x27d   : > { %v453_v13 = vadd.f32 1e-05, %v437_v11  ;;  %v444_v14 = vsel %vm442_vm14, %v443_v8, %v441_v12  ;;  %v446_v15 = vmul.f32 %v966_v9, %v423_v44  ;;  %973 = vrcp.f32 %v342_v62  ;;  %v968_v22 = vpop.eup %967 }
 0x27e   : > { %v454_v16 = vadd.f32 1e-05, %v444_v14  ;;  %v345_v26 = vmul.f32 %v968_v22, %v1342_v36 }
 0x27f   : > { %975 = vrcp.f32 %v453_v13  ;;  %v448_v19 = vsel %vm447_vm15, %v423_v44, %v446_v15 }
 0x280   : > { %977 = vrcp.f32 %v454_v16  ;;  %v451_v20 = vsel %vm449_vm1, %v450_v17, %v448_v19 }
 0x281   : > { %979 = vrcp.f32 %v343_v10  ;;  %v455_v21 = vadd.f32 1e-05, %v451_v20 }
 0x283   : > { %981 = vrcp.f32 %v455_v21 }
 0x285   : > { %v970_v23 = vpop.eup %969 }
 0x286   : > { %v457_v27 = vmul.f32 %v970_v23, %v1322_v18  ;;  %v972_v28 = vpop.eup %971 }
 0x287   : > { %v974_v29 = vpop.eup %973  ;;  %v347_v35 = vmul.f32 %v972_v28, %v1353_v46 }
 0x288   : > { %v464_v32 = vsel %vm270_vm0, %v345_v26, %v457_v27  ;;  %v349_v36 = vmul.f32 %v974_v29, %v1344_v39 }
 0x289   : > { %v976_v33 = vpop.eup %975  ;;  %v474_v40 = vmul.f32 %v797_v31, %v464_v32 }
 0x28a   : > { %v978_v34 = vpop.eup %977  ;;  %v459_v37 = vmul.f32 %v976_v33, %v1326_v24 }
 0x28b   : > { %v980_v38 = vpop.eup %979  ;;  %v461_v18 = vmul.f32 %v978_v34, %v1328_v25  ;;  %v484_v39 = vadd.f32 %v798_v41, %v474_v40 }
 0x28c   : > { %v465_v42 = vsel %vm270_vm0, %v347_v35, %v459_v37  ;;  %v351_v24 = vmul.f32 %v980_v38, %v1348_v43 }
 0x28d   : > { %v982_v44 = vpop.eup %981  ;;  %v475_v45 = vmul.f32 %v797_v31, %v465_v42  ;;  %v466_v46 = vsel %vm270_vm0, %v349_v36, %v461_v18 }
 0x28e   : > { %v463_v47 = vmul.f32 %v982_v44, %v1335_v30  ;;  %v476_v25 = vmul.f32 %v797_v31, %v466_v46 }
 0x28f   : > { %v485_v48 = vadd.f32 %v798_v41, %v475_v45 }
 0x290   : > { %v467_v49 = vsel %vm270_vm0, %v351_v24, %v463_v47  ;;  %v486_v52 = vadd.f32 %v798_v41, %v476_v25 }
 0x291   : > { %v488_v50 = vpack.c.bf16 %v485_v48, %v484_v39  ;;  %v477_v51 = vmul.f32 %v797_v31, %v467_v49 }
 0x293   : > { %619 = vmatmul.mubr.bf16.vlgmr.msra.gmra.mrb[0].mxu0 %v488_v50  ;;  %v487_v53 = vadd.f32 %v798_v41, %v477_v51 }
 0x295   : > { %v489_v54 = vpack.c.bf16 %v487_v53, %v486_v52 }
 0x297   : > { %629 = vmatmul.mubr.bf16.vlgmr.msra.gmra.mrb[0].mxu1 %v489_v54 }
 0x366   : > { %v620_v30 = vpop.f32.mrb[0].mxu0 }
 0x367   : > { %v622_v43 = vpop.f32.mrb[1].mxu0 }
 0x368   : > { %v821_v55 = vpack.c.bf16 %v622_v43, %v620_v30  ;;  %v624_v56 = vpop.f32.mrb[2].mxu0 }
 0x369   : > { %v626_v57 = vpop.f32.mrb[3].mxu0 }
 0x36a   : > { %663 = vst [vmem:[%s261_s11] sm:$0xff] %v821_v55  ;;  %v822_v58 = vpack.c.bf16 %v626_v57, %v624_v56  ;;  %v630_v59 = vpop.f32.mrb[0].mxu1 }
 0x36b   : > { %v632_v60 = vpop.f32.mrb[1].mxu1 }
 0x36c   : > { %664 = vst [vmem:[%s261_s11 + $0x8] sm:$0xff] %v822_v58  ;;  %v823_v61 = vpack.c.bf16 %v632_v60, %v630_v59  ;;  %v634_v62 = vpop.f32.mrb[2].mxu1 }
 0x36d   : > { %v636_v63 = vpop.f32.mrb[3].mxu1 }
 0x36e   : > { %665 = vst [vmem:[%s261_s11 + $0x10] sm:$0xff] %v823_v61  ;;  %v824_v0 = vpack.c.bf16 %v636_v63, %v634_v62 }
 0x370   : > { %666 = vst [vmem:[%s261_s11 + $0x18] sm:$0xff] %v824_v0 }
 0x371 PF: > { %s18_s22 = sadd.s32 1, %s1111_s22   ;;  %s1442_s14 = sld [smem:[#allocation8_spill]] }
 0x372   : > { %p15_p5 = scmp.ge.s32.totalorder %s18_s22, 6   ;;  %s1443_s15 = smov %s1087_s16 }
 0x373   : > { %s1444_s16 = smov %s1091_s17  ;;  %s1445_s17 = smov %s1251_s12 }
 0x374   : > { %s1446_s18 = smov %s1103_s20  ;;  %s1447_s19 = smov %s1107_s21 }
 0x375   : > { %s1449_s21 = smov %s1455_s27  ;;  %17 = sbr.rel (!%p15_p5) target bundleno = 9 (0x9), region = 80 }
 0x377   : > { %s1448_s20 = smov %s1442_s14 }
 0x37c   :  { %699 = vsyncpa [#allocation3], 1 }
 0x37d   :  { %701 = vsyncpa [#allocation3 + $0x1], 1 }
 0x37e   :  { %702 = vsyncpa [#allocation5], 1 }

// kernel: transformer_block.3
= control target key start
LH: loop header
LB: loop body
LE: loop exit
PB: predicated region body
PF: predicated region fallthrough
CT: control target
= control target key end

     0   :  { %s5888_s0 = inlined_call_operand.vmem [shape: f32[2,64,128], index: 0, kind: input, shape index: {}]   ;;  %s5889_s1 = inlined_call_operand.vmem [shape: f32[1,128], index: 1, kind: input, shape index: {}]   ;;  %s5890_s2 = inlined_call_operand.vmem [shape: f32[1,128], index: 2, kind: input, shape index: {}]   ;;  %s5891_s3 = inlined_call_operand.hbm [shape: bf16[128,128], index: 3, kind: input, shape index: {}]   ;;  %s5892_s4 = inlined_call_operand.vmem [shape: bf16[2,64,256], index: 4, kind: input, shape index: {}]   ;;  %s5893_s5 = inlined_call_operand.hbm [shape: bf16[128,128], index: 5, kind: input, shape index: {}]   ;;  %s5894_s6 = inlined_call_operand.vmem [shape: f32[1,128], index: 6, kind: input, shape index: {}]   ;;  %s5895_s7 = inlined_call_operand.vmem [shape: f32[1,128], index: 7, kind: input, shape index: {}]   ;;  %s5896_s8 = inlined_call_operand.vmem [shape: f32[1,128], index: 8, kind: input, shape index: {}]   ;;  %s5897_s9 = inlined_call_operand.vmem [shape: bf16[128,512], index: 9, kind: input, shape index: {}]   ;;  %s5898_s10 = inlined_call_operand.vmem [shape: f32[1,512], index: 10, kind: input, shape index: {}]   ;;  %s5899_s11 = inlined_call_operand.hbm [shape: bf16[512,128], index: 11, kind: input, shape index: {}]   ;;  %s5900_s12 = inlined_call_operand.vmem [shape: f32[1,128], index: 12, kind: input, shape index: {}]   ;;  %s5901_s13 = inlined_call_operand.hbm [shape: f32[2,64,128], index: 13, kind: output, shape index: {}]  }
   0x1   :  { %5930 = sst [smem:[#allocation29_spill]] %s5891_s3 }
   0x2   :  { %5931 = sst [smem:[#allocation30_spill]] %s5895_s7 }
   0x3   :  { %5932 = sst [smem:[#allocation31_spill]] %s5896_s8 }
   0x4   :  { %5933 = sst [smem:[#allocation32_spill]] %s5898_s10 }
   0x5   :  { %5934 = sst [smem:[#allocation33_spill]] %s5900_s12 }
   0x6   :  { %5935 = sst [smem:[#allocation34_spill]] %s5901_s13 }
   0x7   :  { %18 = vsyncpa [#allocation7], 0 }
   0x8   :  { %19 = vsyncpa [#allocation10], 0 }
   0x9   :  { %20 = vsyncpa [#allocation8], 0 }
   0xa   :  { %22 = vsyncpa [#allocation8 + $0x1], 0  ;;  %s4683_s25 = smov 0   ;;  %s4685_s26 = smov 0  }
   0xb   :  { %s4687_s27 = smov 0   ;;  %s4689_s28 = smov 0  }
   0xc   :  { %s4691_s29 = smov 0   ;;  %s4693_s30 = smov 0  }
   0xd   :  { %s4695_s14 = smov 0   ;;  %s4697_s15 = smov 0  }
   0xe   :  { %s4699_s16 = smov 0   ;;  %s4701_s17 = smov 0  }
   0xf LB: > { %5936 = sst [smem:[#allocation16_spill]] %s4535_s25  ;;  %s3546_s18 = sadd.s32 4294967295, %s4571_s17   ;;  %s4571_s17 = sphi %s4701_s17, %s28_s17   ;;  %s4567_s16 = sphi %s4699_s16, %s6004_s16   ;;  %s4563_s15 = sphi %s4697_s15, %s6003_s15   ;;  %s4559_s14 = sphi %s4695_s14, %s6007_s14   ;;  %s4555_s30 = sphi %s4693_s30, %s6001_s30   ;;  %s4551_s29 = sphi %s4691_s29, %s6000_s29   ;;  %s4547_s28 = sphi %s4689_s28, %s5999_s28   ;;  %s4543_s27 = sphi %s4687_s27, %s5998_s27   ;;  %s4539_s26 = sphi %s4685_s26, %s6006_s26   ;;  %s4535_s25 = sphi %s4683_s25, %s6005_s25  }
  0x10   : > { %5937 = sst [smem:[#allocation17_spill]] %s4543_s27  ;;  %s3547_s19 = sadd.s32 4294967294, %s4571_s17  }
  0x11   : > { %5938 = sst [smem:[#allocation18_spill]] %s4559_s14  ;;  %s40_s20 = sadd.s32 1, %s4559_s14 }
  0x12   : > { %5939 = sst [smem:[#allocation19_spill]] %s4563_s15  ;;  %s43_s21 = sadd.s32 1, %s4563_s15 }
  0x13   : > { %5940 = sst [smem:[#allocation20_spill]] %s4567_s16  ;;  %p41_p0 = scmp.ge.s32.totalorder %s40_s20, 2 }
  0x14   : > { %5941 = sst [smem:[#allocation21_spill]] %s4571_s17  ;;  %s47_s22 = sadd.s32 1, %s4567_s16 }
  0x15   : > { %s343_s23 = sadd.s32 1, %s4543_s27  ;;  %p353_p1 = scmp.ne.s32.totalorder %s4543_s27, %s4539_s26 }
  0x16   : > { %s6009_s20 = smov (%p41_p0, %s40_s20), 0  ;;  %s6011_s21 = smov (!%p41_p0, %s43_s21), %s4563_s15 }
  0x17   : > { %5942 = sst [smem:[#allocation22_spill]] %s6009_s20  ;;  %p354_p2 = scmp.eq.s32.totalorder %s3546_s18, 15 }
  0x18   : > { %p359_p3 = scmp.ne.s32.totalorder %s4539_s26, %s4535_s25  ;;  %p45_p4 = scmp.ge.s32.totalorder %s6011_s21, 4 }
  0x19   : > { %p360_p5 = scmp.eq.s32.totalorder %s3547_s19, 15  ;;  %p4746_p6 = por %p354_p2, %p353_p1 }
  0x1a   : > { %p3548_p7 = scmp.ge.s32.totalorder %s4571_s17, 1  ;;  %s6013_s21 = smov (%p45_p4, %s6011_s21), 0 }
  0x1b   : > { %s5943_s24 = scalar_select %p4746_p6, 1, 0 }
  0x1c   : > { %5945 = sst [smem:[#allocation24_spill]] %s6013_s21  ;;  %s6015_s22 = smov (!%p45_p4, %s47_s22), %s4567_s16 }
  0x1d   : > { %5944 = sst [smem:[#allocation23_spill]] %s5943_s24  ;;  %s339_s14 = ssub.s32 %s4563_s15, %s6013_s21 }
  0x1e   : > { %p4756_p8 = por %p360_p5, %p359_p3  ;;  %p49_p9 = scmp.ge.s32.totalorder %s6015_s22, 2 }
  0x1f   : > { %p367_p10 = scmp.lt.s32.totalorder %s4571_s17, 17  ;;  %p4761_p11 = scmp.eq.s32.totalorder %s3546_s18, 0 }
  0x20   : > { %s5946_s13 = scalar_select %p4756_p8, 1, 0 }
  0x21   : > { %s5948_s20 = scalar_select %p4761_p11, 1, 0 }
  0x22   : > { %5947 = sst [smem:[#allocation25_spill]] %s5946_s13  ;;  %s6017_s22 = smov (%p49_p9, %s6015_s22), 0 }
  0x23   : > { %5949 = sst [smem:[#allocation26_spill]] %s6017_s22  ;;  %p4767_p12 = pnand %p3548_p7, %p367_p10 }
  0x24   : > { %s338_s21 = ssub.s32 %s4567_s16, %s6017_s22  ;;  %s4573_s13 = smov [#allocation9]  }
  0x25   : > { %s5950_s19 = scalar_select %p4767_p12, 1, 0 }
  0x26   : > { %s340_s15 = sor.u32 %s339_s14, %s338_s21  ;;  %p3974_p13 = pneg %p4767_p12 }
  0x27   : > { %p341_p0 = scmp.eq.s32.totalorder %s340_s15, 0  ;;  %s398_s25 = sshll.u32 %s4573_s13, 4  ;;  %s399_s25 = int_to_ptr.vmem [resolvable:$true] %s398_s25 }
  0x28   : > { %p4777_p1 = pnand %p4761_p11, %p3974_p13  ;;  %s4369_s10 = scalar_lea.hbm %s5893_s5, 1024 }
  0x29   : > { %s4782_s17 = scalar_select %p341_p0, %s4543_s27, %s343_s23  }
  0x2a   : > { %p4370_p2 = scmp.ne.s32.totalorder %s5893_s5, %s4369_s10  ;;  %p4792_p3 = pneg %p4777_p1 }
  0x2b   : > { %5952 = sst [smem:[#allocation27_spill]] %s4782_s17  ;;  %p4376_p7 = scmp.lt.u32.totalorder %s4369_s10, %s5893_s5 }
  0x2c   : > { %p4372_p4 = pnand %p4792_p3, %p4370_p2 }
  0x2e   : > { %p4373_p5 = pneg %p4372_p4 }
  0x30   : > { %p4378_p9 = pnand %p4376_p7, %p4373_p5 }
  0x32   : > { %4381 = shalt.err (!%p4378_p9)
}
  0x33   : > { %s4382_s12 = scalar_lea.vmem %s399_s25, 1024  ;;  %p4390_p8 = scmp.lt.s32.totalorder %s399_s25, %s399_s25 }
  0x34   : > { %p4383_p10 = scmp.ne.s32.totalorder %s399_s25, %s4382_s12  ;;  %p4391_p6 = scmp.lt.s32.totalorder %s4382_s12, %s4382_s12 }
  0x36   : > { %p4385_p13 = pnand %p4383_p10, %p4792_p3  ;;  %p4392_p11 = por %p4391_p6, %p4390_p8 }
  0x38   : > { %p4386_p0 = pneg %p4385_p13 }
  0x3a   : > { %p4393_p12 = pnand %p4392_p11, %p4386_p0 }
  0x3c   : > { %4396 = shalt.err (!%p4393_p12)
}
  0x3d   : > { %s4574_s22 = smov 64   ;;  %s4575_s23 = smov 4  }
  0x3e   : > { %3980 = dma.hbm_to_vmem [thread:$0]  (!%p4777_p1), %s5893_s5, 1024, %s399_s25, [#allocation10], %s4574_s22, %s4574_s22, %s4575_s23  }
  0x3f   : > { %s4576_s14 = smov [#allocation6]   ;;  %s4577_s21 = smov [#allocation11]  }
  0x40   : > { %s385_s13 = sshll.u32 %s4576_s14, 4  ;;  %s426_s16 = sshll.u32 %s4577_s21, 4  ;;  %s386_s13 = int_to_ptr.vmem [resolvable:$true] %s385_s13  ;;  %s4811_s16 = int_to_ptr.vmem [resolvable:$true] %s426_s16 }
  0x41   : > { %s5954_s3 = sld [smem:[#allocation29_spill]] }
  0x47   : > { %s4397_s27 = scalar_lea.hbm %s5954_s3, 1024 }
  0x48   : > { %p4398_p6 = scmp.ne.s32.totalorder %s5954_s3, %s4397_s27  ;;  %p4404_p12 = scmp.lt.u32.totalorder %s4397_s27, %s5954_s3 }
  0x4a   : > { %p4400_p8 = pnand %p4398_p6, %p4792_p3 }
  0x4c   : > { %p4401_p11 = pneg %p4400_p8 }
  0x4e   : > { %p4406_p2 = pnand %p4404_p12, %p4401_p11 }
  0x50   : > { %4409 = shalt.err (!%p4406_p2)
}
  0x51   : > { %s4410_s24 = scalar_lea.vmem %s386_s13, 1024  ;;  %p4418_p9 = scmp.lt.s32.totalorder %s386_s13, %s386_s13 }
  0x52   : > { %p4411_p4 = scmp.ne.s32.totalorder %s386_s13, %s4410_s24  ;;  %p4419_p10 = scmp.lt.s32.totalorder %s4410_s24, %s4410_s24 }
  0x54   : > { %p4413_p5 = pnand %p4411_p4, %p4792_p3  ;;  %p4420_p13 = por %p4419_p10, %p4418_p9 }
  0x56   : > { %p4414_p7 = pneg %p4413_p5 }
  0x58   : > { %p4421_p0 = pnand %p4420_p13, %p4414_p7 }
  0x5a   : > { %4424 = shalt.err (!%p4421_p0)
}
  0x5b   : > { %3977 = dma.hbm_to_vmem [thread:$0]  (!%p4777_p1), %s5954_s3, 1024, %s386_s13, [#allocation7], %s4574_s22, %s4574_s22, %s4575_s23  }
  0x5c   : > { %s4425_s14 = scalar_lea.hbm %s5899_s11, 4096 }
  0x5d   : > { %p4426_p6 = scmp.ne.s32.totalorder %s5899_s11, %s4425_s14  ;;  %p4432_p12 = scmp.lt.u32.totalorder %s4425_s14, %s5899_s11 }
  0x5f   : > { %p4428_p8 = pnand %p4426_p6, %p4792_p3 }
  0x61   : > { %p4429_p11 = pneg %p4428_p8 }
  0x63   : > { %p4434_p2 = pnand %p4432_p12, %p4429_p11 }
  0x65   : > { %4437 = shalt.err (!%p4434_p2)
}
  0x66   : > { %s4438_s13 = scalar_lea.vmem %s4811_s16, 4096  ;;  %p4446_p9 = scmp.lt.s32.totalorder %s4811_s16, %s4811_s16 }
  0x67   : > { %p4439_p4 = scmp.ne.s32.totalorder %s4811_s16, %s4438_s13  ;;  %p4447_p10 = scmp.lt.s32.totalorder %s4438_s13, %s4438_s13 }
  0x69   : > { %p4441_p5 = pnand %p4439_p4, %p4792_p3  ;;  %p4448_p13 = por %p4447_p10, %p4446_p9 }
  0x6b   : > { %p4442_p7 = pneg %p4441_p5 }
  0x6d   : > { %p4449_p0 = pnand %p4448_p13, %p4442_p7 }
  0x6f   : > { %4452 = shalt.err (!%p4449_p0)
}
  0x70   : > { %3983 = dma.hbm_to_vmem [thread:$0]  (!%p4777_p1), %s5899_s11, 4096, %s4811_s16, [#allocation10], %s4574_s22, %s4574_s22, %s4575_s23  }
  0x71   : > { %p5955_p6 = scmp.ne.s32.totalorder %s5950_s19, 0 }
  0x72   : > { %p5956_p3 = scmp.ne.s32.totalorder (!%p5955_p6), %s5948_s20, 0 }
  0x73   : > { %472 = sbr.rel (%p5955_p6) target bundleno = 6903 (0x1af7), region = 72 }
  0x7a   : > { %4522 = dma.done.wait (%p5956_p3), [#allocation7], 1024  }
  0x7b   : > { %4524 = vsyncadd (%p5956_p3), [#allocation7], 4294966272 }
  0x7c   : > { %4526 = dma.done.wait (%p5956_p3), [#allocation10], 5120  }
  0x7d   : > { %4528 = vsyncadd (%p5956_p3), [#allocation10], 4294962176  ;;  %s5919_s16 = sand.u32 1, %s4539_s26   ;;  %s4872_s19 = sshll.u32 %s4551_s29, 1 }
  0x7e   : > { %s3557_s18 = sshll.u32 %s5919_s16, 4  ;;  %p539_p1 = scmp.lt.s32.totalorder %s4555_s30, 1 }
  0x7f   : > { %p541_p8 = scmp.lt.s32.totalorder %s4872_s19, 7  ;;  %s3561_s20 = sshll.u32 %s4547_s28, 2 }
  0x80   : > { %s540_s15 = scalar_select %p539_p1, %s4555_s30, 1 }
  0x81   : > { %s542_s22 = scalar_select %p541_p8, %s4872_s19, 7 }
  0x82   : > { %s3559_s23 = sshll.u32 %s540_s15, 3  ;;  %p551_p11 = scmp.lt.s32.totalorder %s3561_s20, 7 }
  0x83   : > { %s544_s8 = sadd.s32 %s3559_s23, %s542_s22  ;;  %s3563_s12 = sshll.u32 %s540_s15, 4 }
  0x84   : > { %s3560_s27 = sshll.u32 %s544_s8, 3  ;;  %s6019_s20 = smov (!%p551_p11, %s3561_s20), 7 }
  0x85   : > { %s4884_s21 = scalar_lea.vmem %s5888_s0, %s3560_s27  ;;  %s3562_s10 = sshll.u32 %s6019_s20, 1 }
  0x86   : > { %s555_s25 = sadd.s32 %s3563_s12, %s3562_s10  ;;  %s4891_s3 = scalar_lea.vmem [#allocation12], %s3557_s18 }
  0x87   : > { %s3564_s13 = sshll.u32 %s555_s25, 2  ;;  %p3565_p12 = scmp.ne.s32.totalorder %s4547_s28, 0 }
  0x88   : > { %s4889_s16 = scalar_lea.vmem %s5892_s4, %s3564_s13  ;;  %v565_v0 = vld [vmem:[%s4884_s21] sm:$0xff] (!%p3565_p12)  ;;  %s4578_s22 = smov (!%p3565_p12), 64   ;;  %v566_v1 = vld [vmem:[%s4884_s21 + $0x8] sm:$0xff] (!%p3565_p12)  ;;  %vm569_vm0 = vcmask (!%p3565_p12), 523264   ;;  %v4114_v30 = vld [vmem:[#allocation6] sm:$0xff] (!%p3565_p12)   ;;  %v4579_v31 = vmov (!%p3565_p12), 0.0  }
  0x89   : > { %564 = sbr.rel (%p3565_p12) target bundleno = 919 (0x397), region = 88  ;;  %613 = vrot.lane.b32.xlu0 (!%p3565_p12), %v565_v0, %s4578_s22  ;;  %v570_v2 = vsel (!%p3565_p12), %vm569_vm0, %v565_v0, 0.0  ;;  %v573_v7 = vsel (!%p3565_p12), %vm569_vm0, %v566_v1, 0.0  ;;  %3792 = vmatprep.subr.bf16.mxu0 (!%p3565_p12), %v4579_v31  ;;  %798 = vst [vmem:[#allocation5] sm:$0xff] (!%p3565_p12), %v4579_v31  ;;  %799 = vst [vmem:[#allocation5 + $0x8] sm:$0xff] (!%p3565_p12), %v4579_v31  ;;  %v4115_v32 = vld [vmem:[#allocation6 + $0x8] sm:$0xff] (!%p3565_p12)  }
  0x8a   : > { %3793 = vmatpush3.bf16.msra.mxu0 (!%p3565_p12), %v4114_v30  ;;  %v4116_v33 = vld [vmem:[#allocation6 + $0x10] sm:$0xff] (!%p3565_p12)   ;;  %v4117_v34 = vld [vmem:[#allocation6 + $0x18] sm:$0xff] (!%p3565_p12)   ;;  %vm793_vm1 = vcmask (!%p3565_p12), 64512   ;;  %v4118_v35 = vld [vmem:[#allocation6 + $0x20] sm:$0xff] (!%p3565_p12)   ;;  %v4580_v36 = vmov (!%p3565_p12), -1e+30  }
  0x8b   : > { %3794 = vmatprep.subr.bf16.mxu0 (!%p3565_p12), %v4579_v31  ;;  %794 = vst.msk [vmem:[#allocation3] sm:$0xff] (!%p3565_p12), %vm793_vm1, %v4580_v36  ;;  %795 = vst.msk [vmem:[#allocation3 + $0x8] sm:$0xff] (!%p3565_p12), %vm793_vm1, %v4580_v36  ;;  %vm4581_vm2 = vmmov (!%p3565_p12), 0   ;;  %v4119_v37 = vld [vmem:[#allocation6 + $0x28] sm:$0xff] (!%p3565_p12)   ;;  %v4120_v38 = vld [vmem:[#allocation6 + $0x30] sm:$0xff] (!%p3565_p12)  }
  0x8c   : > { %796 = vst.msk [vmem:[#allocation4] sm:$0xff] (!%p3565_p12), %vm793_vm1, %v4579_v31  ;;  %797 = vst.msk [vmem:[#allocation4 + $0x8] sm:$0xff] (!%p3565_p12), %vm793_vm1, %v4579_v31  ;;  %3808 = vmatprep.mubr.msk.bf16.mxu0 (!%p3565_p12), %vm4581_vm2, %v4579_v31  ;;  %v4121_v39 = vld [vmem:[#allocation6 + $0x38] sm:$0xff] (!%p3565_p12)  }
  0x8d   : > { %615 = vrot.lane.b32.xlu0 (!%p3565_p12), %v566_v1, %s4578_s22 }
  0x8e   : > { %3795 = vmatpush3.bf16.msra.mxu0 (!%p3565_p12), %v4115_v32 }
  0x8f   : > { %3796 = vmatprep.subr.bf16.mxu0 (!%p3565_p12), %v4579_v31 }
  0x92   : > { %3797 = vmatpush3.bf16.msra.mxu0 %v4116_v33 }
  0x93   : > { %3798 = vmatprep.subr.bf16.mxu0 %v4579_v31 }
  0x96   : > { %3799 = vmatpush3.bf16.msra.mxu0 %v4117_v34 }
  0x97   : > { %3800 = vmatprep.subr.bf16.mxu0 %v4579_v31 }
  0x9a   : > { %3801 = vmatpush3.bf16.msra.mxu0 %v4118_v35 }
  0x9b   : > { %3802 = vmatprep.subr.bf16.mxu0 %v4579_v31 }
  0x9e   : > { %3803 = vmatpush3.bf16.msra.mxu0 %v4119_v37 }
  0x9f   : > { %3804 = vmatprep.subr.bf16.mxu0 %v4579_v31 }
  0xa2   : > { %3805 = vmatpush3.bf16.msra.mxu0 %v4120_v38 }
  0xa3   : > { %3806 = vmatprep.subr.bf16.mxu0 %v4579_v31 }
  0xa6   : > { %3807 = vmatpush3.bf16.msra.mxu0 %v4121_v39 }
  0xac   : > { %571 = vadd.xlane.f32.xlu0 %v570_v2 }
  0xfb   : > { %v614_v3 = vpop.permute.xlu0 %613 }
  0xfc   : > { %v619_v4 = vsel %vm569_vm0, %v614_v3, 0.0 }
  0xfd   : > { %620 = vadd.xlane.f32.xlu1 %v619_v4 }
  0xff   : > { %v616_v5 = vpop.permute.xlu0 %615 }
 0x100   : > { %v622_v6 = vsel %vm569_vm0, %v616_v5, 0.0 }
 0x101   : > { %623 = vadd.xlane.f32.xlu1 %v622_v6 }
 0x105   : > { %574 = vadd.xlane.f32.xlu1 %v573_v7 }
 0x139   : > { %v572_v21 = vpop.xlane.xlu0 %571 }
 0x13a   : > { %v577_v22 = vmul.f32 0.015625, %v572_v21 }
 0x13c   : > { %v4913_v23 = vsub.f32 %v565_v0, %v577_v22  ;;  %v3567_v22 = vld [vmem:[%s5890_s2] ss:$0 sm:$0xff] }
 0x13e   : > { %v581_v24 = vmul.f32 %v4913_v23, %v4913_v23 }
 0x140   : > { %v583_v25 = vsel %vm569_vm0, %v581_v24, 0.0 }
 0x18a   : > { %v621_v8 = vpop.xlane.xlu1 %620 }
 0x18b   : > { %v625_v9 = vmul.f32 0.015625, %v621_v8 }
 0x18d   : > { %v4900_v10 = vsub.f32 %v565_v0, %v625_v9 }
 0x18e   : > { %v624_v11 = vpop.xlane.xlu1 %623 }
 0x18f   : > { %v626_v12 = vmul.f32 0.015625, %v624_v11  ;;  %v629_v13 = vmul.f32 %v4900_v10, %v4900_v10 }
 0x191   : > { %v4904_v14 = vsub.f32 %v566_v1, %v626_v12  ;;  %633 = vrot.lane.b32.xlu1 %v629_v13, %s4578_s22 }
 0x192   : > { %v575_v15 = vpop.xlane.xlu1 %574 }
 0x193   : > { %v578_v16 = vmul.f32 0.015625, %v575_v15  ;;  %v630_v17 = vmul.f32 %v4904_v14, %v4904_v14  ;;  %v3566_v15 = vld [vmem:[%s5889_s1] ss:$0 sm:$0xff] }
 0x195   : > { %v4908_v18 = vsub.f32 %v566_v1, %v578_v16  ;;  %635 = vrot.lane.b32.xlu1 %v630_v17, %s4578_s22 }
 0x197   : > { %v582_v19 = vmul.f32 %v4908_v18, %v4908_v18 }
 0x199   : > { %v586_v20 = vsel %vm569_vm0, %v582_v19, 0.0 }
 0x19a   : > { %587 = vadd.xlane.f32.xlu0 %v586_v20 }
 0x1b9   : > { %584 = vadd.xlane.f32.xlu1 %v583_v25 }
 0x203   : > { %v634_v26 = vpop.permute.xlu1 %633 }
 0x204   : > { %v639_v27 = vsel %vm569_vm0, %v634_v26, 0.0 }
 0x205   : > { %640 = vadd.xlane.f32.xlu0 %v639_v27 }
 0x207   : > { %v636_v28 = vpop.permute.xlu1 %635 }
 0x208   : > { %v642_v29 = vsel %vm569_vm0, %v636_v28, 0.0 }
 0x209   : > { %643 = vadd.xlane.f32.xlu0 %v642_v29 }
 0x227   : > { %v588_v42 = vpop.xlane.xlu0 %587 }
 0x228   : > { %v590_v43 = vmul.f32 0.015625, %v588_v42 }
 0x22a   : > { %vm600_vm5 = vcmp.eq.f32.partialorder %v590_v43, inf  ;;  %v603_v54 = vand.u32 2147483648, %v590_v43  ;;  %vm602_vm6 = vcmp.eq.f32.partialorder %v590_v43, 0.0 }
 0x246   : > { %v585_v40 = vpop.xlane.xlu1 %584 }
 0x247   : > { %v589_v41 = vmul.f32 0.015625, %v585_v40 }
 0x249   : > { %4122 = vrsqrt.f32 %v589_v41  ;;  %vm593_vm3 = vcmp.eq.f32.partialorder %v589_v41, inf  ;;  %v596_v51 = vand.u32 2147483648, %v589_v41  ;;  %vm595_vm4 = vcmp.eq.f32.partialorder %v589_v41, 0.0 }
 0x24a   : > { %4124 = vrsqrt.f32 %v590_v43 }
 0x253   : > { %v4123_v45 = vpop.eup %4122 }
 0x254   : > { %v592_v47 = vmul.f32 %v4123_v45, %v589_v41  ;;  %v4125_v49 = vpop.eup %4124 }
 0x255   : > { %v599_v52 = vmul.f32 %v4125_v49, %v590_v43 }
 0x256   : > { %v594_v53 = vsel %vm593_vm3, %v589_v41, %v592_v47 }
 0x257   : > { %v597_v55 = vsel %vm595_vm4, %v596_v51, %v594_v53  ;;  %v601_v56 = vsel %vm600_vm5, %v590_v43, %v599_v52 }
 0x258   : > { %v605_v58 = vadd.f32 1e-05, %v597_v55  ;;  %v604_v60 = vsel %vm602_vm6, %v603_v54, %v601_v56 }
 0x259   : > { %v606_v1 = vadd.f32 1e-05, %v604_v60 }
 0x292   : > { %v641_v44 = vpop.xlane.xlu0 %640 }
 0x293   : > { %v645_v46 = vmul.f32 0.015625, %v641_v44 }
 0x295   : > { %4126 = vrsqrt.f32 %v645_v46  ;;  %vm649_vm7 = vcmp.eq.f32.partialorder %v645_v46, inf  ;;  %v652_v61 = vand.u32 2147483648, %v645_v46  ;;  %vm651_vm8 = vcmp.eq.f32.partialorder %v645_v46, 0.0 }
 0x296   : > { %v644_v48 = vpop.xlane.xlu0 %643 }
 0x297   : > { %v646_v50 = vmul.f32 0.015625, %v644_v48 }
 0x299   : > { %4128 = vrsqrt.f32 %v646_v50  ;;  %vm656_vm9 = vcmp.eq.f32.partialorder %v646_v50, inf  ;;  %v659_v4 = vand.u32 2147483648, %v646_v50  ;;  %vm658_vm10 = vcmp.eq.f32.partialorder %v646_v50, 0.0 }
 0x29a   : > { %4130 = vrcp.f32 %v605_v58 }
 0x29f   : > { %v4127_v57 = vpop.eup %4126 }
 0x2a0   : > { %v648_v59 = vmul.f32 %v4127_v57, %v645_v46 }
 0x2a2   : > { %v650_v62 = vsel %vm649_vm7, %v645_v46, %v648_v59 }
 0x2a3   : > { %v4129_v63 = vpop.eup %4128  ;;  %v653_v0 = vsel %vm651_vm8, %v652_v61, %v650_v62 }
 0x2a4   : > { %v661_v2 = vadd.f32 1e-05, %v653_v0  ;;  %v655_v3 = vmul.f32 %v4129_v63, %v646_v50  ;;  %v4131_v8 = vpop.eup %4130 }
 0x2a5   : > { %v608_v11 = vmul.f32 %v4131_v8, %v4913_v23 }
 0x2a6   : > { %4132 = vrcp.f32 %v661_v2  ;;  %v657_v5 = vsel %vm656_vm9, %v646_v50, %v655_v3 }
 0x2a7   : > { %v660_v6 = vsel %vm658_vm10, %v659_v4, %v657_v5  ;;  %4134 = vrcp.f32 %v606_v1 }
 0x2a8   : > { %v662_v7 = vadd.f32 1e-05, %v660_v6 }
 0x2aa   : > { %4136 = vrcp.f32 %v662_v7 }
 0x2b0   : > { %v4133_v9 = vpop.eup %4132 }
 0x2b1   : > { %v664_v12 = vmul.f32 %v4133_v9, %v4900_v10  ;;  %v4135_v13 = vpop.eup %4134 }
 0x2b2   : > { %v610_v19 = vmul.f32 %v4135_v13, %v4908_v18 }
 0x2b3   : > { %v667_v16 = vsel %vm569_vm0, %v608_v11, %v664_v12 }
 0x2b4   : > { %v4137_v17 = vpop.eup %4136  ;;  %v675_v21 = vmul.f32 %v3566_v15, %v667_v16 }
 0x2b5   : > { %v666_v20 = vmul.f32 %v4137_v17, %v4904_v14 }
 0x2b6   : > { %v683_v24 = vadd.f32 %v3567_v22, %v675_v21 }
 0x2b7   : > { %v668_v23 = vsel %vm569_vm0, %v610_v19, %v666_v20 }
 0x2b8   : > { %v676_v10 = vmul.f32 %v3566_v15, %v668_v23 }
 0x2ba   : > { %v684_v25 = vadd.f32 %v3567_v22, %v676_v10 }
 0x2bc   : > { %v685_v26 = vpack.c.bf16 %v684_v25, %v683_v24 }
 0x2be   : > { %3809 = vmatmul.mubr.bf16.vlgmr.msra.gmra.mrb[0].mxu0 %v685_v26 }
 0x391   : > { %v784_v27 = vpop.f32.mrb[0].mxu0 }
 0x392   : > { %v3810_v28 = vpop.f32.mrb[1].mxu0 }
 0x393   : > { %v787_v29 = vpop.f32.mrb[2].mxu0 }
 0x394   : > { %v791_v30 = vpack.c.bf16 %v787_v29, %v784_v27  ;;  %v3811_v31 = vpop.f32.mrb[3].mxu0 }
 0x396   : > { %792 = vst [vmem:[#allocation2] sm:$0xff] %v791_v30 }
 0x397 PF: > { %s3576_s8 = sshll.u32 %s4551_s29, 4  ;;  %s3577_s27 = sshll.u32 %s4547_s28, 5 }
 0x398   : > { %s802_s17 = sadd.s32 15, %s3576_s8 }
 0x399   : > { %p3578_p2 = scmp.gt.s32.totalorder %s3577_s27, %s802_s17 }
 0x39b   : > { %806 = sbr.rel (%p3578_p2) target bundleno = 5436 (0x153c), region = 92 }
 0x3a2   : > { %v4935_v14 = vld [vmem:[%s4889_s16] ss:$8 sps:$4 sm:$0xff]   ;;  %vm834_vm11 = vcmask 130048   ;;  %v4582_v18 = vmov 0.0   ;;  %vm4583_vm12 = vmmov 0   ;;  %v811_v36 = vlaneseq  ;;  %s4585_s29 = smov 112  }
 0x3a3   : > { %3812 = vmatprep.subr.bf16.mxu0 %v4582_v18  ;;  %3820 = vmatprep.subr.bf16.mxu1 %v4582_v18  ;;  %v839_v32 = vsel %vm834_vm11, %v4935_v14, 0  ;;  %v4947_v33 = vld [vmem:[%s4889_s16 + $0x10] ss:$8 sps:$4 sm:$0xff]   ;;  %v4952_v35 = vld [vmem:[#allocation2] sm:$0xff]  ;;  %v814_v39 = vstv %s3576_s8  ;;  %v819_v40 = vstv %s3577_s27  ;;  %vm889_vm14 = vcmask 261120   ;;  %v4975_v56 = vld [vmem:[#allocation3] sm:$0xff] }
 0x3a4   : > { %3816 = vmatprep.mubr.msk.bf16.mxu0 %vm4583_vm12, %v4582_v18  ;;  %3824 = vmatprep.mubr.msk.bf16.mxu1 %vm4583_vm12, %v4582_v18  ;;  %v842_v34 = vsel %vm834_vm11, %v4947_v33, 0  ;;  %v812_v37 = vshrl.u32 %v811_v36, 7  ;;  %v818_v38 = vand.u32 127, %v811_v36  ;;  %v5927_v55 = vmov 0   ;;  %v4980_v59 = vld [vmem:[#allocation3 + $0x8] sm:$0xff]  ;;  %v807_v63 = vld [vmem:[%s4889_s16] sm:$0xff] }
 0x3a5   : > { %3813 = vmatpush3.bf16.xpose.msra.mxu0 %v839_v32  ;;  %4138 = vset.pattern.permute.xlu1 %v5927_v55  ;;  %vm932_vm0 = vcmask 7168   ;;  %v808_v0 = vld [vmem:[%s4889_s16 + $0x8] sm:$0xff]  ;;  %v809_v2 = vld [vmem:[%s4889_s16 + $0x10] sm:$0xff]  ;;  %v810_v3 = vld [vmem:[%s4889_s16 + $0x18] sm:$0xff]  ;;  %v5926_v36 = vmov 1   ;;  %vm1112_vm1 = vcmask 15368  }
 0x3a6   : > { %3814 = vmatprep.subr.bf16.mxu0 %v4582_v18  ;;  %v813_v41 = vadd.s32 8, %v812_v37  ;;  %v815_v42 = vadd.s32 %v814_v39, %v812_v37  ;;  %v820_v43 = vadd.s32 %v819_v40, %v818_v38  ;;  %v4999_v4 = vcombine.high %v807_v63, %v808_v0  ;;  %4140 = vset.pattern.permute.xlu0 %v5926_v36  ;;  %s4587_s16 = smov 96   ;;  %s4589_s14 = smov 80  }
 0x3a7   : > { %v5004_v5 = vcombine.high %v809_v2, %v810_v3  ;;  %vm1299_vm2 = vcmask 23568   ;;  %vm1486_vm3 = vcmask 31768   ;;  %s4591_s12 = smov 64   ;;  %vm1673_vm4 = vcmask 39968   ;;  %s4593_s10 = smov 48  }
 0x3a8   : > { %v816_v44 = vadd.s32 %v814_v39, %v813_v41  ;;  %vm4958_vm13 = vcmp.gt.s32.totalorder %v820_v43, %v815_v42  ;;  %3821 = vmatpush3.bf16.msra.mxu1 %v4999_v4  ;;  %vm1860_vm5 = vcmask 48168   ;;  %s4595_s25 = smov 32   ;;  %vm2047_vm6 = vcmask 56368   ;;  %s4597_s13 = smov 16  }
 0x3a9   : > { %3822 = vmatprep.subr.bf16.mxu1 %v4582_v18  ;;  %vm1190_vm7 = vcmask 261248   ;;  %vm2234_vm8 = vcmask 64568   ;;  %vm1377_vm9 = vcmask 392448   ;;  %vm1564_vm10 = vcmask 523648  }
 0x3aa   : > { %vm4962_vm15 = vcmp.gt.s32.totalorder %v820_v43, %v816_v44 }
 0x3ac   : > { %3823 = vmatpush3.bf16.msra.mxu1 %v5004_v5 }
 0x3ad   : > { %3815 = vmatpush3.bf16.xpose.msra.mxu0 %v842_v34  ;;  %3828 = vmatprep.subr.bf16.mxu1 %v4582_v18 }
 0x3ae   : > { %3836 = vmatprep.subr.bf16.mxu0 %v4582_v18 }
 0x3b4   : > { %3817 = vmatmul.mubr.msk.bf16.vlgmr.msra.gmra.mrb[0].mxu0 %vm834_vm11, %v4952_v35 }
 0x3b5   : > { %3840 = vmatprep.mubr.msk.bf16.mxu0 %vm4583_vm12, %v4582_v18 }
 0x487   : > { %v878_v46 = vpop.f32.mrb[0].mxu0 }
 0x488   : > { %v885_v48 = vsel %vm4958_vm13, -1e+30, %v878_v46  ;;  %v3818_v49 = vpop.f32.mrb[1].mxu0 }
 0x489   : > { %v881_v50 = vpop.f32.mrb[2].mxu0  ;;  %v890_v51 = vsel %vm889_vm14, %v885_v48, -inf }
 0x48a   : > { %v886_v52 = vsel %vm4962_vm15, -1e+30, %v881_v50  ;;  %891 = vmax.xlane.f32.xlu0 %v890_v51  ;;  %v3819_v53 = vpop.f32.mrb[3].mxu0 }
 0x48b   : > { %v893_v54 = vsel %vm889_vm14, %v886_v52, -inf }
 0x48e   : > { %894 = vmax.xlane.f32.xlu0 %v893_v54 }
 0x4a4   : > { %1012 = vrot.lane.b32.xlu0 %v4935_v14, %s4585_s29 }
 0x517   : > { %v892_v57 = vpop.xlane.xlu0 %891 }
 0x518   : > { %v4978_v58 = vmax.f32 %v4975_v56, %v892_v57 }
 0x51a   : > { %1006 = vst.msk [vmem:[#allocation3] sm:$0xff] %vm932_vm0, %v4978_v58  ;;  %906 = vperm.xlu1 %4138, %v4978_v58  }
 0x51b   : > { %v895_v61 = vpop.xlane.xlu0 %894 }
 0x51c   : > { %v4988_v62 = vmax.f32 %v4980_v59, %v895_v61 }
 0x51e   : > { %1007 = vst.msk [vmem:[#allocation3 + $0x8] sm:$0xff] %vm932_vm0, %v4988_v62  ;;  %911 = vperm.xlu1 %4138, %v4988_v62  }
 0x51f   : > { %v1013_v13 = vpop.permute.xlu0 %1012 }
 0x520   : > { %v1020_v17 = vsel %vm834_vm11, %v1013_v13, 0 }
 0x521   : > { %v5039_v37 = vld [vmem:[#allocation3] sm:$0xff] }
 0x522   : > { %1014 = vrot.lane.b32.xlu1 %v4947_v33, %s4585_s29 }
 0x523   : > { %4139 = vset.pattern.permute.xlu1 %v5926_v36 }
 0x525   : > { %v5044_v40 = vld [vmem:[#allocation3 + $0x8] sm:$0xff] }
 0x526   : > { %1010 = vrot.lane.b32.xlu1 %v4952_v35, %s4585_s29 }
 0x599   : > { %v907_v6 = vpop.permute.xlu1 %906 }
 0x59a   : > { %v914_v7 = vsub.f32 %v885_v48, %v907_v6 }
 0x59c   : > { %v916_v8 = vmul.f32 1.442695, %v914_v7 }
 0x59d   : > { %v912_v9 = vpop.permute.xlu1 %911 }
 0x59e   : > { %v915_v11 = vsub.f32 %v886_v52, %v912_v9  ;;  %4168 = vpow2.f32 %v916_v8 }
 0x5a0   : > { %v918_v12 = vmul.f32 1.442695, %v915_v11 }
 0x5a1   : > { %v1015_v20 = vpop.permute.xlu1 %1014 }
 0x5a2   : > { %4170 = vpow2.f32 %v918_v12  ;;  %v1023_v21 = vsel %vm834_vm11, %v1015_v20, 0 }
 0x5a5   : > { %v1011_v22 = vpop.permute.xlu1 %1010 }
 0x5a8   : > { %v5011_v15 = vpop.eup %4168 }
 0x5ac   : > { %v5013_v16 = vpop.eup %4170 }
 0x5ad   : > { %v949_v19 = vpack.c.bf16 %v5013_v16, %v5011_v15 }
 0x5af   : > { %3825 = vmatmul.mubr.msk.bf16.vlgmr.msra.gmra.mrb[0].mxu1 %vm889_vm14, %v949_v19 }
 0x5b0   : > { %3829 = vmatpush3.bf16.xpose.msra.mxu1 %v1020_v17  ;;  %3832 = vmatprep.mubr.msk.bf16.mxu1 %vm4583_vm12, %v4582_v18 }
 0x5b1   : > { %3830 = vmatprep.subr.bf16.mxu1 %v4582_v18 }
 0x5b8   : > { %3831 = vmatpush3.bf16.xpose.msra.mxu1 %v1023_v21 }
 0x5b9   : > { %3852 = vmatprep.subr.bf16.mxu1 %v4582_v18 }
 0x5bf   : > { %3833 = vmatmul.mubr.msk.bf16.vlgmr.msra.gmra.mrb[4].mxu1 %vm834_vm11, %v1011_v22 }
 0x5c0   : > { %3856 = vmatprep.mubr.msk.bf16.mxu1 %vm4583_vm12, %v4582_v18 }
 0x682   : > { %v5027_v23 = vpop.f32.mrb[0].mxu1 }
 0x683   : > { %v3826_v10 = vpop.f32.mrb[1].mxu1 }
 0x684   : > { %v5029_v24 = vpop.f32.mrb[2].mxu1 }
 0x685   : > { %v3827_v25 = vpop.f32.mrb[3].mxu1 }
 0x692   : > { %v1059_v26 = vpop.f32.mrb[4].mxu1 }
 0x693   : > { %v1066_v27 = vsel %vm4958_vm13, -1e+30, %v1059_v26  ;;  %v3834_v28 = vpop.f32.mrb[5].mxu1  ;;  %v5923_v26 = vmov 2  }
 0x694   : > { %v1062_v29 = vpop.f32.mrb[6].mxu1  ;;  %v1070_v30 = vsel %vm889_vm14, %v1066_v27, -inf }
 0x695   : > { %v1067_v31 = vsel %vm4962_vm15, -1e+30, %v1062_v29  ;;  %1071 = vmax.xlane.f32.xlu1 %v1070_v30  ;;  %v3835_v32 = vpop.f32.mrb[7].mxu1 }
 0x696   : > { %v1073_v34 = vsel %vm889_vm14, %v1067_v31, -inf }
 0x697   : > { %1074 = vmax.xlane.f32.xlu0 %v1073_v34 }
 0x722   : > { %v1072_v38 = vpop.xlane.xlu1 %1071 }
 0x723   : > { %v5042_v39 = vmax.f32 %v5039_v37, %v1072_v38 }
 0x724   : > { %v1075_v41 = vpop.xlane.xlu0 %1074 }
 0x725   : > { %1193 = vst.msk [vmem:[#allocation3] sm:$0xff] %vm1112_vm1, %v5042_v39  ;;  %v5051_v43 = vmax.f32 %v5044_v40, %v1075_v41  ;;  %1086 = vperm.xlu1 %4139, %v5042_v39  }
 0x727   : > { %1194 = vst.msk [vmem:[#allocation3 + $0x8] sm:$0xff] %vm1112_vm1, %v5051_v43  ;;  %1091 = vperm.xlu0 %4140, %v5051_v43  }
 0x729   : > { %1130 = vrot.lane.b32.xlu1 %v4999_v4, %s4585_s29 }
 0x72a   : > { %4141 = vset.pattern.permute.xlu1 %v5923_v26 }
 0x72b   : > { %4142 = vset.pattern.permute.xlu0 %v5923_v26 }
 0x72d   : > { %1132 = vrot.lane.b32.xlu1 %v5004_v5, %s4585_s29 }
 0x72e   : > { %v5104_v30 = vld [vmem:[#allocation3 + $0x8] sm:$0xff] }
 0x731   : > { %1199 = vrot.lane.b32.xlu1 %v4935_v14, %s4587_s16 }
 0x735   : > { %1201 = vrot.lane.b32.xlu1 %v4947_v33, %s4587_s16 }
 0x739   : > { %1197 = vrot.lane.b32.xlu1 %v4952_v35, %s4587_s16 }
 0x7a4   : > { %v1087_v46 = vpop.permute.xlu1 %1086 }
 0x7a5   : > { %v1094_v48 = vsub.f32 %v1066_v27, %v1087_v46  ;;  %v5099_v27 = vld [vmem:[#allocation3] sm:$0xff] }
 0x7a6   : > { %v1092_v49 = vpop.permute.xlu0 %1091 }
 0x7a7   : > { %v1096_v50 = vmul.f32 1.442695, %v1094_v48  ;;  %v1095_v51 = vsub.f32 %v1067_v31, %v1092_v49 }
 0x7a8   : > { %v1131_v52 = vpop.permute.xlu1 %1130 }
 0x7a9   : > { %v1098_v53 = vmul.f32 1.442695, %v1095_v51  ;;  %3837 = vmatpush3.bf16.msra.mxu0 %v1131_v52  ;;  %4172 = vpow2.f32 %v1096_v50 }
 0x7aa   : > { %3838 = vmatprep.subr.bf16.mxu0 %v4582_v18 }
 0x7ab   : > { %4174 = vpow2.f32 %v1098_v53 }
 0x7ac   : > { %v1133_v54 = vpop.permute.xlu1 %1132 }
 0x7ad   : > { %3839 = vmatpush3.bf16.msra.mxu0 %v1133_v54 }
 0x7ae   : > { %3844 = vmatprep.subr.bf16.mxu0 %v4582_v18 }
 0x7b0   : > { %v1200_v57 = vpop.permute.xlu1 %1199 }
 0x7b1   : > { %v1207_v0 = vsel %vm834_vm11, %v1200_v57, 0 }
 0x7b3   : > { %v5071_v61 = vpop.eup %4172 }
 0x7b4   : > { %v1202_v3 = vpop.permute.xlu1 %1201 }
 0x7b5   : > { %v5073_v63 = vpop.eup %4174  ;;  %v1210_v6 = vsel %vm834_vm11, %v1202_v3, 0 }
 0x7b6   : > { %v1129_v2 = vpack.c.bf16 %v5073_v63, %v5071_v61 }
 0x7b8   : > { %3841 = vmatmul.mubr.msk.bf16.vlgmr.msra.gmra.mrb[4].mxu0 %vm889_vm14, %v1129_v2  ;;  %v1198_v7 = vpop.permute.xlu1 %1197 }
 0x7b9   : > { %3845 = vmatpush3.bf16.xpose.msra.mxu0 %v1207_v0  ;;  %3848 = vmatprep.mubr.msk.bf16.mxu0 %vm4583_vm12, %v4582_v18 }
 0x7ba   : > { %3846 = vmatprep.subr.bf16.mxu0 %v4582_v18 }
 0x7c1   : > { %3847 = vmatpush3.bf16.xpose.msra.mxu0 %v1210_v6 }
 0x7c2   : > { %3868 = vmatprep.subr.bf16.mxu0 %v4582_v18 }
 0x7c8   : > { %3849 = vmatmul.mubr.msk.bf16.vlgmr.msra.gmra.mrb[8].mxu0 %vm834_vm11, %v1198_v7 }
 0x7c9   : > { %3872 = vmatprep.mubr.msk.bf16.mxu0 %vm4583_vm12, %v4582_v18 }
 0x88b   : > { %v5087_v8 = vpop.f32.mrb[4].mxu0 }
 0x88c   : > { %v3842_v9 = vpop.f32.mrb[5].mxu0 }
 0x88d   : > { %v5089_v11 = vpop.f32.mrb[6].mxu0 }
 0x88e   : > { %v3843_v12 = vpop.f32.mrb[7].mxu0 }
 0x89b   : > { %v1246_v13 = vpop.f32.mrb[8].mxu0 }
 0x89c   : > { %v1253_v17 = vsel %vm4958_vm13, -1e+30, %v1246_v13  ;;  %v3850_v19 = vpop.f32.mrb[9].mxu0 }
 0x89d   : > { %v1249_v20 = vpop.f32.mrb[10].mxu0  ;;  %v1257_v21 = vsel %vm889_vm14, %v1253_v17, -inf }
 0x89e   : > { %v1254_v22 = vsel %vm4962_vm15, -1e+30, %v1249_v20  ;;  %1258 = vmax.xlane.f32.xlu1 %v1257_v21  ;;  %v3851_v10 = vpop.f32.mrb[11].mxu0 }
 0x89f   : > { %v1260_v25 = vsel %vm889_vm14, %v1254_v22, -inf }
 0x8a0   : > { %1261 = vmax.xlane.f32.xlu0 %v1260_v25 }
 0x92b   : > { %v1259_v28 = vpop.xlane.xlu1 %1258 }
 0x92c   : > { %v5102_v29 = vmax.f32 %v5099_v27, %v1259_v28 }
 0x92d   : > { %v1262_v31 = vpop.xlane.xlu0 %1261 }
 0x92e   : > { %1380 = vst.msk [vmem:[#allocation3] sm:$0xff] %vm1299_vm2, %v5102_v29  ;;  %v5111_v34 = vmax.f32 %v5104_v30, %v1262_v31  ;;  %1273 = vperm.xlu1 %4141, %v5102_v29   ;;  %v5970_v47 = vsub.f32 %v5099_v27, %v5102_v29 }
 0x930   : > { %1381 = vst.msk [vmem:[#allocation3 + $0x8] sm:$0xff] %vm1299_vm2, %v5111_v34  ;;  %1278 = vperm.xlu0 %4142, %v5111_v34  }
 0x932   : > { %1317 = vrot.lane.b32.xlu1 %v4999_v4, %s4587_s16 }
 0x936   : > { %1319 = vrot.lane.b32.xlu1 %v5004_v5, %s4587_s16 }
 0x93a   : > { %1386 = vrot.lane.b32.xlu1 %v4935_v14, %s4589_s14 }
 0x93e   : > { %1388 = vrot.lane.b32.xlu1 %v4947_v33, %s4589_s14 }
 0x942   : > { %1384 = vrot.lane.b32.xlu1 %v4952_v35, %s4589_s14 }
 0x9ad   : > { %v1274_v41 = vpop.permute.xlu1 %1273 }
 0x9ae   : > { %v1281_v46 = vsub.f32 %v1253_v17, %v1274_v41 }
 0x9af   : > { %v1279_v48 = vpop.permute.xlu0 %1278 }
 0x9b0   : > { %v1283_v49 = vmul.f32 1.442695, %v1281_v46  ;;  %v1282_v50 = vsub.f32 %v1254_v22, %v1279_v48  ;;  %v5921_v46 = vmov 3   ;;  %v5159_v48 = vld [vmem:[#allocation3] sm:$0xff] }
 0x9b1   : > { %v1318_v51 = vpop.permute.xlu1 %1317  ;;  %4143 = vset.pattern.permute.xlu1 %v5921_v46  ;;  %4144 = vset.pattern.permute.xlu0 %v5921_v46 }
 0x9b2   : > { %v1285_v52 = vmul.f32 1.442695, %v1282_v50  ;;  %3853 = vmatpush3.bf16.msra.mxu1 %v1318_v51  ;;  %4176 = vpow2.f32 %v1283_v49 }
 0x9b3   : > { %3854 = vmatprep.subr.bf16.mxu1 %v4582_v18 }
 0x9b4   : > { %4178 = vpow2.f32 %v1285_v52  ;;  %v5164_v52 = vld [vmem:[#allocation3 + $0x8] sm:$0xff] }
 0x9b5   : > { %v1320_v53 = vpop.permute.xlu1 %1319 }
 0x9b6   : > { %3855 = vmatpush3.bf16.msra.mxu1 %v1320_v53 }
 0x9b7   : > { %3860 = vmatprep.subr.bf16.mxu1 %v4582_v18 }
 0x9b9   : > { %v1387_v54 = vpop.permute.xlu1 %1386 }
 0x9ba   : > { %v1394_v2 = vsel %vm834_vm11, %v1387_v54, 0 }
 0x9bc   : > { %v5131_v57 = vpop.eup %4176 }
 0x9bd   : > { %v1389_v6 = vpop.permute.xlu1 %1388  ;;  %v1291_v45 = vsel %vm889_vm14, %v5131_v57, 0.0 }
 0x9be   : > { %v5133_v0 = vpop.eup %4178  ;;  %v1397_v7 = vsel %vm834_vm11, %v1389_v6, 0 }
 0x9bf   : > { %v1316_v3 = vpack.c.bf16 %v5133_v0, %v5131_v57 }
 0x9c1   : > { %3857 = vmatmul.mubr.msk.bf16.vlgmr.msra.gmra.mrb[8].mxu1 %vm889_vm14, %v1316_v3  ;;  %v1385_v9 = vpop.permute.xlu1 %1384 }
 0x9c2   : > { %3861 = vmatpush3.bf16.xpose.msra.mxu1 %v1394_v2  ;;  %3864 = vmatprep.mubr.msk.bf16.mxu1 %vm4583_vm12, %v4582_v18 }
 0x9c3   : > { %3862 = vmatprep.subr.bf16.mxu1 %v4582_v18 }
 0x9ca   : > { %3863 = vmatpush3.bf16.xpose.msra.mxu1 %v1397_v7 }
 0x9cb   : > { %3884 = vmatprep.subr.bf16.mxu1 %v4582_v18 }
 0x9d1   : > { %3865 = vmatmul.mubr.msk.bf16.vlgmr.msra.gmra.mrb[12].mxu1 %vm834_vm11, %v1385_v9 }
 0x9d2   : > { %3888 = vmatprep.mubr.msk.bf16.mxu1 %vm4583_vm12, %v4582_v18 }
 0xa94   : > { %v5147_v12 = vpop.f32.mrb[8].mxu1 }
 0xa95   : > { %v3858_v13 = vpop.f32.mrb[9].mxu1 }
 0xa96   : > { %v5149_v17 = vpop.f32.mrb[10].mxu1 }
 0xa97   : > { %v3859_v19 = vpop.f32.mrb[11].mxu1 }
 0xaa4   : > { %v1433_v20 = vpop.f32.mrb[12].mxu1 }
 0xaa5   : > { %v1440_v21 = vsel %vm4958_vm13, -1e+30, %v1433_v20  ;;  %v3866_v22 = vpop.f32.mrb[13].mxu1 }
 0xaa6   : > { %v1436_v10 = vpop.f32.mrb[14].mxu1  ;;  %v1444_v25 = vsel %vm889_vm14, %v1440_v21, -inf }
 0xaa7   : > { %v1441_v28 = vsel %vm4962_vm15, -1e+30, %v1436_v10  ;;  %1445 = vmax.xlane.f32.xlu1 %v1444_v25  ;;  %v3867_v31 = vpop.f32.mrb[15].mxu1 }
 0xaa8   : > { %v1447_v41 = vsel %vm889_vm14, %v1441_v28, -inf }
 0xaa9   : > { %1448 = vmax.xlane.f32.xlu0 %v1447_v41 }
 0xb34   : > { %v1446_v49 = vpop.xlane.xlu1 %1445 }
 0xb35   : > { %v5162_v50 = vmax.f32 %v5159_v48, %v1446_v49 }
 0xb36   : > { %v1449_v51 = vpop.xlane.xlu0 %1448 }
 0xb37   : > { %1567 = vst.msk [vmem:[#allocation3] sm:$0xff] %vm1486_vm3, %v5162_v50  ;;  %v5171_v54 = vmax.f32 %v5164_v52, %v1449_v51  ;;  %1460 = vperm.xlu1 %4143, %v5162_v50  }
 0xb39   : > { %1568 = vst.msk [vmem:[#allocation3 + $0x8] sm:$0xff] %vm1486_vm3, %v5171_v54  ;;  %1465 = vperm.xlu0 %4144, %v5171_v54  }
 0xb3b   : > { %1504 = vrot.lane.b32.xlu1 %v4999_v4, %s4589_s14 }
 0xb3f   : > { %1506 = vrot.lane.b32.xlu1 %v5004_v5, %s4589_s14 }
 0xb43   : > { %1573 = vrot.lane.b32.xlu1 %v4935_v14, %s4591_s12 }
 0xb47   : > { %1575 = vrot.lane.b32.xlu1 %v4947_v33, %s4591_s12 }
 0xb4b   : > { %1571 = vrot.lane.b32.xlu1 %v4952_v35, %s4591_s12 }
 0xbb6   : > { %v1461_v3 = vpop.permute.xlu1 %1460 }
 0xbb7   : > { %v1468_v6 = vsub.f32 %v1440_v21, %v1461_v3 }
 0xbb8   : > { %v1466_v7 = vpop.permute.xlu0 %1465 }
 0xbb9   : > { %v1470_v9 = vmul.f32 1.442695, %v1468_v6  ;;  %v1469_v13 = vsub.f32 %v1441_v28, %v1466_v7 }
 0xbba   : > { %v1505_v19 = vpop.permute.xlu1 %1504 }
 0xbbb   : > { %v1472_v20 = vmul.f32 1.442695, %v1469_v13  ;;  %3869 = vmatpush3.bf16.msra.mxu0 %v1505_v19  ;;  %4180 = vpow2.f32 %v1470_v9 }
 0xbbc   : > { %3870 = vmatprep.subr.bf16.mxu0 %v4582_v18 }
 0xbbd   : > { %4182 = vpow2.f32 %v1472_v20 }
 0xbbe   : > { %v1507_v22 = vpop.permute.xlu1 %1506 }
 0xbbf   : > { %3871 = vmatpush3.bf16.msra.mxu0 %v1507_v22 }
 0xbc0   : > { %3876 = vmatprep.subr.bf16.mxu0 %v4582_v18 }
 0xbc2   : > { %v1574_v10 = vpop.permute.xlu1 %1573 }
 0xbc3   : > { %v1581_v21 = vsel %vm834_vm11, %v1574_v10, 0 }
 0xbc5   : > { %v5191_v25 = vpop.eup %4180 }
 0xbc6   : > { %v1576_v41 = vpop.permute.xlu1 %1575 }
 0xbc7   : > { %v5193_v31 = vpop.eup %4182  ;;  %v1584_v49 = vsel %vm834_vm11, %v1576_v41, 0 }
 0xbc8   : > { %v1503_v28 = vpack.c.bf16 %v5193_v31, %v5191_v25 }
 0xbca   : > { %3873 = vmatmul.mubr.msk.bf16.vlgmr.msra.gmra.mrb[12].mxu0 %vm889_vm14, %v1503_v28  ;;  %v1572_v51 = vpop.permute.xlu1 %1571 }
 0xbcb   : > { %3877 = vmatpush3.bf16.xpose.msra.mxu0 %v1581_v21  ;;  %3880 = vmatprep.mubr.msk.bf16.mxu0 %vm4583_vm12, %v4582_v18 }
 0xbcc   : > { %3878 = vmatprep.subr.bf16.mxu0 %v4582_v18 }
 0xbd3   : > { %3879 = vmatpush3.bf16.xpose.msra.mxu0 %v1584_v49  ;;  %v5920_v49 = vmov 4  }
 0xbd4   : > { %3900 = vmatprep.subr.bf16.mxu0 %v4582_v18  ;;  %4145 = vset.pattern.permute.xlu1 %v5920_v49 }
 0xbd5   : > { %4146 = vset.pattern.permute.xlu0 %v5920_v49 }
 0xbda   : > { %3881 = vmatmul.mubr.msk.bf16.vlgmr.msra.gmra.mrb[16].mxu0 %vm834_vm11, %v1572_v51  ;;  %v5219_v51 = vld [vmem:[#allocation3] sm:$0xff] }
 0xbdb   : > { %3904 = vmatprep.mubr.msk.bf16.mxu0 %vm4583_vm12, %v4582_v18 }
 0xc9d   : > { %v5207_v3 = vpop.f32.mrb[12].mxu0 }
 0xc9e   : > { %v3874_v6 = vpop.f32.mrb[13].mxu0 }
 0xc9f   : > { %v5209_v7 = vpop.f32.mrb[14].mxu0 }
 0xca0   : > { %v3875_v9 = vpop.f32.mrb[15].mxu0 }
 0xcad   : > { %v1620_v13 = vpop.f32.mrb[16].mxu0 }
 0xcae   : > { %v1627_v19 = vsel %vm4958_vm13, -1e+30, %v1620_v13  ;;  %v3882_v20 = vpop.f32.mrb[17].mxu0  ;;  %v5224_v13 = vld [vmem:[#allocation3 + $0x8] sm:$0xff] }
 0xcaf   : > { %v1623_v22 = vpop.f32.mrb[18].mxu0  ;;  %v1631_v10 = vsel %vm889_vm14, %v1627_v19, -inf }
 0xcb0   : > { %v1628_v21 = vsel %vm4962_vm15, -1e+30, %v1623_v22  ;;  %1632 = vmax.xlane.f32.xlu1 %v1631_v10  ;;  %v3883_v28 = vpop.f32.mrb[19].mxu0 }
 0xcb1   : > { %v1634_v41 = vsel %vm889_vm14, %v1628_v21, -inf }
 0xcb2   : > { %1635 = vmax.xlane.f32.xlu0 %v1634_v41 }
 0xd3d   : > { %v1633_v6 = vpop.xlane.xlu1 %1632 }
 0xd3e   : > { %v5222_v9 = vmax.f32 %v5219_v51, %v1633_v6 }
 0xd3f   : > { %v1636_v20 = vpop.xlane.xlu0 %1635 }
 0xd40   : > { %1754 = vst.msk [vmem:[#allocation3] sm:$0xff] %vm1673_vm4, %v5222_v9  ;;  %v5231_v10 = vmax.f32 %v5224_v13, %v1636_v20  ;;  %1647 = vperm.xlu1 %4145, %v5222_v9  }
 0xd42   : > { %1755 = vst.msk [vmem:[#allocation3 + $0x8] sm:$0xff] %vm1673_vm4, %v5231_v10  ;;  %1652 = vperm.xlu0 %4146, %v5231_v10  }
 0xd44   : > { %1691 = vrot.lane.b32.xlu1 %v4999_v4, %s4591_s12 }
 0xd48   : > { %1693 = vrot.lane.b32.xlu1 %v5004_v5, %s4591_s12 }
 0xd49   : > { %v5284_v42 = vld [vmem:[#allocation3 + $0x8] sm:$0xff] }
 0xd4c   : > { %1760 = vrot.lane.b32.xlu1 %v4935_v14, %s4593_s10 }
 0xd50   : > { %1762 = vrot.lane.b32.xlu1 %v4947_v33, %s4593_s10 }
 0xd54   : > { %1758 = vrot.lane.b32.xlu1 %v4952_v35, %s4593_s10 }
 0xdbf   : > { %v1648_v41 = vpop.permute.xlu1 %1647 }
 0xdc0   : > { %v1655_v6 = vsub.f32 %v1627_v19, %v1648_v41 }
 0xdc1   : > { %v1653_v20 = vpop.permute.xlu0 %1652 }
 0xdc2   : > { %v1657_v28 = vmul.f32 1.442695, %v1655_v6  ;;  %v1656_v22 = vsub.f32 %v1628_v21, %v1653_v20 }
 0xdc3   : > { %v1692_v49 = vpop.permute.xlu1 %1691 }
 0xdc4   : > { %v1659_v2 = vmul.f32 1.442695, %v1656_v22  ;;  %3885 = vmatpush3.bf16.msra.mxu1 %v1692_v49  ;;  %4184 = vpow2.f32 %v1657_v28 }
 0xdc5   : > { %3886 = vmatprep.subr.bf16.mxu1 %v4582_v18 }
 0xdc6   : > { %4186 = vpow2.f32 %v1659_v2 }
 0xdc7   : > { %v1694_v53 = vpop.permute.xlu1 %1693 }
 0xdc8   : > { %3887 = vmatpush3.bf16.msra.mxu1 %v1694_v53 }
 0xdc9   : > { %3892 = vmatprep.subr.bf16.mxu1 %v4582_v18 }
 0xdcb   : > { %v1761_v46 = vpop.permute.xlu1 %1760 }
 0xdcc   : > { %v1768_v19 = vsel %vm834_vm11, %v1761_v46, 0 }
 0xdce   : > { %v5251_v32 = vpop.eup %4184 }
 0xdcf   : > { %v1763_v53 = vpop.permute.xlu1 %1762 }
 0xdd0   : > { %v5253_v38 = vpop.eup %4186  ;;  %v1771_v2 = vsel %vm834_vm11, %v1763_v53, 0 }
 0xdd1   : > { %v1690_v21 = vpack.c.bf16 %v5253_v38, %v5251_v32 }
 0xdd3   : > { %3889 = vmatmul.mubr.msk.bf16.vlgmr.msra.gmra.mrb[16].mxu1 %vm889_vm14, %v1690_v21  ;;  %v1759_v49 = vpop.permute.xlu1 %1758 }
 0xdd4   : > { %3893 = vmatpush3.bf16.xpose.msra.mxu1 %v1768_v19  ;;  %3896 = vmatprep.mubr.msk.bf16.mxu1 %vm4583_vm12, %v4582_v18 }
 0xdd5   : > { %3894 = vmatprep.subr.bf16.mxu1 %v4582_v18 }
 0xddc   : > { %3895 = vmatpush3.bf16.xpose.msra.mxu1 %v1771_v2 }
 0xddd   : > { %3916 = vmatprep.subr.bf16.mxu1 %v4582_v18 }
 0xde3   : > { %3897 = vmatmul.mubr.msk.bf16.vlgmr.msra.gmra.mrb[20].mxu1 %vm834_vm11, %v1759_v49 }
 0xde4   : > { %3920 = vmatprep.mubr.msk.bf16.mxu1 %vm4583_vm12, %v4582_v18 }
 0xea6   : > { %v5267_v46 = vpop.f32.mrb[16].mxu1 }
 0xea7   : > { %v3890_v22 = vpop.f32.mrb[17].mxu1 }
 0xea8   : > { %v5269_v28 = vpop.f32.mrb[18].mxu1  ;;  %v5924_v22 = vmov 5  }
 0xea9   : > { %v3891_v41 = vpop.f32.mrb[19].mxu1  ;;  %4147 = vset.pattern.permute.xlu1 %v5924_v22  ;;  %4148 = vset.pattern.permute.xlu0 %v5924_v22 }
 0xeaa   : > { %v5279_v41 = vld [vmem:[#allocation3] sm:$0xff] }
 0xeb6   : > { %v1807_v6 = vpop.f32.mrb[20].mxu1 }
 0xeb7   : > { %v1814_v20 = vsel %vm4958_vm13, -1e+30, %v1807_v6  ;;  %v3898_v19 = vpop.f32.mrb[21].mxu1 }
 0xeb8   : > { %v1810_v21 = vpop.f32.mrb[22].mxu1  ;;  %v1818_v53 = vsel %vm889_vm14, %v1814_v20, -inf }
 0xeb9   : > { %v1815_v2 = vsel %vm4962_vm15, -1e+30, %v1810_v21  ;;  %1819 = vmax.xlane.f32.xlu1 %v1818_v53  ;;  %v3899_v49 = vpop.f32.mrb[23].mxu1 }
 0xeba   : > { %v1821_v26 = vsel %vm889_vm14, %v1815_v2, -inf }
 0xebb   : > { %1822 = vmax.xlane.f32.xlu0 %v1821_v26 }
 0xf46   : > { %v1820_v6 = vpop.xlane.xlu1 %1819 }
 0xf47   : > { %v5282_v19 = vmax.f32 %v5279_v41, %v1820_v6 }
 0xf48   : > { %v1823_v44 = vpop.xlane.xlu0 %1822 }
 0xf49   : > { %5961 = vst [vmem:[#allocation28_spill] sm:$0xff] %v5282_v19  ;;  %1941 = vst.msk [vmem:[#allocation3] sm:$0xff] %vm1860_vm5, %v5282_v19  ;;  %v5291_v26 = vmax.f32 %v5284_v42, %v1823_v44  ;;  %1834 = vperm.xlu1 %4147, %v5282_v19  }
 0xf4b   : > { %1942 = vst.msk [vmem:[#allocation3 + $0x8] sm:$0xff] %vm1860_vm5, %v5291_v26  ;;  %1839 = vperm.xlu0 %4148, %v5291_v26  }
 0xf4d   : > { %1878 = vrot.lane.b32.xlu1 %v4999_v4, %s4593_s10 }
 0xf4f   : > { %4150 = vset.pattern.permute.xlu0 %v5927_v55 }
 0xf51   : > { %1880 = vrot.lane.b32.xlu1 %v5004_v5, %s4593_s10 }
 0xf55   : > { %1947 = vrot.lane.b32.xlu1 %v4935_v14, %s4595_s25 }
 0xf59   : > { %1949 = vrot.lane.b32.xlu1 %v4947_v33, %s4595_s25 }
 0xf5d   : > { %1945 = vrot.lane.b32.xlu1 %v4952_v35, %s4595_s25 }
 0xfc8   : > { %v1835_v44 = vpop.permute.xlu1 %1834 }
 0xfc9   : > { %v1842_v49 = vsub.f32 %v1814_v20, %v1835_v44 }
 0xfca   : > { %v1840_v6 = vpop.permute.xlu0 %1839 }
 0xfcb   : > { %v1844_v21 = vmul.f32 1.442695, %v1842_v49  ;;  %v1843_v53 = vsub.f32 %v1815_v2, %v1840_v6 }
 0xfcc   : > { %v1879_v22 = vpop.permute.xlu1 %1878 }
 0xfcd   : > { %v1846_v36 = vmul.f32 1.442695, %v1843_v53  ;;  %3901 = vmatpush3.bf16.msra.mxu0 %v1879_v22  ;;  %4188 = vpow2.f32 %v1844_v21 }
 0xfce   : > { %3902 = vmatprep.subr.bf16.mxu0 %v4582_v18 }
 0xfcf   : > { %4190 = vpow2.f32 %v1846_v36 }
 0xfd0   : > { %v1881_v1 = vpop.permute.xlu1 %1880 }
 0xfd1   : > { %3903 = vmatpush3.bf16.msra.mxu0 %v1881_v1 }
 0xfd2   : > { %3908 = vmatprep.subr.bf16.mxu0 %v4582_v18 }
 0xfd4   : > { %v1948_v55 = vpop.permute.xlu1 %1947 }
 0xfd5   : > { %v1955_v20 = vsel %vm834_vm11, %v1948_v55, 0 }
 0xfd7   : > { %v5312_v60 = vpop.eup %4188 }
 0xfd8   : > { %v1950_v1 = vpop.permute.xlu1 %1949 }
 0xfd9   : > { %v5314_v19 = vpop.eup %4190  ;;  %v1958_v36 = vsel %vm834_vm11, %v1950_v1, 0 }
 0xfda   : > { %v1877_v2 = vpack.c.bf16 %v5314_v19, %v5312_v60 }
 0xfdc   : > { %3905 = vmatmul.mubr.msk.bf16.vlgmr.msra.gmra.mrb[20].mxu0 %vm889_vm14, %v1877_v2  ;;  %v1946_v22 = vpop.permute.xlu1 %1945 }
 0xfdd   : > { %3909 = vmatpush3.bf16.xpose.msra.mxu0 %v1955_v20  ;;  %3912 = vmatprep.mubr.msk.bf16.mxu0 %vm4583_vm12, %v4582_v18 }
 0xfde   : > { %3910 = vmatprep.subr.bf16.mxu0 %v4582_v18 }
 0xfe5   : > { %3911 = vmatpush3.bf16.xpose.msra.mxu0 %v1958_v36 }
 0xfe6   : > { %3932 = vmatprep.subr.bf16.mxu0 %v4582_v18 }
 0xfec   : > { %3913 = vmatmul.mubr.msk.bf16.vlgmr.msra.gmra.mrb[24].mxu0 %vm834_vm11, %v1946_v22 }
 0xfed   : > { %3936 = vmatprep.mubr.msk.bf16.mxu0 %vm4583_vm12, %v4582_v18 }
0x10af   : > { %v5328_v55 = vpop.f32.mrb[20].mxu0 }
0x10b0   : > { %v3906_v21 = vpop.f32.mrb[21].mxu0 }
0x10b1   : > { %v5330_v53 = vpop.f32.mrb[22].mxu0 }
0x10b2   : > { %v3907_v44 = vpop.f32.mrb[23].mxu0 }
0x10b3   : > { %v5929_v44 = vmov 6  }
0x10b4   : > { %4149 = vset.pattern.permute.xlu1 %v5929_v44 }
0x10bf   : > { %v1994_v49 = vpop.f32.mrb[24].mxu0 }
0x10c0   : > { %v5334_v6 = vsel %vm4958_vm13, -1e+30, %v1994_v49  ;;  %v3914_v20 = vpop.f32.mrb[25].mxu0  ;;  %v924_v49 = vsel %vm889_vm14, %v5011_v15, 0.0  ;;  %v5358_v15 = vld [vmem:[#allocation3] sm:$0xff] }
0x10c1   : > { %v1997_v2 = vpop.f32.mrb[26].mxu0  ;;  %v2005_v1 = vsel %vm889_vm14, %v5334_v6, -inf  ;;  %v5962_v20 = vsub.f32 %v4975_v56, %v4978_v58  ;;  %v5363_v58 = vld [vmem:[#allocation3 + $0x8] sm:$0xff] }
0x10c2   : > { %v5340_v36 = vsel %vm4962_vm15, -1e+30, %v1997_v2  ;;  %2006 = vmax.xlane.f32.xlu1 %v2005_v1  ;;  %v3915_v22 = vpop.f32.mrb[27].mxu0 }
0x10c3   : > { %v2008_v21 = vsel %vm889_vm14, %v5340_v36, -inf  ;;  %v900_v2 = vmul.f32 1.442695, %v5962_v20  ;;  %v1107_v22 = vsel %vm889_vm14, %v5073_v63, 0.0  ;;  %v935_v63 = vld [vmem:[#allocation5] sm:$0xff] }
0x10c4   : > { %2009 = vmax.xlane.f32.xlu0 %v2008_v21  ;;  %v1294_v21 = vsel %vm889_vm14, %v5133_v0, 0.0 }
0x10c5   : > { %4192 = vpow2.f32 %v900_v2 }
0x10cf   : > { %v4193_v1 = vpop.eup %4192 }
0x10da   : > { %2065 = vrot.lane.b32.xlu0 %v4999_v4, %s4595_s25 }
0x10f9   : > { %925 = vadd.xlane.f32.xlu0 %v924_v49 }
0x110f   : > { %939 = vperm.xlu0 %4150, %v4193_v1  }
0x112e   : > { %1108 = vadd.xlane.f32.xlu0 %v1107_v22  ;;  %v5963_v22 = vmov 0  }
0x1132   : > { %1295 = vadd.xlane.f32.xlu0 %v1294_v21  ;;  %v920_v21 = vld [vmem:[#allocation4] sm:$0xff] }
0x1148   : > { %1369 = vrot.lane.b32.xlu0 %v5147_v12, %s4595_s25  ;;  %v927_v12 = vsel %vm889_vm14, %v5013_v16, 0.0  ;;  %v1104_v16 = vsel %vm889_vm14, %v5071_v61, 0.0 }
0x114f   : > { %v2007_v49 = vpop.xlane.xlu1 %2006 }
0x1150   : > { %v5361_v56 = vmax.f32 %v5358_v15, %v2007_v49  ;;  %v922_v49 = vmul.f32 %v4193_v1, %v920_v21  ;;  %v5965_v21 = vmov 1  }
0x1151   : > { %v2010_v20 = vpop.xlane.xlu0 %2009 }
0x1152   : > { %2128 = vst.msk [vmem:[#allocation3] sm:$0xff] %vm2047_vm6, %v5361_v56  ;;  %v5370_v0 = vmax.f32 %v5363_v58, %v2010_v20  ;;  %2021 = vperm.xlu1 %4149, %v5361_v56  }
0x1154   : > { %2129 = vst.msk [vmem:[#allocation3 + $0x8] sm:$0xff] %vm2047_vm6, %v5370_v0 }
0x1155   : > { %v2066_v2 = vpop.permute.xlu0 %2065 }
0x1156   : > { %2026 = vperm.xlu1 %4149, %v5370_v0   ;;  %3917 = vmatpush3.bf16.msra.mxu1 %v2066_v2 }
0x1157   : > { %3918 = vmatprep.subr.bf16.mxu1 %v4582_v18 }
0x115a   : > { %2067 = vrot.lane.b32.xlu1 %v5004_v5, %s4595_s25 }
0x115b   : > { %4151 = vset.pattern.permute.xlu1 %v5963_v22  ;;  %v5964_v22 = vsub.f32 %v4980_v59, %v4988_v62  ;;  %v5966_v59 = vsub.f32 %v5039_v37, %v5042_v39  ;;  %v5471_v27 = vld [vmem:[#allocation3 + $0x8] sm:$0xff] }
0x115d   : > { %v1080_v62 = vmul.f32 1.442695, %v5966_v59 }
0x115e   : > { %2134 = vrot.lane.b32.xlu1 %v4935_v14, %s4597_s13  ;;  %v902_v14 = vmul.f32 1.442695, %v5964_v22 }
0x1160   : > { %4194 = vpow2.f32 %v902_v14 }
0x1161   : > { %4196 = vpow2.f32 %v1080_v62  ;;  %v936_v62 = vld [vmem:[#allocation5 + $0x8] sm:$0xff] }
0x1162   : > { %2136 = vrot.lane.b32.xlu1 %v4947_v33, %s4597_s13 }
0x1166   : > { %2132 = vrot.lane.b32.xlu1 %v4952_v35, %s4597_s13 }
0x116a   : > { %v4195_v1 = vpop.eup %4194 }
0x1186   : > { %v926_v20 = vpop.xlane.xlu0 %925 }
0x1187   : > { %v930_v2 = vadd.f32 %v926_v20, %v922_v49 }
0x1189   : > { %933 = vst.msk [vmem:[#allocation4] sm:$0xff] %vm932_vm0, %v930_v2 }
0x118a   : > { %928 = vadd.xlane.f32.xlu1 %v927_v12 }
0x118e   : > { %v940_v44 = vpop.permute.xlu0 %939 }
0x118f   : > { %v947_v33 = vmul.f32 %v940_v44, %v935_v63  ;;  %v5967_v44 = vsub.f32 %v5044_v40, %v5051_v43 }
0x1191   : > { %v1002_v35 = vadd.f32 %v5027_v23, %v947_v33  ;;  %v1082_v63 = vmul.f32 1.442695, %v5967_v44  ;;  %v4197_v23 = vpop.eup %4196 }
0x1193   : > { %1004 = vst.msk [vmem:[#allocation5] sm:$0xff] %vm834_vm11, %v1002_v35  ;;  %4198 = vpow2.f32 %v1082_v63  ;;  %v921_v35 = vld [vmem:[#allocation4 + $0x8] sm:$0xff] }
0x119b   : > { %944 = vperm.xlu1 %4151, %v4195_v1  }
0x119d   : > { %v4199_v40 = vpop.eup %4198 }
0x119f   : > { %4152 = vset.pattern.permute.xlu1 %v5965_v21  ;;  %v923_v21 = vmul.f32 %v4195_v1, %v921_v35 }
0x11bf   : > { %1105 = vadd.xlane.f32.xlu1 %v1104_v16 }
0x11d0   : > { %1119 = vperm.xlu1 %4152, %v4197_v23  }
0x11d1   : > { %v2022_v12 = vpop.permute.xlu1 %2021 }
0x11d2   : > { %v2029_v49 = vsub.f32 %v5334_v6, %v2022_v12 }
0x11d4   : > { %2252 = vrot.lane.b32.xlu1 %v4999_v4, %s4597_s13  ;;  %v2031_v61 = vmul.f32 1.442695, %v2029_v49  ;;  %v5968_v4 = vmov 2   ;;  %v5969_v49 = vsub.f32 %v5104_v30, %v5111_v34 }
0x11d5   : > { %v2027_v20 = vpop.permute.xlu1 %2026 }
0x11d6   : > { %v2030_v2 = vsub.f32 %v5340_v36, %v2027_v20  ;;  %4200 = vpow2.f32 %v2031_v61  ;;  %v1269_v61 = vmul.f32 1.442695, %v5969_v49 }
0x11d8   : > { %v2033_v37 = vmul.f32 1.442695, %v2030_v2  ;;  %2254 = vrot.lane.b32.xlu1 %v5004_v5, %s4597_s13 }
0x11d9   : > { %v2068_v39 = vpop.permute.xlu1 %2067 }
0x11da   : > { %4202 = vpow2.f32 %v2033_v37  ;;  %3919 = vmatpush3.bf16.msra.mxu1 %v2068_v39  ;;  %v1109_v37 = vpop.xlane.xlu0 %1108 }
0x11db   : > { %3924 = vmatprep.subr.bf16.mxu1 %v4582_v18  ;;  %4204 = vpow2.f32 %v1269_v61 }
0x11dc   : > { %1124 = vperm.xlu1 %4152, %v4199_v40  }
0x11dd   : > { %v2135_v43 = vpop.permute.xlu1 %2134 }
0x11de   : > { %v2142_v5 = vsel %vm834_vm11, %v2135_v43, 0 }
0x11e0   : > { %1182 = vrot.lane.b32.xlu1 %v5087_v8, %s4597_s13  ;;  %v5415_v6 = vpop.eup %4200 }
0x11e1   : > { %4153 = vset.pattern.permute.xlu1 %v5968_v4  ;;  %v2137_v8 = vpop.permute.xlu1 %2136 }
0x11e2   : > { %v2145_v14 = vsel %vm834_vm11, %v2137_v8, 0 }
0x11e4   : > { %v5417_v36 = vpop.eup %4202 }
0x11e5   : > { %v2064_v22 = vpack.c.bf16 %v5417_v36, %v5415_v6  ;;  %v2133_v33 = vpop.permute.xlu1 %2132  ;;  %v4205_v39 = vpop.eup %4204 }
0x11e7   : > { %3921 = vmatmul.mubr.msk.bf16.vlgmr.msra.gmra.mrb[24].mxu1 %vm889_vm14, %v2064_v22 }
0x11e8   : > { %3925 = vmatpush3.bf16.xpose.msra.mxu1 %v2142_v5  ;;  %3928 = vmatprep.mubr.msk.bf16.mxu1 %vm4583_vm12, %v4582_v18  ;;  %v1296_v5 = vpop.xlane.xlu0 %1295  ;;  %vm1938_vm12 = vcmask 786048  }
0x11e9   : > { %3926 = vmatprep.subr.bf16.mxu1 %v4582_v18 }
0x11f0   : > { %3927 = vmatpush3.bf16.xpose.msra.mxu1 %v2145_v14 }
0x11f7   : > { %3929 = vmatmul.mubr.msk.bf16.vlgmr.msra.gmra.mrb[28].mxu1 %vm834_vm11, %v2133_v33 }
0x1217   : > { %v929_v16 = vpop.xlane.xlu1 %928 }
0x1218   : > { %v931_v59 = vadd.f32 %v929_v16, %v923_v21  ;;  %v1115_v21 = vld [vmem:[#allocation5] sm:$0xff] }
0x121a   : > { %934 = vst.msk [vmem:[#allocation4 + $0x8] sm:$0xff] %vm932_vm0, %v931_v59 }
0x121b   : > { %v945_v44 = vpop.permute.xlu1 %944 }
0x121c   : > { %v948_v63 = vmul.f32 %v945_v44, %v936_v62 }
0x121e   : > { %v1003_v12 = vadd.f32 %v5029_v24, %v948_v63  ;;  %v1100_v24 = vld [vmem:[#allocation4] sm:$0xff] }
0x121f   : > { %v1102_v8 = vmul.f32 %v4197_v23, %v1100_v24  ;;  %v1370_v24 = vpop.permute.xlu0 %1369 }
0x1220   : > { %1005 = vst.msk [vmem:[#allocation5 + $0x8] sm:$0xff] %vm834_vm11, %v1003_v12  ;;  %vm1751_vm11 = vcmask 654848  }
0x1221   : > { %v1101_v20 = vld [vmem:[#allocation4 + $0x8] sm:$0xff] }
0x1222   : > { %v1103_v2 = vmul.f32 %v4199_v40, %v1101_v20 }
0x1224   : > { %v1111_v1 = vadd.f32 %v1109_v37, %v1103_v2 }
0x1226   : > { %1114 = vst.msk [vmem:[#allocation4 + $0x8] sm:$0xff] %vm1112_vm1, %v1111_v1 }
0x122d   : > { %v1288_v4 = vld [vmem:[#allocation4 + $0x8] sm:$0xff] }
0x122e   : > { %v1290_v43 = vmul.f32 %v4205_v39, %v1288_v4 }
0x1230   : > { %v1298_v22 = vadd.f32 %v1296_v5, %v1290_v43  ;;  %v4598_v43 = vmov 7   ;;  %v1267_v5 = vmul.f32 1.442695, %v5970_v47 }
0x1231   : > { %4155 = vset.pattern.permute.xlu0 %v4598_v43 }
0x1232   : > { %1301 = vst.msk [vmem:[#allocation4 + $0x8] sm:$0xff] %vm1299_vm2, %v1298_v22  ;;  %4206 = vpow2.f32 %v1267_v5 }
0x123c   : > { %v4207_v22 = vpop.eup %4206 }
0x124c   : > { %v1106_v30 = vpop.xlane.xlu1 %1105 }
0x124d   : > { %v1110_v34 = vadd.f32 %v1106_v30, %v1102_v8  ;;  %v5466_v8 = vld [vmem:[#allocation3] sm:$0xff]  ;;  %v1116_v30 = vld [vmem:[#allocation5 + $0x8] sm:$0xff] }
0x124f   : > { %1113 = vst.msk [vmem:[#allocation4] sm:$0xff] %vm1112_vm1, %v1110_v34 }
0x1250   : > { %v1120_v14 = vpop.permute.xlu1 %1119 }
0x1251   : > { %v1127_v16 = vmul.f32 %v1120_v14, %v1115_v21  ;;  %v1481_v21 = vsel %vm889_vm14, %v5193_v31, 0.0 }
0x1254   : > { %v2253_v40 = vpop.permute.xlu1 %2252 }
0x1255   : > { %3933 = vmatpush3.bf16.msra.mxu0 %v2253_v40 }
0x1256   : > { %3934 = vmatprep.subr.bf16.mxu0 %v4582_v18 }
0x1258   : > { %v2255_v33 = vpop.permute.xlu1 %2254 }
0x1259   : > { %3935 = vmatpush3.bf16.msra.mxu0 %v2255_v33 }
0x125c   : > { %v1125_v35 = vpop.permute.xlu1 %1124 }
0x125d   : > { %v1128_v34 = vmul.f32 %v1125_v35, %v1116_v30  ;;  %v5971_v35 = vmov 3   ;;  %v5976_v30 = vsub.f32 %v5219_v51, %v5222_v9 }
0x1260   : > { %v1183_v59 = vpop.permute.xlu1 %1182 }
0x1261   : > { %v1188_v62 = vadd.f32 %v1183_v59, %v1127_v16  ;;  %v1478_v16 = vsel %vm889_vm14, %v5191_v25, 0.0  ;;  %v5972_v59 = vsub.f32 %v5159_v48, %v5162_v50 }
0x1263   : > { %1191 = vst.msk [vmem:[#allocation5] sm:$0xff] %vm1190_vm7, %v1188_v62  ;;  %v1454_v62 = vmul.f32 1.442695, %v5972_v59  ;;  %v5979_v59 = vld [vmem:[#allocation28_spill] sm:$0xff] }
0x1265   : > { %4208 = vpow2.f32 %v1454_v62  ;;  %v5980_v62 = vsub.f32 %v5279_v41, %v5979_v59 }
0x126a   : > { %v1302_v48 = vld [vmem:[#allocation5] sm:$0xff] }
0x126f   : > { %v5499_v31 = vpop.eup %4208 }
0x12ba   : > { %v5439_v23 = vpop.f32.mrb[24].mxu1 }
0x12bb   : > { %v3922_v44 = vpop.f32.mrb[25].mxu1 }
0x12bc   : > { %v5441_v63 = vpop.f32.mrb[26].mxu1  ;;  %v5973_v44 = vsub.f32 %v5164_v52, %v5171_v54 }
0x12bd   : > { %v3923_v12 = vpop.f32.mrb[27].mxu1 }
0x12be   : > { %v1456_v12 = vmul.f32 1.442695, %v5973_v44  ;;  %v1828_v44 = vmul.f32 1.442695, %v5980_v62 }
0x12c0   : > { %4210 = vpow2.f32 %v1456_v12 }
0x12ca   : > { %v2181_v49 = vpop.f32.mrb[28].mxu1  ;;  %v4211_v25 = vpop.eup %4210 }
0x12cb   : > { %v5445_v18 = vsel %vm4958_vm13, -1e+30, %v2181_v49  ;;  %v3930_v61 = vpop.f32.mrb[29].mxu1  ;;  %v1287_v49 = vld [vmem:[#allocation4] sm:$0xff]  ;;  %vm2125_vm13 = vcmask 917248  }
0x12cc   : > { %v2192_v20 = vsel %vm889_vm14, %v5445_v18, -inf  ;;  %v2184_v2 = vpop.f32.mrb[30].mxu1  ;;  %v1289_v61 = vmul.f32 %v4207_v22, %v1287_v49 }
0x12cd   : > { %v5451_v37 = vsel %vm4962_vm15, -1e+30, %v2184_v2  ;;  %2193 = vmax.xlane.f32.xlu1 %v2192_v20  ;;  %v3931_v1 = vpop.f32.mrb[31].mxu1 }
0x12ce   : > { %v2195_v4 = vsel %vm889_vm14, %v5451_v37, -inf }
0x12cf   : > { %2196 = vmax.xlane.f32.xlu0 %v2195_v4  ;;  %v5974_v4 = vmov 4  }
0x12de   : > { %1184 = vrot.lane.b32.xlu1 %v5089_v11, %s4597_s13 }
0x1302   : > { %1292 = vadd.xlane.f32.xlu1 %v1291_v45  ;;  %v5975_v45 = vmov 5  }
0x1313   : > { %1306 = vperm.xlu1 %4153, %v4207_v22  }
0x1317   : > { %1311 = vperm.xlu1 %4153, %v4205_v39  }
0x131b   : > { %1371 = vrot.lane.b32.xlu1 %v5149_v17, %s4595_s25 }
0x131c   : > { %4154 = vset.pattern.permute.xlu1 %v4598_v43 }
0x135a   : > { %v2194_v11 = vpop.xlane.xlu1 %2193 }
0x135b   : > { %v5469_v57 = vmax.f32 %v5466_v8, %v2194_v11 }
0x135c   : > { %v2197_v29 = vpop.xlane.xlu0 %2196 }
0x135d   : > { %v2200_v39 = vsub.f32 %v5466_v8, %v5469_v57  ;;  %2315 = vst.msk [vmem:[#allocation3] sm:$0xff] %vm2234_vm8, %v5469_v57  ;;  %v5478_v17 = vmax.f32 %v5471_v27, %v2197_v29  ;;  %2208 = vperm.xlu1 %4154, %v5469_v57   ;;  %v1641_v29 = vmul.f32 1.442695, %v5976_v30  ;;  %v5983_v30 = vsub.f32 %v5363_v58, %v5370_v0 }
0x135e   : > { %v1185_v14 = vpop.permute.xlu1 %1184 }
0x135f   : > { %v2201_v40 = vsub.f32 %v5471_v27, %v5478_v17  ;;  %2316 = vst.msk [vmem:[#allocation3 + $0x8] sm:$0xff] %vm2234_vm8, %v5478_v17  ;;  %v1189_v33 = vadd.f32 %v1185_v14, %v1128_v34  ;;  %2213 = vperm.xlu0 %4155, %v5478_v17   ;;  %4212 = vpow2.f32 %v1641_v29  ;;  %v5977_v34 = vsub.f32 %v5224_v13, %v5231_v10 }
0x1360   : > { %v2017_v8 = vmul.f32 1.442695, %v5983_v30 }
0x1361   : > { %1192 = vst.msk [vmem:[#allocation5 + $0x8] sm:$0xff] %vm1190_vm7, %v1189_v33  ;;  %4156 = vset.pattern.permute.xlu1 %v5971_v35  ;;  %v1855_v33 = vsel %vm889_vm14, %v5314_v19, 0.0 }
0x1363   : > { %4157 = vset.pattern.permute.xlu0 %v5971_v35 }
0x1368   : > { %v1303_v47 = vld [vmem:[#allocation5 + $0x8] sm:$0xff] }
0x1369   : > { %v5521_v14 = vpop.eup %4212 }
0x137e   : > { %1482 = vadd.xlane.f32.xlu0 %v1481_v21 }
0x1381   : > { %1479 = vadd.xlane.f32.xlu1 %v1478_v16 }
0x138f   : > { %v1293_v20 = vpop.xlane.xlu1 %1292 }
0x1390   : > { %v1297_v2 = vadd.f32 %v1293_v20, %v1289_v61 }
0x1392   : > { %1300 = vst.msk [vmem:[#allocation4] sm:$0xff] %vm1299_vm2, %v1297_v2  ;;  %1493 = vperm.xlu1 %4156, %v5499_v31  }
0x1393   : > { %v1307_v1 = vpop.permute.xlu1 %1306 }
0x1394   : > { %v1314_v50 = vmul.f32 %v1307_v1, %v1302_v48  ;;  %1498 = vperm.xlu0 %4157, %v4211_v25   ;;  %v5981_v1 = vmov 6  }
0x1396   : > { %v1375_v52 = vadd.f32 %v1370_v24, %v1314_v50  ;;  %1556 = vrot.lane.b32.xlu1 %v5207_v3, %s4593_s10  ;;  %v1668_v24 = vsel %vm889_vm14, %v5253_v38, 0.0  ;;  %v1665_v3 = vsel %vm889_vm14, %v5251_v32, 0.0 }
0x1397   : > { %v1312_v54 = vpop.permute.xlu1 %1311  ;;  %4158 = vset.pattern.permute.xlu1 %v5974_v4 }
0x1398   : > { %1378 = vst.msk [vmem:[#allocation5] sm:$0xff] %vm1377_vm9, %v1375_v52  ;;  %4160 = vset.pattern.permute.xlu0 %v5975_v45  ;;  %v1315_v5 = vmul.f32 %v1312_v54, %v1303_v47 }
0x1399   : > { %v1474_v12 = vld [vmem:[#allocation4] sm:$0xff] }
0x139a   : > { %1558 = vrot.lane.b32.xlu1 %v5209_v7, %s4593_s10  ;;  %v1643_v7 = vmul.f32 1.442695, %v5977_v34 }
0x139b   : > { %v1372_v22 = vpop.permute.xlu1 %1371 }
0x139c   : > { %v1376_v11 = vadd.f32 %v1372_v22, %v1315_v5  ;;  %4214 = vpow2.f32 %v1643_v7  ;;  %v2202_v22 = vmul.f32 1.442695, %v2200_v39 }
0x139e   : > { %1379 = vst.msk [vmem:[#allocation5 + $0x8] sm:$0xff] %vm1377_vm9, %v1376_v11  ;;  %v2039_v11 = vsel %vm889_vm14, %v5415_v6, 0.0 }
0x139f   : > { %v1489_v48 = vld [vmem:[#allocation5] sm:$0xff] }
0x13a5   : > { %v1490_v4 = vld [vmem:[#allocation5 + $0x8] sm:$0xff] }
0x13a6   : > { %v5524_v38 = vpop.eup %4214 }
0x13b3   : > { %1669 = vadd.xlane.f32.xlu0 %v1668_v24  ;;  %v5982_v24 = vsub.f32 %v5358_v15, %v5361_v56  ;;  %v2204_v15 = vmul.f32 1.442695, %v2201_v40 }
0x13be   : > { %1666 = vadd.xlane.f32.xlu1 %v1665_v3  ;;  %v2015_v3 = vmul.f32 1.442695, %v5982_v24 }
0x13c9   : > { %1745 = vrot.lane.b32.xlu0 %v5269_v28, %s4591_s12 }
0x13cf   : > { %1680 = vperm.xlu1 %4158, %v5521_v14  }
0x13d3   : > { %1685 = vperm.xlu1 %4158, %v5524_v38  }
0x13d7   : > { %1743 = vrot.lane.b32.xlu1 %v5267_v46, %s4591_s12 }
0x13d8   : > { %4159 = vset.pattern.permute.xlu1 %v5975_v45 }
0x13dc   : > { %v2209_v32 = vpop.permute.xlu1 %2208 }
0x13dd   : > { %v2216_v51 = vsub.f32 %v5445_v18, %v2209_v32  ;;  %v5978_v18 = vsub.f32 %v5284_v42, %v5291_v26  ;;  %v1475_v42 = vld [vmem:[#allocation4 + $0x8] sm:$0xff] }
0x13de   : > { %v2214_v9 = vpop.permute.xlu0 %2213  ;;  %v1477_v26 = vmul.f32 %v4211_v25, %v1475_v42 }
0x13df   : > { %v2218_v13 = vmul.f32 1.442695, %v2216_v51  ;;  %v2217_v10 = vsub.f32 %v5451_v37, %v2214_v9  ;;  %v1830_v16 = vmul.f32 1.442695, %v5978_v18  ;;  %v1852_v37 = vsel %vm889_vm14, %v5312_v60, 0.0 }
0x13e0   : > { %v1476_v60 = vmul.f32 %v5499_v31, %v1474_v12 }
0x13e1   : > { %v2220_v28 = vmul.f32 1.442695, %v2217_v10  ;;  %4216 = vpow2.f32 %v2218_v13 }
0x13e3   : > { %4218 = vpow2.f32 %v2220_v28 }
0x13e4   : > { %4220 = vpow2.f32 %v1830_v16 }
0x13e5   : > { %4222 = vpow2.f32 %v1828_v44 }
0x13e6   : > { %4224 = vpow2.f32 %v2202_v22 }
0x13e7   : > { %4226 = vpow2.f32 %v2015_v3 }
0x13e8   : > { %1856 = vadd.xlane.f32.xlu0 %v1855_v33  ;;  %4228 = vpow2.f32 %v2017_v8 }
0x13e9   : > { %4230 = vpow2.f32 %v2204_v15 }
0x13eb   : > { %v5534_v35 = vpop.eup %4216 }
0x13ec   : > { %v2226_v18 = vsel %vm889_vm14, %v5534_v35, 0.0 }
0x13ed   : > { %v5536_v21 = vpop.eup %4218 }
0x13ee   : > { %v2251_v46 = vpack.c.bf16 %v5536_v21, %v5534_v35  ;;  %v5546_v19 = vpop.eup %4220  ;;  %v2229_v32 = vsel %vm889_vm14, %v5536_v21, 0.0 }
0x13ef   : > { %v5553_v49 = vpop.eup %4222 }
0x13f0   : > { %3937 = vmatmul.mubr.msk.bf16.vlgmr.msra.gmra.mrb[28].mxu0 %vm889_vm14, %v2251_v46 }
0x13fb   : > { %1853 = vadd.xlane.f32.xlu1 %v1852_v37 }
0x13fe   : > { %1872 = vperm.xlu0 %4160, %v5546_v19  }
0x1402   : > { %4162 = vset.pattern.permute.xlu0 %v4598_v43 }
0x140b   : > { %v1483_v61 = vpop.xlane.xlu0 %1482 }
0x140c   : > { %v1485_v20 = vadd.f32 %v1483_v61, %v1477_v26  ;;  %1867 = vperm.xlu1 %4159, %v5553_v49  }
0x140e   : > { %1488 = vst.msk [vmem:[#allocation4 + $0x8] sm:$0xff] %vm1486_vm3, %v1485_v20  ;;  %v1480_v41 = vpop.xlane.xlu1 %1479 }
0x140f   : > { %v1484_v2 = vadd.f32 %v1480_v41, %v1476_v60 }
0x1410   : > { %1930 = vrot.lane.b32.xlu1 %v5328_v55, %s4589_s14  ;;  %v2042_v55 = vsel %vm889_vm14, %v5417_v36, 0.0  ;;  %vm2312_vm14 = vcmask 1048448  }
0x1411   : > { %1487 = vst.msk [vmem:[#allocation4] sm:$0xff] %vm1486_vm3, %v1484_v2  ;;  %4161 = vset.pattern.permute.xlu1 %v5981_v1 }
0x1412   : > { %v1494_v25 = vpop.permute.xlu1 %1493 }
0x1413   : > { %v1501_v50 = vmul.f32 %v1494_v25, %v1489_v48  ;;  %v1499_v52 = vpop.permute.xlu0 %1498 }
0x1414   : > { %1932 = vrot.lane.b32.xlu1 %v5330_v53, %s4589_s14  ;;  %v1502_v45 = vmul.f32 %v1499_v52, %v1490_v4  ;;  %v5569_v53 = vpop.eup %4224 }
0x1415   : > { %v1662_v36 = vld [vmem:[#allocation4 + $0x8] sm:$0xff]  ;;  %v5582_v6 = vpop.eup %4226 }
0x1416   : > { %v1557_v31 = vpop.permute.xlu1 %1556  ;;  %v1664_v57 = vmul.f32 %v5524_v38, %v1662_v36  ;;  %v4229_v0 = vpop.eup %4228 }
0x1417   : > { %v1562_v54 = vadd.f32 %v1557_v31, %v1501_v50  ;;  %v4231_v28 = vpop.eup %4230 }
0x1418   : > { %v1661_v34 = vld [vmem:[#allocation4] sm:$0xff] }
0x1419   : > { %1565 = vst.msk [vmem:[#allocation5] sm:$0xff] %vm1564_vm10, %v1562_v54  ;;  %v1663_v56 = vmul.f32 %v5521_v14, %v1661_v34 }
0x141a   : > { %v1559_v47 = vpop.permute.xlu1 %1558 }
0x141b   : > { %v1563_v5 = vadd.f32 %v1559_v47, %v1502_v45 }
0x141d   : > { %1566 = vst.msk [vmem:[#allocation5 + $0x8] sm:$0xff] %vm1564_vm10, %v1563_v5  ;;  %2043 = vadd.xlane.f32.xlu0 %v2042_v55 }
0x1420   : > { %v1676_v51 = vld [vmem:[#allocation5] sm:$0xff] }
0x1424   : > { %v1677_v17 = vld [vmem:[#allocation5 + $0x8] sm:$0xff] }
0x1433   : > { %2241 = vperm.xlu0 %4162, %v5569_v53  }
0x1438   : > { %2040 = vadd.xlane.f32.xlu1 %v2039_v11 }
0x1440   : > { %v1670_v39 = vpop.xlane.xlu0 %1669 }
0x1441   : > { %v1672_v29 = vadd.f32 %v1670_v39, %v1664_v57 }
0x1443   : > { %1675 = vst.msk [vmem:[#allocation4 + $0x8] sm:$0xff] %vm1673_vm4, %v1672_v29 }
0x1444   : > { %v1746_v14 = vpop.permute.xlu0 %1745 }
0x1449   : > { %2054 = vperm.xlu1 %4161, %v5582_v6  }
0x144a   : > { %v1849_v33 = vld [vmem:[#allocation4 + $0x8] sm:$0xff] }
0x144b   : > { %v1667_v58 = vpop.xlane.xlu1 %1666 }
0x144c   : > { %v1671_v7 = vadd.f32 %v1667_v58, %v1663_v56 }
0x144d   : > { %2059 = vperm.xlu1 %4161, %v4229_v0  }
0x144e   : > { %1674 = vst.msk [vmem:[#allocation4] sm:$0xff] %vm1673_vm4, %v1671_v7 }
0x144f   : > { %v1681_v38 = vpop.permute.xlu1 %1680 }
0x1450   : > { %v1688_v9 = vmul.f32 %v1681_v38, %v1676_v51 }
0x1451   : > { %2117 = vrot.lane.b32.xlu1 %v5439_v23, %s4587_s16 }
0x1452   : > { %2230 = vadd.xlane.f32.xlu0 %v2229_v32  ;;  %4163 = vset.pattern.permute.xlu1 %v4598_v43  ;;  %v1851_v43 = vmul.f32 %v5546_v19, %v1849_v33 }
0x1453   : > { %v1686_v27 = vpop.permute.xlu1 %1685 }
0x1454   : > { %v1689_v40 = vmul.f32 %v1686_v27, %v1677_v17 }
0x1455   : > { %2119 = vrot.lane.b32.xlu1 %v5441_v63, %s4587_s16  ;;  %v1848_v63 = vld [vmem:[#allocation4] sm:$0xff] }
0x1456   : > { %v1750_v13 = vadd.f32 %v1746_v14, %v1689_v40  ;;  %v1850_v16 = vmul.f32 %v5553_v49, %v1848_v63 }
0x1457   : > { %v1744_v10 = vpop.permute.xlu1 %1743 }
0x1458   : > { %1753 = vst.msk [vmem:[#allocation5 + $0x8] sm:$0xff] %vm1751_vm11, %v1750_v13  ;;  %v1749_v23 = vadd.f32 %v1744_v10, %v1688_v9 }
0x1459   : > { %2246 = vperm.xlu1 %4163, %v4231_v28  }
0x145a   : > { %1752 = vst.msk [vmem:[#allocation5] sm:$0xff] %vm1751_vm11, %v1749_v23 }
0x145f   : > { %v1864_v61 = vld [vmem:[#allocation5 + $0x8] sm:$0xff] }
0x1461   : > { %v1863_v44 = vld [vmem:[#allocation5] sm:$0xff] }
0x1475   : > { %v1857_v21 = vpop.xlane.xlu0 %1856 }
0x1476   : > { %v1859_v46 = vadd.f32 %v1857_v21, %v1851_v43 }
0x1478   : > { %1862 = vst.msk [vmem:[#allocation4 + $0x8] sm:$0xff] %vm1860_vm5, %v1859_v46 }
0x147d   : > { %2227 = vadd.xlane.f32.xlu1 %v2226_v18  ;;  %v1873_v26 = vpop.permute.xlu0 %1872 }
0x147e   : > { %v1876_v20 = vmul.f32 %v1873_v26, %v1864_v61 }
0x147f   : > { %v2036_v41 = vld [vmem:[#allocation4 + $0x8] sm:$0xff] }
0x1480   : > { %v2038_v2 = vmul.f32 %v4229_v0, %v2036_v41 }
0x1488   : > { %v1854_v37 = vpop.xlane.xlu1 %1853 }
0x1489   : > { %v1858_v59 = vadd.f32 %v1854_v37, %v1850_v16 }
0x148b   : > { %1861 = vst.msk [vmem:[#allocation4] sm:$0xff] %vm1860_vm5, %v1858_v59 }
0x148c   : > { %v1868_v62 = vpop.permute.xlu1 %1867 }
0x148d   : > { %v1875_v42 = vmul.f32 %v1868_v62, %v1863_v44 }
0x1490   : > { %v1931_v19 = vpop.permute.xlu1 %1930 }
0x1491   : > { %v1936_v12 = vadd.f32 %v1931_v19, %v1875_v42 }
0x1492   : > { %v2035_v25 = vld [vmem:[#allocation4] sm:$0xff] }
0x1493   : > { %1939 = vst.msk [vmem:[#allocation5] sm:$0xff] %vm1938_vm12, %v1936_v12  ;;  %v2037_v52 = vmul.f32 %v5582_v6, %v2035_v25 }
0x1494   : > { %v1933_v60 = vpop.permute.xlu1 %1932 }
0x1495   : > { %v1937_v35 = vadd.f32 %v1933_v60, %v1876_v20 }
0x1497   : > { %1940 = vst.msk [vmem:[#allocation5 + $0x8] sm:$0xff] %vm1938_vm12, %v1937_v35 }
0x149a   : > { %v2050_v55 = vld [vmem:[#allocation5] sm:$0xff] }
0x149e   : > { %v2051_v3 = vld [vmem:[#allocation5 + $0x8] sm:$0xff] }
0x14aa   : > { %v2044_v49 = vpop.xlane.xlu0 %2043 }
0x14ab   : > { %v2046_v1 = vadd.f32 %v2044_v49, %v2038_v2 }
0x14ad   : > { %2049 = vst.msk [vmem:[#allocation4 + $0x8] sm:$0xff] %vm2047_vm6, %v2046_v1 }
0x14b2   : > { %v2242_v57 = vpop.permute.xlu0 %2241 }
0x14b4   : > { %v2223_v39 = vld [vmem:[#allocation4 + $0x8] sm:$0xff] }
0x14b5   : > { %v2225_v29 = vmul.f32 %v4231_v28, %v2223_v39 }
0x14c3   : > { %v2295_v48 = vpop.f32.mrb[28].mxu0 }
0x14c4   : > { %2304 = vrot.lane.b32.xlu0 %v2295_v48, %s4585_s29  ;;  %v3938_v50 = vpop.f32.mrb[29].mxu0 }
0x14c5   : > { %v2041_v31 = vpop.xlane.xlu1 %2040  ;;  %v2298_v54 = vpop.f32.mrb[30].mxu0 }
0x14c6   : > { %v2045_v4 = vadd.f32 %v2041_v31, %v2037_v52  ;;  %2306 = vrot.lane.b32.xlu1 %v2298_v54, %s4585_s29  ;;  %v3939_v45 = vpop.f32.mrb[31].mxu0 }
0x14c8   : > { %2048 = vst.msk [vmem:[#allocation4] sm:$0xff] %vm2047_vm6, %v2045_v4 }
0x14c9   : > { %v2055_v47 = vpop.permute.xlu1 %2054 }
0x14ca   : > { %v2062_v22 = vmul.f32 %v2055_v47, %v2050_v55 }
0x14cd   : > { %v2060_v5 = vpop.permute.xlu1 %2059 }
0x14ce   : > { %v2063_v36 = vmul.f32 %v2060_v5, %v2051_v3 }
0x14cf   : > { %v2222_v56 = vld [vmem:[#allocation4] sm:$0xff] }
0x14d0   : > { %v2224_v58 = vmul.f32 %v5569_v53, %v2222_v56 }
0x14d1   : > { %v2118_v11 = vpop.permute.xlu1 %2117 }
0x14d2   : > { %v2123_v24 = vadd.f32 %v2118_v11, %v2062_v22 }
0x14d4   : > { %2126 = vst.msk [vmem:[#allocation5] sm:$0xff] %vm2125_vm13, %v2123_v24 }
0x14d5   : > { %v2120_v30 = vpop.permute.xlu1 %2119 }
0x14d6   : > { %v2124_v8 = vadd.f32 %v2120_v30, %v2063_v36 }
0x14d8   : > { %2127 = vst.msk [vmem:[#allocation5 + $0x8] sm:$0xff] %vm2125_vm13, %v2124_v8 }
0x14d9   : > { %v2247_v15 = vpop.permute.xlu1 %2246 }
0x14db   : > { %v2237_v38 = vld [vmem:[#allocation5] sm:$0xff] }
0x14dc   : > { %v2249_v27 = vmul.f32 %v2242_v57, %v2237_v38 }
0x14df   : > { %v2231_v34 = vpop.xlane.xlu0 %2230  ;;  %v2238_v32 = vld [vmem:[#allocation5 + $0x8] sm:$0xff] }
0x14e0   : > { %v2233_v6 = vadd.f32 %v2231_v34, %v2225_v29  ;;  %v2250_v40 = vmul.f32 %v2247_v15, %v2238_v32 }
0x14e2   : > { %2236 = vst.msk [vmem:[#allocation4 + $0x8] sm:$0xff] %vm2234_vm8, %v2233_v6 }
0x150a   : > { %v2228_v0 = vpop.xlane.xlu1 %2227 }
0x150b   : > { %v2232_v7 = vadd.f32 %v2228_v0, %v2224_v58 }
0x150d   : > { %2235 = vst.msk [vmem:[#allocation4] sm:$0xff] %vm2234_vm8, %v2232_v7 }
0x1536   : > { %v2305_v17 = vpop.permute.xlu0 %2304 }
0x1537   : > { %v2310_v14 = vadd.f32 %v2305_v17, %v2249_v27 }
0x1538   : > { %v2307_v51 = vpop.permute.xlu1 %2306 }
0x1539   : > { %2313 = vst.msk [vmem:[#allocation5] sm:$0xff] %vm2312_vm14, %v2310_v14  ;;  %v2311_v9 = vadd.f32 %v2307_v51, %v2250_v40 }
0x153b   : > { %2314 = vst.msk [vmem:[#allocation5 + $0x8] sm:$0xff] %vm2312_vm14, %v2311_v9 }
0x153c PF: > { %p3599_p4 = scmp.ne.s32.totalorder %s4547_s28, 1 }
0x153d   : > { %v2323_v53 = vld [vmem:[#allocation4] sm:$0xff] (!%p3599_p4)  ;;  %v2324_v13 = vld [vmem:[#allocation4 + $0x8] sm:$0xff] (!%p3599_p4)  ;;  %v4599_v10 = vmov (!%p3599_p4), 1   ;;  %v4600_v28 = vmov (!%p3599_p4), 0   ;;  %v4601_v43 = vmov (!%p3599_p4), 2   ;;  %v4602_v21 = vmov (!%p3599_p4), 3  }
0x153e   : > { %2320 = sbr.rel (%p3599_p4) target bundleno = 6874 (0x1ada), region = 96  ;;  %4233 = vset.pattern.permute.xlu1 (!%p3599_p4), %v4599_v10  ;;  %4232 = vset.pattern.permute.xlu0 (!%p3599_p4), %v4600_v28  ;;  %4333 = vrcp.f32 (!%p3599_p4), %v2323_v53  ;;  %v4245_v46 = vld [vmem:[#allocation9] sm:$0xff] (!%p3599_p4)   ;;  %v4603_v18 = vmov (!%p3599_p4), 0.0   ;;  %v4604_v63 = vmov (!%p3599_p4), 4   ;;  %v4605_v16 = vmov (!%p3599_p4), 5   ;;  %v4246_v37 = vld [vmem:[#allocation9 + $0x8] sm:$0xff] (!%p3599_p4)  }
0x153f   : > { %2911 = vmatprep.mubr.bf16.mxu1 (!%p3599_p4), %v4600_v28  ;;  %4335 = vrcp.f32 (!%p3599_p4), %v2324_v13  ;;  %3940 = vmatprep.subr.bf16.mxu0 (!%p3599_p4), %v4603_v18  ;;  %v4247_v59 = vld [vmem:[#allocation9 + $0x10] sm:$0xff] (!%p3599_p4)   ;;  %v4606_v62 = vmov (!%p3599_p4), 6   ;;  %v4248_v44 = vld [vmem:[#allocation9 + $0x18] sm:$0xff] (!%p3599_p4)   ;;  %v4607_v42 = vmov (!%p3599_p4), 7   ;;  %v4249_v26 = vld [vmem:[#allocation9 + $0x20] sm:$0xff] (!%p3599_p4)   ;;  %vm4608_vm15 = vmmov (!%p3599_p4), 0  }
0x1540   : > { %3941 = vmatpush3.bf16.msra.mxu0 (!%p3599_p4), %v4245_v46  ;;  %v4250_v19 = vld [vmem:[#allocation9 + $0x28] sm:$0xff] (!%p3599_p4)   ;;  %v4251_v12 = vld [vmem:[#allocation9 + $0x30] sm:$0xff] (!%p3599_p4)   ;;  %v4252_v61 = vld [vmem:[#allocation9 + $0x38] sm:$0xff] (!%p3599_p4)   ;;  %3956 = vmatprep.mubr.msk.bf16.mxu0 (!%p3599_p4), %vm4608_vm15, %v4603_v18  ;;  %vm2411_vm0 = vcmask (!%p3599_p4), 130048   ;;  %vm2414_vm1 = vcmask (!%p3599_p4), 261120   ;;  %vm2417_vm2 = vcmask (!%p3599_p4), 392192  }
0x1541   : > { %3942 = vmatprep.subr.bf16.mxu0 (!%p3599_p4), %v4603_v18  ;;  %v2327_v31 = vld [vmem:[#allocation5] sm:$0xff] (!%p3599_p4)  ;;  %vm2420_vm3 = vcmask (!%p3599_p4), 523264   ;;  %vm2423_vm4 = vcmask (!%p3599_p4), 654336   ;;  %vm2426_vm5 = vcmask (!%p3599_p4), 785408   ;;  %vm2429_vm6 = vcmask (!%p3599_p4), 916480   ;;  %v2321_v46 = vld [vmem:[%s4884_s21] sm:$0xff] (!%p3599_p4) }
0x1542   : > { %v2328_v54 = vld [vmem:[#allocation5 + $0x8] sm:$0xff] (!%p3599_p4)  ;;  %s4609_s7 = smov (!%p3599_p4), 64   ;;  %s5984_s29 = sld [smem:[#allocation30_spill]] (!%p3599_p4) }
0x1543   : > { %s5985_s12 = sld [smem:[#allocation31_spill]] (!%p3599_p4)  ;;  %s5986_s13 = sld [smem:[#allocation32_spill]] (!%p3599_p4) }
0x1544   : > { %3943 = vmatpush3.bf16.msra.mxu0 (!%p3599_p4), %v4246_v37  ;;  %v2322_v37 = vld [vmem:[%s4884_s21 + $0x8] sm:$0xff] (!%p3599_p4) }
0x1545   : > { %3944 = vmatprep.subr.bf16.mxu0 %v4603_v18 }
0x1548   : > { %v4334_v23 = vpop.eup %4333  ;;  %3945 = vmatpush3.bf16.msra.mxu0 %v4247_v59 }
0x1549   : > { %2342 = vperm.xlu1 %4233, %v4334_v23   ;;  %2331 = vperm.xlu0 %4232, %v4334_v23   ;;  %v4336_v33 = vpop.eup %4335 }
0x154a   : > { %3946 = vmatprep.subr.bf16.mxu0 %v4603_v18 }
0x154c   : > { %3947 = vmatpush3.bf16.msra.mxu0 %v4248_v44 }
0x154d   : > { %2346 = vperm.xlu1 %4233, %v4336_v33   ;;  %2336 = vperm.xlu0 %4232, %v4336_v33  }
0x154e   : > { %3948 = vmatprep.subr.bf16.mxu0 %v4603_v18 }
0x1550   : > { %3949 = vmatpush3.bf16.msra.mxu0 %v4249_v26 }
0x1551   : > { %4235 = vset.pattern.permute.xlu1 %v4601_v43  ;;  %4234 = vset.pattern.permute.xlu0 %v4601_v43 }
0x1552   : > { %2356 = vperm.xlu1 %4235, %v4336_v33   ;;  %2352 = vperm.xlu0 %4234, %v4334_v23  }
0x1553   : > { %3950 = vmatprep.subr.bf16.mxu0 %v4603_v18 }
0x1554   : > { %3951 = vmatpush3.bf16.msra.mxu0 %v4250_v19 }
0x1555   : > { %3952 = vmatprep.subr.bf16.mxu0 %v4603_v18 }
0x1556   : > { %4236 = vset.pattern.permute.xlu1 %v4602_v21  ;;  %4237 = vset.pattern.permute.xlu0 %v4602_v21  ;;  %v3600_v21 = vld [vmem:[%s5894_s6] ss:$0 sm:$0xff] }
0x1557   : > { %2362 = vperm.xlu1 %4236, %v4334_v23   ;;  %2366 = vperm.xlu0 %4237, %v4336_v33  }
0x1558   : > { %3953 = vmatpush3.bf16.msra.mxu0 %v4251_v12 }
0x1559   : > { %3954 = vmatprep.subr.bf16.mxu0 %v4603_v18 }
0x155b   : > { %4238 = vset.pattern.permute.xlu1 %v4604_v63  ;;  %4239 = vset.pattern.permute.xlu0 %v4605_v16 }
0x155c   : > { %2372 = vperm.xlu1 %4238, %v4334_v23   ;;  %2382 = vperm.xlu0 %4239, %v4334_v23  }
0x155d   : > { %3955 = vmatpush3.bf16.msra.mxu0 %v4252_v61 }
0x1560   : > { %2376 = vperm.xlu1 %4238, %v4336_v33   ;;  %4242 = vset.pattern.permute.xlu0 %v4606_v62 }
0x1561   : > { %2396 = vperm.xlu0 %4242, %v4336_v33  }
0x1564   : > { %4240 = vset.pattern.permute.xlu1 %v4605_v16 }
0x1565   : > { %2386 = vperm.xlu1 %4240, %v4336_v33   ;;  %4244 = vset.pattern.permute.xlu0 %v4607_v42 }
0x1569   : > { %4241 = vset.pattern.permute.xlu1 %v4606_v62 }
0x156a   : > { %2392 = vperm.xlu1 %4241, %v4334_v23  }
0x156e   : > { %4243 = vset.pattern.permute.xlu1 %v4607_v42 }
0x156f   : > { %2402 = vperm.xlu1 %4243, %v4334_v23  }
0x1573   : > { %2406 = vperm.xlu1 %4243, %v4336_v33  }
0x15c8   : > { %v2343_v20 = vpop.permute.xlu1 %2342  ;;  %v2332_v41 = vpop.permute.xlu0 %2331 }
0x15c9   : > { %v2349_v4 = vmul.f32 %v2343_v20, %v2327_v31  ;;  %v2339_v45 = vmul.f32 %v2332_v41, %v2327_v31 }
0x15cb   : > { %v2412_v57 = vsel %vm2411_vm0, %v2339_v45, %v2349_v4 }
0x15cc   : > { %v2347_v60 = vpop.permute.xlu1 %2346  ;;  %v2337_v49 = vpop.permute.xlu0 %2336 }
0x15cd   : > { %v2350_v47 = vmul.f32 %v2347_v60, %v2328_v54  ;;  %v2340_v5 = vmul.f32 %v2337_v49, %v2328_v54 }
0x15cf   : > { %v2413_v39 = vsel %vm2411_vm0, %v2340_v5, %v2350_v47 }
0x15d1   : > { %v2357_v35 = vpop.permute.xlu1 %2356  ;;  %v2353_v25 = vpop.permute.xlu0 %2352 }
0x15d2   : > { %v2360_v11 = vmul.f32 %v2357_v35, %v2328_v54  ;;  %v2359_v24 = vmul.f32 %v2353_v25, %v2327_v31 }
0x15d4   : > { %v2416_v6 = vsel %vm2414_vm1, %v2413_v39, %v2360_v11  ;;  %v2415_v15 = vsel %vm2414_vm1, %v2412_v57, %v2359_v24  ;;  %v4257_v57 = vld [vmem:[%s5897_s9 + $0xc] ss:$16 sps:$4 sm:$0xff]   ;;  %v4255_v39 = vld [vmem:[%s5897_s9 + $0x8] ss:$16 sps:$4 sm:$0xff]  }
0x15d5   : > { %2922 = vmatprep.subr.bf16.mxu0 %v4257_v57 }
0x15d6   : > { %v2363_v2 = vpop.permute.xlu1 %2362  ;;  %v2367_v52 = vpop.permute.xlu0 %2366 }
0x15d7   : > { %v2369_v3 = vmul.f32 %v2363_v2, %v2327_v31  ;;  %v2370_v36 = vmul.f32 %v2367_v52, %v2328_v54 }
0x15d9   : > { %v2418_v58 = vsel %vm2417_vm2, %v2415_v15, %v2369_v3  ;;  %v2419_v0 = vsel %vm2417_vm2, %v2416_v6, %v2370_v36  ;;  %v4263_v6 = vld [vmem:[%s5897_s9 + $0x2c] ss:$16 sps:$4 sm:$0xff]   ;;  %v4261_v15 = vld [vmem:[%s5897_s9 + $0x28] ss:$16 sps:$4 sm:$0xff]  }
0x15db   : > { %v2373_v1 = vpop.permute.xlu1 %2372  ;;  %v2383_v55 = vpop.permute.xlu0 %2382 }
0x15dc   : > { %v2379_v30 = vmul.f32 %v2373_v1, %v2327_v31  ;;  %v2389_v7 = vmul.f32 %v2383_v55, %v2327_v31 }
0x15de   : > { %v2421_v38 = vsel %vm2420_vm3, %v2418_v58, %v2379_v30  ;;  %v4265_v58 = vld [vmem:[%s5897_s9 + $0x44] ss:$16 sps:$4 sm:$0xff]  }
0x15df   : > { %v2377_v48 = vpop.permute.xlu1 %2376  ;;  %v2424_v9 = vsel %vm2423_vm4, %v2421_v38, %v2389_v7  ;;  %v4267_v7 = vld [vmem:[%s5897_s9 + $0x48] ss:$16 sps:$4 sm:$0xff]   ;;  %v4270_v38 = vld [vmem:[%s5897_s9 + $0x40] ss:$16 sps:$4 sm:$0xff]  }
0x15e0   : > { %v2380_v8 = vmul.f32 %v2377_v48, %v2328_v54  ;;  %v2397_v34 = vpop.permute.xlu0 %2396 }
0x15e1   : > { %v2400_v27 = vmul.f32 %v2397_v34, %v2328_v54  ;;  %v4259_v34 = vld [vmem:[%s5897_s9 + $0x24] ss:$16 sps:$4 sm:$0xff]  }
0x15e2   : > { %v2422_v32 = vsel %vm2420_vm3, %v2419_v0, %v2380_v8  ;;  %v4253_v8 = vld [vmem:[%s5897_s9 + $0x4] ss:$16 sps:$4 sm:$0xff]   ;;  %v4269_v0 = vld [vmem:[%s5897_s9 + $0x4c] ss:$16 sps:$4 sm:$0xff]  }
0x15e3   : > { %2879 = vmatprep.subr.bf16.mxu1 %v4253_v8 }
0x15e4   : > { %v2387_v50 = vpop.permute.xlu1 %2386 }
0x15e5   : > { %v2390_v29 = vmul.f32 %v2387_v50, %v2328_v54 }
0x15e7   : > { %v2425_v40 = vsel %vm2423_vm4, %v2422_v32, %v2390_v29  ;;  %v4258_v29 = vld [vmem:[%s5897_s9] ss:$16 sps:$4 sm:$0xff]   ;;  %v4271_v32 = vld [vmem:[%s5897_s9 + $0x64] ss:$16 sps:$4 sm:$0xff]  }
0x15e8   : > { %v2428_v13 = vsel %vm2426_vm5, %v2425_v40, %v2400_v27  ;;  %2880 = vmatpush1.bf16.msra.mxu1 %v4258_v29  ;;  %v4275_v27 = vld [vmem:[%s5897_s9 + $0x6c] ss:$16 sps:$4 sm:$0xff]   ;;  %v4276_v40 = vld [vmem:[%s5897_s9 + $0x60] ss:$16 sps:$4 sm:$0xff]  }
0x15e9   : > { %v2393_v22 = vpop.permute.xlu1 %2392  ;;  %2881 = vmatprep.subr.bf16.mxu1 %v4259_v34 }
0x15ea   : > { %v2399_v17 = vmul.f32 %v2393_v22, %v2327_v31 }
0x15ec   : > { %v2427_v10 = vsel %vm2426_vm5, %v2424_v9, %v2399_v17  ;;  %v4273_v17 = vld [vmem:[%s5897_s9 + $0x68] ss:$16 sps:$4 sm:$0xff]  }
0x15ed   : > { %v4279_v9 = vld [vmem:[%s5897_s9 + $0x88] ss:$16 sps:$4 sm:$0xff]  }
0x15ee   : > { %v2403_v56 = vpop.permute.xlu1 %2402 }
0x15ef   : > { %v2409_v14 = vmul.f32 %v2403_v56, %v2327_v31  ;;  %v4264_v56 = vld [vmem:[%s5897_s9 + $0x20] ss:$16 sps:$4 sm:$0xff]  }
0x15f0   : > { %2882 = vmatpush1.bf16.msra.mxu1 %v4264_v56 }
0x15f1   : > { %v2430_v23 = vsel %vm2429_vm6, %v2427_v10, %v2409_v14  ;;  %2883 = vmatprep.subr.bf16.mxu1 %v4265_v58  ;;  %v4277_v14 = vld [vmem:[%s5897_s9 + $0x84] ss:$16 sps:$4 sm:$0xff]   ;;  %v4287_v10 = vld [vmem:[%s5897_s9 + $0xac] ss:$16 sps:$4 sm:$0xff]  }
0x15f2   : > { %v2407_v51 = vpop.permute.xlu1 %2406 }
0x15f3   : > { %v2410_v53 = vmul.f32 %v2407_v51, %v2328_v54  ;;  %v4281_v51 = vld [vmem:[%s5897_s9 + $0x8c] ss:$16 sps:$4 sm:$0xff]  }
0x15f4   : > { %2884 = vmatpush1.bf16.msra.mxu1 %v4270_v38  ;;  %v3609_v38 = vld [vmem:[%s5984_s29] ss:$0 sm:$0xff] }
0x15f5   : > { %v2431_v33 = vsel %vm2429_vm6, %v2428_v13, %v2410_v53  ;;  %2885 = vmatprep.subr.bf16.mxu1 %v4271_v32  ;;  %v4282_v53 = vld [vmem:[%s5897_s9 + $0x80] ss:$16 sps:$4 sm:$0xff]   ;;  %v4283_v13 = vld [vmem:[%s5897_s9 + $0xa4] ss:$16 sps:$4 sm:$0xff]  }
0x15f6   : > { %v2432_v43 = vpack.c.bf16 %v2431_v33, %v2430_v23  ;;  %v4285_v23 = vld [vmem:[%s5897_s9 + $0xa8] ss:$16 sps:$4 sm:$0xff]   ;;  %v4288_v33 = vld [vmem:[%s5897_s9 + $0xa0] ss:$16 sps:$4 sm:$0xff]  }
0x15f8   : > { %3957 = vmatmul.mubr.bf16.vlgmr.msra.gmra.mrb[0].mxu0 %v2432_v43  ;;  %2886 = vmatpush1.bf16.msra.mxu1 %v4276_v40  ;;  %v4289_v43 = vld [vmem:[%s5897_s9 + $0xc4] ss:$16 sps:$4 sm:$0xff]  }
0x15f9   : > { %2954 = vmatprep.mubr.bf16.mxu0 %v4600_v28  ;;  %2923 = vmatpush1.bf16.msra.mxu0 %v4255_v39 }
0x15fa   : > { %2924 = vmatprep.subr.bf16.mxu0 %v4263_v6  ;;  %2887 = vmatprep.subr.bf16.mxu1 %v4277_v14 }
0x15fc   : > { %2888 = vmatpush1.bf16.msra.mxu1 %v4282_v53 }
0x15fd   : > { %2925 = vmatpush1.bf16.msra.mxu0 %v4261_v15  ;;  %2889 = vmatprep.subr.bf16.mxu1 %v4283_v13 }
0x15fe   : > { %2926 = vmatprep.subr.bf16.mxu0 %v4269_v0 }
0x1600   : > { %2890 = vmatpush1.bf16.msra.mxu1 %v4288_v33  ;;  %v4303_v33 = vld [vmem:[#allocation11] sm:$0xff]  }
0x1601   : > { %2927 = vmatpush1.bf16.msra.mxu0 %v4267_v7  ;;  %2891 = vmatprep.subr.bf16.mxu1 %v4289_v43  ;;  %v4304_v43 = vld [vmem:[#allocation11 + $0x80] sm:$0xff]  }
0x1602   : > { %2928 = vmatprep.subr.bf16.mxu0 %v4275_v27 }
0x1605   : > { %2929 = vmatpush1.bf16.msra.mxu0 %v4273_v17 }
0x1606   : > { %2930 = vmatprep.subr.bf16.mxu0 %v4281_v51  ;;  %v3610_v51 = vld [vmem:[%s5985_s12] ss:$0 sm:$0xff] }
0x1609   : > { %2931 = vmatpush1.bf16.msra.mxu0 %v4279_v9 }
0x160a   : > { %2932 = vmatprep.subr.bf16.mxu0 %v4287_v10  ;;  %v4301_v10 = vld [vmem:[#allocation11 + $0x40] sm:$0xff]  }
0x160d   : > { %2933 = vmatpush1.bf16.msra.mxu0 %v4285_v23  ;;  %v4302_v23 = vld [vmem:[#allocation11 + $0xc0] sm:$0xff]  }
0x16cb   : > { %v2538_v18 = vpop.f32.mrb[0].mxu0 }
0x16cc   : > { %v2539_v63 = vadd.f32 %v3600_v21, %v2538_v18  ;;  %v3958_v16 = vpop.f32.mrb[1].mxu0  ;;  %v4294_v18 = vld [vmem:[%s5897_s9 + $0xc0] ss:$16 sps:$4 sm:$0xff]  }
0x16cd   : > { %v2541_v59 = vpop.f32.mrb[2].mxu0  ;;  %v4299_v16 = vld [vmem:[%s5897_s9 + $0xec] ss:$16 sps:$4 sm:$0xff]   ;;  %2892 = vmatpush1.bf16.msra.mxu1 %v4294_v18 }
0x16ce   : > { %v5622_v62 = vadd.f32 %v2539_v63, %v2321_v46  ;;  %v2542_v44 = vadd.f32 %v3600_v21, %v2541_v59  ;;  %v3959_v42 = vpop.f32.mrb[3].mxu0  ;;  %v4293_v21 = vld [vmem:[%s5897_s9 + $0xcc] ss:$16 sps:$4 sm:$0xff]   ;;  %v4291_v46 = vld [vmem:[%s5897_s9 + $0xc8] ss:$16 sps:$4 sm:$0xff]  }
0x16cf   : > { %2934 = vmatprep.subr.bf16.mxu0 %v4293_v21  ;;  %v4295_v63 = vld [vmem:[%s5897_s9 + $0xe4] ss:$16 sps:$4 sm:$0xff]   ;;  %v4300_v59 = vld [vmem:[%s5897_s9 + $0xe0] ss:$16 sps:$4 sm:$0xff]   ;;  %v4309_v18 = vld [vmem:[#allocation11 + $0x50] sm:$0xff]  }
0x16d0   : > { %v5624_v26 = vadd.f32 %v2542_v44, %v2322_v37  ;;  %2592 = vrot.lane.b32.xlu0 %v5622_v62, %s4609_s7  ;;  %v2549_v20 = vsel %vm2420_vm3, %v5622_v62, 0.0  ;;  %2935 = vmatpush1.bf16.msra.mxu0 %v4291_v46  ;;  %v4297_v37 = vld [vmem:[%s5897_s9 + $0xe8] ss:$16 sps:$4 sm:$0xff]   ;;  %v4307_v21 = vld [vmem:[#allocation11 + $0x8] sm:$0xff]  }
0x16d1   : > { %2893 = vmatprep.subr.bf16.mxu1 %v4295_v63  ;;  %2936 = vmatprep.subr.bf16.mxu0 %v4299_v16  ;;  %v4308_v46 = vld [vmem:[#allocation11 + $0x88] sm:$0xff]   ;;  %v4310_v63 = vld [vmem:[#allocation11 + $0xd0] sm:$0xff]  }
0x16d2   : > { %2594 = vrot.lane.b32.xlu1 %v5624_v26, %s4609_s7  ;;  %v2552_v60 = vsel %vm2420_vm3, %v5624_v26, 0.0  ;;  %2894 = vmatpush1.bf16.msra.mxu1 %v4300_v59  ;;  %v4311_v16 = vld [vmem:[#allocation11 + $0x10] sm:$0xff]   ;;  %v4313_v59 = vld [vmem:[#allocation11 + $0x58] sm:$0xff]  }
0x16d3   : > { %3748 = vmatprep.subr.bf16.mxu1 %v4301_v10 }
0x16d4   : > { %2937 = vmatpush1.bf16.msra.mxu0 %v4297_v37  ;;  %v4312_v37 = vld [vmem:[#allocation11 + $0x90] sm:$0xff]  }
0x16d5   : > { %3770 = vmatprep.subr.bf16.mxu0 %v4302_v23 }
0x1742   : > { %v2593_v28 = vpop.permute.xlu0 %2592 }
0x1743   : > { %v2598_v19 = vsel %vm2420_vm3, %v2593_v28, 0.0 }
0x1744   : > { %v2595_v12 = vpop.permute.xlu1 %2594  ;;  %2599 = vadd.xlane.f32.xlu0 %v2598_v19 }
0x1745   : > { %v2601_v61 = vsel %vm2420_vm3, %v2595_v12, 0.0 }
0x1746   : > { %2602 = vadd.xlane.f32.xlu1 %v2601_v61 }
0x1748   : > { %2550 = vadd.xlane.f32.xlu0 %v2549_v20 }
0x174c   : > { %2553 = vadd.xlane.f32.xlu0 %v2552_v60 }
0x17d1   : > { %v2600_v35 = vpop.xlane.xlu0 %2599 }
0x17d2   : > { %v2604_v41 = vmul.f32 0.015625, %v2600_v35 }
0x17d3   : > { %v2603_v2 = vpop.xlane.xlu1 %2602 }
0x17d4   : > { %v5635_v49 = vsub.f32 %v5622_v62, %v2604_v41  ;;  %v2605_v1 = vmul.f32 0.015625, %v2603_v2 }
0x17d5   : > { %v2551_v52 = vpop.xlane.xlu0 %2550 }
0x17d6   : > { %v5638_v25 = vsub.f32 %v5624_v26, %v2605_v1  ;;  %v2608_v48 = vmul.f32 %v5635_v49, %v5635_v49  ;;  %v2556_v4 = vmul.f32 0.015625, %v2551_v52 }
0x17d8   : > { %2612 = vrot.lane.b32.xlu1 %v2608_v48, %s4609_s7  ;;  %v2609_v50 = vmul.f32 %v5638_v25, %v5638_v25  ;;  %v5648_v47 = vsub.f32 %v5622_v62, %v2556_v4 }
0x17d9   : > { %v2554_v31 = vpop.xlane.xlu0 %2553 }
0x17da   : > { %2614 = vrot.lane.b32.xlu0 %v2609_v50, %s4609_s7  ;;  %v2557_v54 = vmul.f32 0.015625, %v2554_v31  ;;  %v2560_v55 = vmul.f32 %v5648_v47, %v5648_v47  ;;  %s5987_s7 = sld [smem:[#allocation33_spill]] }
0x17dc   : > { %v5645_v45 = vsub.f32 %v5624_v26, %v2557_v54  ;;  %v2562_v11 = vsel %vm2420_vm3, %v2560_v55, 0.0 }
0x17de   : > { %v2561_v5 = vmul.f32 %v5645_v45, %v5645_v45 }
0x17e0   : > { %v2565_v22 = vsel %vm2420_vm3, %v2561_v5, 0.0 }
0x17f9   : > { %2566 = vadd.xlane.f32.xlu0 %v2565_v22 }
0x17fc   : > { %2563 = vadd.xlane.f32.xlu1 %v2562_v11 }
0x184a   : > { %v2613_v24 = vpop.permute.xlu1 %2612 }
0x184b   : > { %v2618_v3 = vsel %vm2420_vm3, %v2613_v24, 0.0 }
0x184c   : > { %2619 = vadd.xlane.f32.xlu1 %v2618_v3  ;;  %v2615_v36 = vpop.permute.xlu0 %2614 }
0x184d   : > { %v2621_v30 = vsel %vm2420_vm3, %v2615_v36, 0.0 }
0x184e   : > { %2622 = vadd.xlane.f32.xlu0 %v2621_v30 }
0x1886   : > { %v2567_v42 = vpop.xlane.xlu0 %2566 }
0x1887   : > { %v2569_v19 = vmul.f32 0.015625, %v2567_v42  ;;  %v4315_v42 = vld [vmem:[#allocation11 + $0x18] sm:$0xff]  }
0x1889   : > { %v2564_v44 = vpop.xlane.xlu1 %2563  ;;  %vm2579_vm8 = vcmp.eq.f32.partialorder %v2569_v19, inf  ;;  %v2582_v54 = vand.u32 2147483648, %v2569_v19  ;;  %vm2581_vm10 = vcmp.eq.f32.partialorder %v2569_v19, 0.0 }
0x188a   : > { %v2568_v28 = vmul.f32 0.015625, %v2564_v44  ;;  %v4314_v44 = vld [vmem:[#allocation11 + $0xd8] sm:$0xff]  }
0x188c   : > { %4337 = vrsqrt.f32 %v2568_v28  ;;  %vm2572_vm7 = vcmp.eq.f32.partialorder %v2568_v28, inf  ;;  %v2575_v50 = vand.u32 2147483648, %v2568_v28  ;;  %vm2574_vm9 = vcmp.eq.f32.partialorder %v2568_v28, 0.0 }
0x188d   : > { %4339 = vrsqrt.f32 %v2569_v19 }
0x1896   : > { %v4338_v61 = vpop.eup %4337 }
0x1897   : > { %v4340_v35 = vpop.eup %4339  ;;  %v2571_v41 = vmul.f32 %v4338_v61, %v2568_v28  ;;  %v4319_v61 = vld [vmem:[#allocation11 + $0x20] sm:$0xff]  }
0x1898   : > { %v2578_v1 = vmul.f32 %v4340_v35, %v2569_v19  ;;  %v4322_v35 = vld [vmem:[#allocation11 + $0xe8] sm:$0xff]  }
0x1899   : > { %v2573_v48 = vsel %vm2572_vm7, %v2568_v28, %v2571_v41  ;;  %v4316_v28 = vld [vmem:[#allocation11 + $0x98] sm:$0xff]   ;;  %v4323_v41 = vld [vmem:[#allocation11 + $0x28] sm:$0xff]  }
0x189a   : > { %v2580_v52 = vsel %vm2579_vm8, %v2569_v19, %v2578_v1  ;;  %v2576_v31 = vsel %vm2574_vm9, %v2575_v50, %v2573_v48  ;;  %v4317_v19 = vld [vmem:[#allocation11 + $0x60] sm:$0xff]   ;;  %v4325_v1 = vld [vmem:[#allocation11 + $0x70] sm:$0xff]  }
0x189b   : > { %v2583_v5 = vsel %vm2581_vm10, %v2582_v54, %v2580_v52  ;;  %v2584_v55 = vadd.f32 1e-05, %v2576_v31  ;;  %v4326_v48 = vld [vmem:[#allocation11 + $0xf0] sm:$0xff]   ;;  %v4329_v31 = vld [vmem:[#allocation11 + $0x78] sm:$0xff]  }
0x189c   : > { %v2585_v36 = vadd.f32 1e-05, %v2583_v5  ;;  %v4327_v50 = vld [vmem:[#allocation11 + $0x30] sm:$0xff]   ;;  %v4330_v54 = vld [vmem:[#allocation11 + $0xf8] sm:$0xff]  }
0x189d   : > { %v4328_v52 = vld [vmem:[#allocation11 + $0xb0] sm:$0xff]   ;;  %v4332_v5 = vld [vmem:[#allocation11 + $0xb8] sm:$0xff]  }
0x18d9   : > { %v2620_v12 = vpop.xlane.xlu1 %2619 }
0x18da   : > { %v2624_v20 = vmul.f32 0.015625, %v2620_v12  ;;  %v4318_v12 = vld [vmem:[#allocation11 + $0xe0] sm:$0xff]  }
0x18db   : > { %v2623_v60 = vpop.xlane.xlu0 %2622 }
0x18dc   : > { %4341 = vrsqrt.f32 %v2624_v20  ;;  %v2625_v2 = vmul.f32 0.015625, %v2623_v60  ;;  %vm2628_vm11 = vcmp.eq.f32.partialorder %v2624_v20, inf  ;;  %v2631_v11 = vand.u32 2147483648, %v2624_v20  ;;  %v4321_v60 = vld [vmem:[#allocation11 + $0x68] sm:$0xff]  }
0x18dd   : > { %vm2630_vm12 = vcmp.eq.f32.partialorder %v2624_v20, 0.0 }
0x18de   : > { %4343 = vrsqrt.f32 %v2625_v2  ;;  %vm2635_vm13 = vcmp.eq.f32.partialorder %v2625_v2, inf  ;;  %v2638_v39 = vand.u32 2147483648, %v2625_v2  ;;  %vm2637_vm14 = vcmp.eq.f32.partialorder %v2625_v2, 0.0 }
0x18df   : > { %4345 = vrcp.f32 %v2584_v55  ;;  %v2699_v55 = vlaneseq }
0x18e6   : > { %v4342_v4 = vpop.eup %4341 }
0x18e7   : > { %v2627_v22 = vmul.f32 %v4342_v4, %v2624_v20  ;;  %v4331_v4 = vld [vmem:[#allocation11 + $0x38] sm:$0xff]  }
0x18e8   : > { %v4344_v24 = vpop.eup %4343 }
0x18e9   : > { %v2629_v3 = vsel %vm2628_vm11, %v2624_v20, %v2627_v22  ;;  %v2634_v8 = vmul.f32 %v4344_v24, %v2625_v2  ;;  %v4346_v15 = vpop.eup %4345  ;;  %v4320_v20 = vld [vmem:[#allocation11 + $0xa0] sm:$0xff]   ;;  %v2700_v22 = vshrl.u32 %v2699_v55, 7 }
0x18ea   : > { %v2632_v30 = vsel %vm2630_vm12, %v2631_v11, %v2629_v3  ;;  %v2587_v0 = vmul.f32 %v4346_v15, %v5648_v47  ;;  %v2697_v3 = vld [vmem:[%s5986_s13] sm:$0xf] }
0x18eb   : > { %v2640_v57 = vadd.f32 1e-05, %v2632_v30  ;;  %v2636_v29 = vsel %vm2635_vm13, %v2625_v2, %v2634_v8  ;;  %v4324_v2 = vld [vmem:[#allocation11 + $0xa8] sm:$0xff]   ;;  %v2701_v11 = vsub.s32 0, %v2700_v22  ;;  %v2709_v24 = vsub.s32 2, %v2700_v22 }
0x18ec   : > { %v2639_v34 = vsel %vm2637_vm14, %v2638_v39, %v2636_v29  ;;  %v2713_v30 = vsub.s32 3, %v2700_v22 }
0x18ed   : > { %4347 = vrcp.f32 %v2640_v57  ;;  %v2641_v6 = vadd.f32 1e-05, %v2639_v34  ;;  %v2702_v8 = vrot.slane %v2697_v3, %v2701_v11  ;;  %v2710_v57 = vrot.slane %v2697_v3, %v2709_v24 }
0x18ee   : > { %4349 = vrcp.f32 %v2585_v36  ;;  %v2705_v36 = vsub.s32 1, %v2700_v22  ;;  %v2714_v29 = vrot.slane %v2697_v3, %v2713_v30 }
0x18ef   : > { %4351 = vrcp.f32 %v2641_v6 }
0x18f0   : > { %v2706_v39 = vrot.slane %v2697_v3, %v2705_v36 }
0x18f7   : > { %v4348_v56 = vpop.eup %4347 }
0x18f8   : > { %v4350_v58 = vpop.eup %4349  ;;  %v2643_v7 = vmul.f32 %v4348_v56, %v5635_v49 }
0x18f9   : > { %v4352_v32 = vpop.eup %4351  ;;  %v2589_v17 = vmul.f32 %v4350_v58, %v5645_v45  ;;  %v4306_v45 = vld [vmem:[#allocation11 + $0xc8] sm:$0xff]  }
0x18fa   : > { %v2646_v27 = vsel %vm2420_vm3, %v2587_v0, %v2643_v7  ;;  %v2645_v40 = vmul.f32 %v4352_v32, %v5638_v25  ;;  %v4305_v25 = vld [vmem:[#allocation11 + $0x48] sm:$0xff]  }
0x18fb   : > { %v2654_v14 = vmul.f32 %v3609_v38, %v2646_v27 }
0x18fc   : > { %v2647_v47 = vsel %vm2420_vm3, %v2589_v17, %v2645_v40 }
0x18fd   : > { %v2655_v9 = vmul.f32 %v3609_v38, %v2647_v47  ;;  %v2662_v49 = vadd.f32 %v3610_v51, %v2654_v14 }
0x18ff   : > { %v2663_v53 = vadd.f32 %v3610_v51, %v2655_v9 }
0x1901   : > { %v2664_v13 = vpack.c.bf16 %v2663_v53, %v2662_v49 }
0x1903   : > { %2912 = vmatmul.mubr.bf16.vlgmr.msra.gmra.mrb[0].mxu1 %v2664_v13  ;;  %2955 = vmatmul.mubr.bf16.vlgmr.msra.gmra.mrb[4].mxu0 %v2664_v13 }
0x1904   : > { %3749 = vmatpush3.bf16.msra.mxu1 %v4303_v33  ;;  %3771 = vmatpush3.bf16.msra.mxu0 %v4304_v43 }
0x1905   : > { %3750 = vmatprep.subr.bf16.mxu1 %v4305_v25  ;;  %3772 = vmatprep.subr.bf16.mxu0 %v4306_v45 }
0x1908   : > { %3751 = vmatpush3.bf16.msra.mxu1 %v4307_v21  ;;  %3773 = vmatpush3.bf16.msra.mxu0 %v4308_v46 }
0x1909   : > { %3752 = vmatprep.subr.bf16.mxu1 %v4309_v18  ;;  %3774 = vmatprep.subr.bf16.mxu0 %v4310_v63 }
0x190c   : > { %3753 = vmatpush3.bf16.msra.mxu1 %v4311_v16  ;;  %3775 = vmatpush3.bf16.msra.mxu0 %v4312_v37 }
0x190d   : > { %3754 = vmatprep.subr.bf16.mxu1 %v4313_v59  ;;  %3776 = vmatprep.subr.bf16.mxu0 %v4314_v44 }
0x1910   : > { %3755 = vmatpush3.bf16.msra.mxu1 %v4315_v42  ;;  %3777 = vmatpush3.bf16.msra.mxu0 %v4316_v28 }
0x1911   : > { %3756 = vmatprep.subr.bf16.mxu1 %v4317_v19  ;;  %3778 = vmatprep.subr.bf16.mxu0 %v4318_v12 }
0x1914   : > { %3757 = vmatpush3.bf16.msra.mxu1 %v4319_v61  ;;  %3779 = vmatpush3.bf16.msra.mxu0 %v4320_v20 }
0x1915   : > { %3758 = vmatprep.subr.bf16.mxu1 %v4321_v60  ;;  %3780 = vmatprep.subr.bf16.mxu0 %v4322_v35 }
0x1918   : > { %3759 = vmatpush3.bf16.msra.mxu1 %v4323_v41  ;;  %3781 = vmatpush3.bf16.msra.mxu0 %v4324_v2 }
0x1919   : > { %3760 = vmatprep.subr.bf16.mxu1 %v4325_v1  ;;  %3782 = vmatprep.subr.bf16.mxu0 %v4326_v48 }
0x191c   : > { %3761 = vmatpush3.bf16.msra.mxu1 %v4327_v50  ;;  %3783 = vmatpush3.bf16.msra.mxu0 %v4328_v52 }
0x191d   : > { %3762 = vmatprep.subr.bf16.mxu1 %v4329_v31  ;;  %3784 = vmatprep.subr.bf16.mxu0 %v4330_v54 }
0x1920   : > { %3763 = vmatpush3.bf16.msra.mxu1 %v4331_v4  ;;  %3785 = vmatpush3.bf16.msra.mxu0 %v4332_v5 }
0x19d6   : > { %v2913_v34 = vpop.f32.mrb[0].mxu1  ;;  %v2956_v6 = vpop.f32.mrb[4].mxu0 }
0x19d7   : > { %v5769_v15 = vadd.f32 %v2913_v34, %v2702_v8  ;;  %v5771_v56 = vadd.f32 %v2956_v6, %v2710_v57  ;;  %v2915_v58 = vpop.f32.mrb[1].mxu1  ;;  %v2958_v0 = vpop.f32.mrb[5].mxu0 }
0x19d8   : > { %v5773_v7 = vadd.f32 %v2915_v58, %v2706_v39  ;;  %v5775_v38 = vadd.f32 %v2958_v0, %v2714_v29  ;;  %v2917_v32 = vpop.f32.mrb[2].mxu1  ;;  %v2960_v27 = vpop.f32.mrb[6].mxu0 }
0x19d9   : > { %v2973_v17 = vmul.f32 0.044715, %v5769_v15  ;;  %v2975_v40 = vmul.f32 0.044715, %v5771_v56  ;;  %v2918_v14 = vadd.f32 %v2917_v32, %v2702_v8  ;;  %v2961_v51 = vadd.f32 %v2960_v27, %v2710_v57  ;;  %v2919_v47 = vpop.f32.mrb[3].mxu1  ;;  %v2962_v9 = vpop.f32.mrb[7].mxu0 }
0x19da   : > { %v2974_v49 = vmul.f32 0.044715, %v5773_v7  ;;  %v2976_v53 = vmul.f32 0.044715, %v5775_v38  ;;  %v5781_v13 = vadd.f32 %v2919_v47, %v2706_v39  ;;  %v5783_v10 = vadd.f32 %v2962_v9, %v2714_v29 }
0x19db   : > { %v2981_v23 = vmul.f32 %v2973_v17, %v5769_v15  ;;  %v2983_v33 = vmul.f32 %v2975_v40, %v5771_v56  ;;  %v2977_v43 = vmul.f32 0.044715, %v2918_v14  ;;  %v2979_v25 = vmul.f32 0.044715, %v2961_v51 }
0x19dc   : > { %v2982_v45 = vmul.f32 %v2974_v49, %v5773_v7  ;;  %v2984_v21 = vmul.f32 %v2976_v53, %v5775_v38  ;;  %v2978_v46 = vmul.f32 0.044715, %v5781_v13  ;;  %v2980_v18 = vmul.f32 0.044715, %v5783_v10 }
0x19dd   : > { %v2989_v63 = vmul.f32 %v2981_v23, %v5769_v15  ;;  %v2991_v16 = vmul.f32 %v2983_v33, %v5771_v56  ;;  %v2985_v37 = vmul.f32 %v2977_v43, %v2918_v14  ;;  %v2987_v59 = vmul.f32 %v2979_v25, %v2961_v51 }
0x19de   : > { %v2990_v44 = vmul.f32 %v2982_v45, %v5773_v7  ;;  %v2992_v42 = vmul.f32 %v2984_v21, %v5775_v38  ;;  %v2986_v28 = vmul.f32 %v2978_v46, %v5781_v13  ;;  %v2988_v19 = vmul.f32 %v2980_v18, %v5783_v10 }
0x19df   : > { %v2997_v12 = vadd.f32 %v2989_v63, %v5769_v15  ;;  %v2999_v61 = vadd.f32 %v2991_v16, %v5771_v56  ;;  %v2993_v20 = vmul.f32 %v2985_v37, %v2918_v14  ;;  %v2995_v60 = vmul.f32 %v2987_v59, %v2961_v51 }
0x19e0   : > { %v2994_v35 = vmul.f32 %v2986_v28, %v5781_v13  ;;  %v2996_v41 = vmul.f32 %v2988_v19, %v5783_v10  ;;  %v2998_v52 = vadd.f32 %v2990_v44, %v5773_v7  ;;  %v3000_v5 = vadd.f32 %v2992_v42, %v5775_v38 }
0x19e1   : > { %v3005_v2 = vmul.f32 0.7978846, %v2997_v12  ;;  %v3007_v1 = vmul.f32 0.7978846, %v2999_v61  ;;  %v3001_v48 = vadd.f32 %v2993_v20, %v2918_v14  ;;  %v3003_v50 = vadd.f32 %v2995_v60, %v2961_v51 }
0x19e2   : > { %v3002_v31 = vadd.f32 %v2994_v35, %v5781_v13  ;;  %v3006_v55 = vmul.f32 0.7978846, %v2998_v52  ;;  %v3004_v11 = vadd.f32 %v2996_v41, %v5783_v10  ;;  %v3008_v24 = vmul.f32 0.7978846, %v3000_v5 }
0x19e3   : > { %4353 = vtanh.f32 %v3005_v2  ;;  %v3009_v54 = vmul.f32 0.7978846, %v3001_v48  ;;  %v3011_v4 = vmul.f32 0.7978846, %v3003_v50  ;;  %v2965_v34 = vmul.f32 0.5, %v5769_v15 }
0x19e4   : > { %4355 = vtanh.f32 %v3007_v1  ;;  %v3010_v22 = vmul.f32 0.7978846, %v3002_v31  ;;  %v3012_v3 = vmul.f32 0.7978846, %v3004_v11  ;;  %v2969_v6 = vmul.f32 0.5, %v2918_v14 }
0x19e5   : > { %4357 = vtanh.f32 %v3009_v54  ;;  %v2967_v32 = vmul.f32 0.5, %v5771_v56  ;;  %v2971_v27 = vmul.f32 0.5, %v2961_v51  ;;  %v2966_v47 = vmul.f32 0.5, %v5773_v7 }
0x19e6   : > { %4359 = vtanh.f32 %v3011_v4  ;;  %v2970_v33 = vmul.f32 0.5, %v5781_v13  ;;  %v2968_v14 = vmul.f32 0.5, %v5775_v38  ;;  %v2972_v21 = vmul.f32 0.5, %v5783_v10  ;;  %v3643_v38 = vld [vmem:[%s5987_s7] ss:$0 sm:$0xff] }
0x19e7   : > { %4361 = vtanh.f32 %v3006_v55 }
0x19e8   : > { %4363 = vtanh.f32 %v3010_v22 }
0x19e9   : > { %4365 = vtanh.f32 %v3008_v24 }
0x19ea   : > { %4367 = vtanh.f32 %v3012_v3 }
0x19ed   : > { %v4354_v36 = vpop.eup %4353 }
0x19ee   : > { %v4356_v30 = vpop.eup %4355  ;;  %v3021_v8 = vadd.f32 1.0, %v4354_v36 }
0x19ef   : > { %v4358_v57 = vpop.eup %4357  ;;  %v3023_v39 = vadd.f32 1.0, %v4356_v30 }
0x19f0   : > { %v4360_v29 = vpop.eup %4359  ;;  %v3025_v58 = vadd.f32 1.0, %v4358_v57  ;;  %v3029_v49 = vmul.f32 %v3021_v8, %v2965_v34 }
0x19f1   : > { %v4362_v0 = vpop.eup %4361  ;;  %v3027_v17 = vadd.f32 1.0, %v4360_v29  ;;  %v3031_v25 = vmul.f32 %v3023_v39, %v2967_v32 }
0x19f2   : > { %v4364_v40 = vpop.eup %4363  ;;  %v3022_v9 = vadd.f32 1.0, %v4362_v0  ;;  %v3033_v53 = vmul.f32 %v3025_v58, %v2969_v6 }
0x19f3   : > { %v4366_v23 = vpop.eup %4365  ;;  %v3026_v43 = vadd.f32 1.0, %v4364_v40  ;;  %v3035_v45 = vmul.f32 %v3027_v17, %v2971_v27 }
0x19f4   : > { %v4368_v15 = vpop.eup %4367  ;;  %v3024_v56 = vadd.f32 1.0, %v4366_v23  ;;  %v3037_v51 = vpack.c.bf16 %v3033_v53, %v3029_v49  ;;  %v3030_v46 = vmul.f32 %v3022_v9, %v2966_v47 }
0x19f5   : > { %v3034_v18 = vmul.f32 %v3026_v43, %v2970_v33  ;;  %v3028_v63 = vadd.f32 1.0, %v4368_v15  ;;  %v3039_v7 = vpack.c.bf16 %v3035_v45, %v3031_v25 }
0x19f6   : > { %v3032_v37 = vmul.f32 %v3024_v56, %v2968_v14 }
0x19f7   : > { %v3038_v16 = vpack.c.bf16 %v3034_v18, %v3030_v46  ;;  %v3036_v59 = vmul.f32 %v3028_v63, %v2972_v21 }
0x19f9   : > { %3336 = vmatprep.mubr.bf16.mxu1 %v3038_v16  ;;  %v3040_v44 = vpack.c.bf16 %v3036_v59, %v3032_v37 }
0x19fa   : > { %3337 = vmatmul.mubr.bf16.vlgmr.msra.gmra.mrb[4].mxu1 %v3037_v51 }
0x19fb   : > { %3377 = vmatprep.mubr.bf16.mxu0 %v3040_v44 }
0x19fc   : > { %3378 = vmatmul.mubr.bf16.vlgmr.msra.gmra.mrb[8].mxu0 %v3039_v7 }
0x1acd   : > { %v3764_v13 = vpop.f32.mrb[4].mxu1 }
0x1ace   : > { %v3765_v10 = vpop.f32.mrb[5].mxu1 }
0x1acf   : > { %v3786_v42 = vpop.f32.mrb[8].mxu0  ;;  %v3766_v28 = vadd.f32 %v3765_v10, %v3764_v13  ;;  %v3767_v19 = vpop.f32.mrb[6].mxu1 }
0x1ad0   : > { %v3787_v12 = vpop.f32.mrb[9].mxu0  ;;  %v3768_v61 = vpop.f32.mrb[7].mxu1 }
0x1ad1   : > { %v3339_v20 = vadd.f32 %v3766_v28, %v3643_v38  ;;  %v3788_v60 = vadd.f32 %v3787_v12, %v3786_v42  ;;  %v3789_v35 = vpop.f32.mrb[10].mxu0  ;;  %v3769_v41 = vadd.f32 %v3768_v61, %v3767_v19 }
0x1ad2   : > { %v3790_v2 = vpop.f32.mrb[11].mxu0 }
0x1ad3   : > { %v3380_v1 = vadd.f32 %v3788_v60, %v3339_v20  ;;  %v3342_v48 = vadd.f32 %v3769_v41, %v3643_v38  ;;  %v3791_v50 = vadd.f32 %v3790_v2, %v3789_v35 }
0x1ad5   : > { %v3386_v52 = vadd.f32 %v3380_v1, %v5622_v62  ;;  %v3383_v31 = vadd.f32 %v3791_v50, %v3342_v48 }
0x1ad7   : > { %3388 = vst [vmem:[%s4891_s3] sm:$0xff] %v3386_v52  ;;  %v3387_v54 = vadd.f32 %v3383_v31, %v5624_v26 }
0x1ad9   : > { %3389 = vst [vmem:[%s4891_s3 + $0x8] sm:$0xff] %v3387_v54 }
0x1ada PF: > { %s5988_s21 = sld [smem:[#allocation23_spill]]  ;;  %s3678_s22 = sshll.u32 %s4555_s30, 3 }
0x1adb   : > { %s3403_s18 = sadd.s32 %s3678_s22, %s4872_s19  ;;  %s3406_s15 = sshll.u32 %s4891_s3, 4  ;;  %s5821_s15 = int_to_ptr.vmem [resolvable:$true] %s3406_s15 }
0x1adc   : > { %s3679_s23 = sshll.u32 %s3403_s18, 7  ;;  %s5989_s27 = sld [smem:[#allocation34_spill]] }
0x1add   : > { %s5991_s29 = sand.u32 1, %s4539_s26   ;;  %s4453_s14 = scalar_lea.vmem %s5821_s15, 256 }
0x1ade   : > { %s5830_s16 = scalar_lea.sflag [#allocation8], %s5991_s29  ;;  %p4454_p5 = scmp.ne.s32.totalorder %s5821_s15, %s4453_s14 }
0x1adf   : > { %s4610_s3 = smov [#allocation12]  }
0x1ae0   : > { %p5992_p7 = scmp.ne.s32.totalorder %s5988_s21, 0  ;;  %s4457_s30 = sshll.u32 %s4610_s3, 4  ;;  %s4458_s30 = int_to_ptr.vmem [resolvable:$false] %s4457_s30 }
0x1ae1   : > { %s4459_s19 = scalar_lea.vmem %s4458_s30, 512  ;;  %p4460_p13 = scmp.lt.s32.totalorder %s5821_s15, %s4458_s30 }
0x1ae2   : > { %s5990_s12 = smov %s5989_s27  ;;  %s5826_s17 = scalar_lea.hbm %s5989_s27, %s3679_s23 }
0x1ae3   : > { %p4455_p9 = pnand %p4454_p5, %p5992_p7  ;;  %p4461_p0 = scmp.lt.s32.totalorder %s4459_s19, %s4453_s14 }
0x1ae5   : > { %p4456_p10 = pneg %p4455_p9  ;;  %p4462_p6 = por %p4461_p0, %p4460_p13 }
0x1ae7   : > { %p4463_p3 = pnand %p4462_p6, %p4456_p10 }
0x1ae9   : > { %4466 = shalt.err (!%p4463_p3)
}
0x1aea   : > { %s4467_s10 = scalar_lea.hbm %s5826_s17, 256  ;;  %s4471_s28 = scalar_lea.hbm %s5990_s12, 2048 }
0x1aeb   : > { %p4468_p1 = scmp.ne.s32.totalorder %s5826_s17, %s4467_s10  ;;  %p4472_p12 = scmp.lt.u32.totalorder %s5826_s17, %s5990_s12 }
0x1aec   : > { %p4473_p2 = scmp.lt.u32.totalorder %s4471_s28, %s4467_s10  ;;  %p4475_p5 = scmp.lt.u32.totalorder %s4467_s10, %s5826_s17 }
0x1aed   : > { %p4469_p8 = pnand %p4468_p1, %p5992_p7 }
0x1aee   : > { %p4474_p4 = por %p4473_p2, %p4472_p12 }
0x1aef   : > { %p4470_p11 = pneg %p4469_p8 }
0x1af0   : > { %p4476_p9 = por %p4475_p5, %p4474_p4 }
0x1af2   : > { %p4477_p10 = pnand %p4476_p9, %p4470_p11 }
0x1af4   : > { %4480 = shalt.err (!%p4477_p10)
}
0x1af5   : > { %s4611_s22 = smov 128   ;;  %s4612_s18 = smov 8  }
0x1af6   : > { %3972 = dma.vmem_to_hbm [thread:$0]  (%p5992_p7), %s5821_s15, 256, %s5826_s17, %s5830_s16, %s4611_s22, %s4611_s22, %s4612_s18  }
0x1af7 PF: > { %s5993_s23 = sld [smem:[#allocation21_spill]]  ;;  %s5994_s20 = sld [smem:[#allocation16_spill]] }
0x1af8   : > { %s5995_s8 = sld [smem:[#allocation25_spill]] }
0x1afd   : > { %p3994_p13 = scmp.ge.s32.totalorder %s5993_s23, 2  ;;  %s3421_s27 = sand.u32 1, %s5994_s20  }
0x1afe   : > { %p5996_p0 = scmp.ne.s32.totalorder %s5995_s8, 0  ;;  %s3422_s29 = scalar_lea.sflag [#allocation8], %s3421_s27 }
0x1b00   : > { %p3985_p6 = pnand %p3994_p13, %p5996_p0 }
0x1b02   : > { %4530 = dma.done.wait (!%p3985_p6), %s3422_s29, 256  }
0x1b03   : > { %4532 = vsyncadd (!%p3985_p6), %s3422_s29, 4294967040  ;;  %s28_s17 = sadd.s32 1, %s5993_s23   ;;  %s5997_s14 = sld [smem:[#allocation17_spill]] }
0x1b04   : > { %p25_p3 = scmp.ge.s32.totalorder %s28_s17, 18   ;;  %s5998_s27 = sld [smem:[#allocation27_spill]] }
0x1b05   : > { %s5999_s28 = sld [smem:[#allocation18_spill]]  ;;  %s6000_s29 = sld [smem:[#allocation19_spill]] }
0x1b06   : > { %s6001_s30 = sld [smem:[#allocation20_spill]]  ;;  %s6002_s21 = sld [smem:[#allocation22_spill]] }
0x1b07   : > { %s6003_s15 = sld [smem:[#allocation24_spill]]  ;;  %s6004_s16 = sld [smem:[#allocation26_spill]] }
0x1b08   : > { %s6005_s25 = smov %s4539_s26  ;;  %27 = sbr.rel (!%p25_p3) target bundleno = 15 (0xf), region = 135 }
0x1b09   : > { %s6006_s26 = smov %s5997_s14 }
0x1b0c   : > { %s6007_s14 = smov %s6002_s21 }
0x1b0f   :  { %3427 = vsyncpa [#allocation7], 1 }
0x1b10   :  { %3429 = vsyncpa [#allocation7 + $0x1], 1 }
0x1b11   :  { %3430 = vsyncpa [#allocation10], 1 }
0x1b12   :  { %3431 = vsyncpa [#allocation8], 1 }
0x1b13   :  { %3433 = vsyncpa [#allocation8 + $0x1], 1 }

</bundles_post_ra>
